<compile_context>
chip_gen: v7x
topology: tpu7x:2x2x1
jax: 0.10.0
libtpu: 0.0.40
codegen_flags: <defaults>
</compile_context>

<pallas_src>
import functools

import jax
import jax.numpy as jnp
from jax import lax
from jax.experimental import pallas as pl
from jax.experimental.pallas import tpu as pltpu


# ---------------------------------------------------------------------------
# Fused PReLU + 3x3 conv kernel (stride 1 with in-kernel zero padding, or
# native stride 2 on parity planes), im2col + 3 dy-grouped MXU matmuls.
# ---------------------------------------------------------------------------
def _prelu_conv3x3_kernel(alpha_ref, *refs, stride, apply_prelu):
    """Computes one (row-tile, full-width) output block of PReLU -> Conv3x3.

    refs layout after alpha (SMEM (1,) f32):
      stride 1: x (H, W, Cin), w (3, 3*Cin, Cout) bf16, b (1, Cout) f32,
                out (TH, W, Cout), scratch xpad (TH+2, W+2, Cin) bf16,
                scratch xs (TH+2, W, 3*Cin) bf16.
      stride 2: p00 p01 p10 p11 parity planes (H/2+1, W/2+1, Cin), w, b,
                out (TH, W/2, Cout), scratch xs0/xs1 (TH+1, W/2, 3*Cin) bf16.
    """
    def act(v):
        # PReLU applied exactly once per needed input element, then cast to
        # bf16 for the MXU (f32 only for the network's raw f32 input layer).
        if apply_prelu:
            a = alpha_ref[0].astype(v.dtype)
            v = jnp.where(v >= 0, v, a * v)
        return v.astype(jnp.bfloat16)

    t = pl.program_id(1)
    nt = pl.num_programs(1)

    if stride == 1:
        x_ref, w_ref, b_ref, o_ref, xpad_ref, xs_ref = refs
        th, w_out, cout = o_ref.shape
        cin = x_ref.shape[-1]
        r0 = pl.multiple_of(t * th, th)

        # ---- PReLU'd, zero-padded bf16 window (padding done in-kernel) ----
        zero_col = jnp.zeros((th + 2, 1, cin), jnp.bfloat16)
        xpad_ref[:, 0:1, :] = zero_col
        xpad_ref[:, w_out + 1:w_out + 2, :] = zero_col
        xpad_ref[1:th + 1, 1:w_out + 1, :] = act(x_ref[pl.ds(r0, th), :, :])

        @pl.when(t == 0)
        def _():
            xpad_ref[0:1, :, :] = jnp.zeros((1, w_out + 2, cin), jnp.bfloat16)

        @pl.when(t > 0)
        def _():
            xpad_ref[0:1, 1:w_out + 1, :] = act(x_ref[pl.ds(r0 - 1, 1), :, :])

        @pl.when(t == nt - 1)
        def _():
            xpad_ref[th + 1:th + 2, :, :] = jnp.zeros((1, w_out + 2, cin),
                                                      jnp.bfloat16)

        @pl.when(t < nt - 1)
        def _():
            xpad_ref[th + 1:th + 2, 1:w_out + 1, :] = act(
                x_ref[pl.ds(r0 + th, 1), :, :])

        # ---- dx-shifted im2col: slot dx lives at channels [dx*Cin, (dx+1)*Cin)
        for dx in range(3):
            xs_ref[:, :, dx * cin:(dx + 1) * cin] = xpad_ref[:, dx:dx + w_out, :]

        dy_views = [xs_ref[dy:dy + th, :, :] for dy in range(3)]

    else:
        p00, p01, p10, p11, w_ref, b_ref, o_ref, xs0_ref, xs1_ref = refs
        planes = ((p00, p01), (p10, p11))          # [row_parity][col_parity]
        xs = (xs0_ref, xs1_ref)
        th, w_out, cout = o_ref.shape
        cin = p00.shape[-1]
        r0 = pl.multiple_of(t * th, th)

        # stride-2 tap (dy, dx) on the zero-padded input reads
        # plane(dy%2, dx%2)[oy + dy//2, ox + dx//2]; per row-parity the dx
        # slots are (plane cp=0, co=0), (cp=1, co=0), (cp=0, co=1).
        for rp in range(2):
            for slot, (cp, co) in enumerate(((0, 0), (1, 0), (0, 1))):
                win = planes[rp][cp][pl.ds(r0, th + 1), co:co + w_out, :]
                xs[rp][:, :, slot * cin:(slot + 1) * cin] = act(win)

        dy_views = [xs[dy % 2][dy // 2:dy // 2 + th, :, :] for dy in range(3)]

    # ---- 3 dy-grouped K=3*Cin matmuls, accumulated in registers/MRB (no
    # VMEM accumulator RMW); bias added once; single store to o_ref. ----
    acc = None
    for dy in range(3):
        patch = dy_views[dy].reshape(th * w_out, 3 * cin)
        d = jnp.dot(patch, w_ref[dy], preferred_element_type=jnp.float32)
        acc = d if acc is None else acc + d
    acc = acc + b_ref[...]
    o_ref[...] = acc.reshape(th, w_out, cout).astype(o_ref.dtype)


def _pick_row_tile(h_out, bytes_per_row, *, budget=8 << 20, forced=None):
    """Largest divisor of h_out whose per-tile buffers fit the VMEM budget."""
    if forced is not None:
        assert h_out % forced == 0, (h_out, forced)
        return forced
    best = 1
    for cand in range(1, h_out + 1):
        if h_out % cand == 0 and cand * bytes_per_row <= budget:
            best = cand
    return best


def prelu_conv3x3(x, conv, alpha, *, apply_prelu=True, stride=1,
                  out_dtype=jnp.bfloat16, row_tile=None):
    """x: (N, H, W, Cin) float -> (N, H/stride, W/stride, Cout) out_dtype."""
    N, H, W, Cin = x.shape
    w, b = conv["w"], conv["b"]
    Cout = w.shape[-1]

    # dy-grouped weights: w3[dy] is (3*Cin, Cout), dx-major / cin-minor rows,
    # matching the im2col channel-slot layout built in the kernel.
    w3 = w.reshape(3, 3 * Cin, Cout).astype(jnp.bfloat16)
    b2 = b.reshape(1, Cout).astype(jnp.float32)
    alpha = alpha.reshape(1).astype(jnp.float32)

    if stride == 1:
        H_out, W_out = H, W
        planes = [x]                  # unpadded; zero border handled in-kernel
    else:
        assert stride == 2 and H % 2 == 0 and W % 2 == 0
        H_out, W_out = H // 2, W // 2
        # TODO(synk): fold this pad + parity de-interleave into the kernel's
        # scratch fill (as done for stride 1) to drop the extra HBM round trip.
        xp = jnp.pad(x, ((0, 0), (1, 1), (1, 1), (0, 0)))
        planes = [xp[:, 0::2, 0::2, :], xp[:, 0::2, 1::2, :],
                  xp[:, 1::2, 0::2, :], xp[:, 1::2, 1::2, :]]

    n_planes = len(planes)
    plane_shape = tuple(planes[0].shape[1:])
    out_itemsize = jnp.dtype(out_dtype).itemsize

    row_bytes = (6 * W_out * Cin * 2                 # bf16 im2col scratches
                 + 2 * W_out * Cout * out_itemsize   # double-buffered out block
                 + W_out * Cout * 4)                 # f32 matmul result
    TH = _pick_row_tile(H_out, row_bytes, forced=row_tile)
    T = H_out // TH

    kernel = functools.partial(_prelu_conv3x3_kernel, stride=stride,
                               apply_prelu=apply_prelu)

    in_specs = [pl.BlockSpec(memory_space=pltpu.MemorySpace.SMEM)]   # alpha
    for _ in range(n_planes):
        # Full plane resident per batch element (block index constant along t).
        # TODO(synk): halo-blocked row-tile input DMA for production
        # resolutions on v7x (64 MiB VMEM); full residency is fine at small H*W.
        in_specs.append(pl.BlockSpec((None,) + plane_shape,
                                     lambda n, t: (n, 0, 0, 0)))
    in_specs.append(pl.BlockSpec((3, 3 * Cin, Cout), lambda n, t: (0, 0, 0)))
    in_specs.append(pl.BlockSpec((1, Cout), lambda n, t: (0, 0)))

    # TODO(synk): lane-dense output (W_out*Cout on lanes) for the Cout=3 final
    # conv to avoid masked partial stores at full resolution.
    out_specs = pl.BlockSpec((None, TH, W_out, Cout), lambda n, t: (n, t, 0, 0))

    if stride == 1:
        scratch_shapes = [pltpu.VMEM((TH + 2, W_out + 2, Cin), jnp.bfloat16),
                          pltpu.VMEM((TH + 2, W_out, 3 * Cin), jnp.bfloat16)]
        scratch_bytes = ((TH + 2) * (W_out + 2) * Cin
                         + (TH + 2) * W_out * 3 * Cin) * 2
    else:
        scratch_shapes = [pltpu.VMEM((TH + 1, W_out, 3 * Cin), jnp.bfloat16)
                          for _ in range(2)]
        scratch_bytes = 2 * (TH + 1) * W_out * 3 * Cin * 2

    resident = (n_planes * plane_shape[0] * plane_shape[1] * Cin
                * x.dtype.itemsize)
    est = (2 * resident                                  # pipelined input planes
           + 2 * TH * W_out * Cout * out_itemsize        # pipelined output block
           + scratch_bytes
           + TH * W_out * Cout * 4                       # f32 matmul result
           + 2 * (9 * Cin * Cout * 2 + Cout * 4))        # weights + bias
    # TODO(synk): pipeline_mode=pl.Buffered(1) on the constant-index inputs
    # would halve the resident-plane term (v7x enabler).
    vmem_limit = int(min(56 << 20, max(16 << 20, int(1.3 * est))))

    return pl.pallas_call(
        kernel,
        out_shape=jax.ShapeDtypeStruct((N, H_out, W_out, Cout), out_dtype),
        grid=(N, T),
        in_specs=in_specs,
        out_specs=out_specs,
        scratch_shapes=scratch_shapes,
        compiler_params=pltpu.CompilerParams(
            dimension_semantics=("parallel", "parallel"),
            vmem_limit_bytes=vmem_limit),
    )(alpha, *planes, w3, b2)


# ---------------------------------------------------------------------------
# Gather-free bilinear 2x upsample (align_corners=False), plain JAX glue
# ---------------------------------------------------------------------------
def upsample_bilinear_2x(x):
    """out[2i] = 0.75*x[i] + 0.25*x[i-1], out[2i+1] = 0.75*x[i] + 0.25*x[i+1]
    (indices clamped at the borders), applied separably along H then W.
    Matches torch nn.Upsample(scale_factor=2, mode='bilinear',
    align_corners=False).  Runs in bf16 on inter-layer activations.
    TODO(synk): fuse this fixed 2-phase interpolation into the following conv
    kernel's scratch fill to remove one HBM round trip per UpSamplingBlock.
    """
    def up_axis(v, axis):
        size = v.shape[axis]
        head = lax.slice_in_dim(v, 0, 1, axis=axis)
        tail = lax.slice_in_dim(v, size - 1, size, axis=axis)
        prev = jnp.concatenate(
            [head, lax.slice_in_dim(v, 0, size - 1, axis=axis)], axis=axis)
        nxt = jnp.concatenate(
            [lax.slice_in_dim(v, 1, size, axis=axis), tail], axis=axis)
        even = 0.75 * v + 0.25 * prev
        odd = 0.75 * v + 0.25 * nxt
        out = jnp.stack([even, odd], axis=axis + 1)
        new_shape = list(v.shape)
        new_shape[axis] = 2 * size
        return out.reshape(new_shape)

    return up_axis(up_axis(x, 1), 2)


# ---------------------------------------------------------------------------
# GridNet blocks
# ---------------------------------------------------------------------------
def lateral_block(p, x):
    # TODO(synk): fuse conv1->conv2 (+ residual/skip) into one pallas_call
    # holding the intermediate activation in VMEM scratch (needs 2-row halo
    # recompute per tile).
    h = prelu_conv3x3(x, p["conv1"], p["a1"], apply_prelu=True)
    h = prelu_conv3x3(h, p["conv2"], p["a2"], apply_prelu=True)
    if "skip" in p:
        x = prelu_conv3x3(x, p["skip"], jnp.zeros((1,), jnp.float32),
                          apply_prelu=False)
    return h + x.astype(h.dtype)


def down_block(p, x):
    h = prelu_conv3x3(x, p["conv1"], p["a1"], apply_prelu=True, stride=2)
    h = prelu_conv3x3(h, p["conv2"], p["a2"], apply_prelu=True)
    return h


def up_block(p, x):
    x = upsample_bilinear_2x(x)
    h = prelu_conv3x3(x, p["conv1"], p["a1"], apply_prelu=True)
    h = prelu_conv3x3(h, p["conv2"], p["a2"], apply_prelu=True)
    return h


# ---------------------------------------------------------------------------
# Parameter initialization (deterministic, synthetic)
# ---------------------------------------------------------------------------
def _conv_init(key, cin, cout):
    kw, kb = jax.random.split(key)
    w = jax.random.normal(kw, (3, 3, cin, cout), jnp.float32) / jnp.sqrt(9.0 * cin)
    b = jax.random.normal(kb, (cout,), jnp.float32) * 0.01
    return {"w": w, "b": b}


def _prelu_init():
    return jnp.full((1,), 0.25, jnp.float32)  # nn.PReLU() default


def init_gridnet(key, in_chs, out_chs, grid_chs=(32, 64, 96)):
    n_row, n_col = 3, 6
    assert len(grid_chs) == n_row
    counter = [0]

    def nk():
        counter[0] += 1
        return jax.random.fold_in(key, counter[0])

    def lateral(cin, cout):
        p = {"a1": _prelu_init(), "conv1": _conv_init(nk(), cin, cout),
             "a2": _prelu_init(), "conv2": _conv_init(nk(), cout, cout)}
        if cin != cout:
            p["skip"] = _conv_init(nk(), cin, cout)
        return p

    def downup(cin, cout):
        return {"a1": _prelu_init(), "conv1": _conv_init(nk(), cin, cout),
                "a2": _prelu_init(), "conv2": _conv_init(nk(), cout, cout)}

    params = {"lateral_init": lateral(in_chs, grid_chs[0])}
    for r, n_ch in enumerate(grid_chs):
        for c in range(n_col - 1):
            params[f"lateral_{r}_{c}"] = lateral(n_ch, n_ch)
    for r, (ci, co) in enumerate(zip(grid_chs[:-1], grid_chs[1:])):
        for c in range(n_col // 2):
            params[f"down_{r}_{c}"] = downup(ci, co)
    for r, (ci, co) in enumerate(zip(grid_chs[1:], grid_chs[:-1])):
        for c in range(n_col // 2):
            params[f"up_{r}_{c}"] = downup(ci, co)
    params["lateral_final"] = lateral(grid_chs[0], out_chs)
    return params


# ---------------------------------------------------------------------------
# GridNet forward (mirrors the PyTorch forward graph exactly)
# ---------------------------------------------------------------------------
def gridnet_forward(params, x):
    s00 = lateral_block(params["lateral_init"], x)
    s10 = down_block(params["down_0_0"], s00)
    s20 = down_block(params["down_1_0"], s10)

    s01 = lateral_block(params["lateral_0_0"], s00)
    s11 = down_block(params["down_0_1"], s01) + lateral_block(params["lateral_1_0"], s10)
    s21 = down_block(params["down_1_1"], s11) + lateral_block(params["lateral_2_0"], s20)

    s02 = lateral_block(params["lateral_0_1"], s01)
    s12 = down_block(params["down_0_2"], s02) + lateral_block(params["lateral_1_1"], s11)
    s22 = down_block(params["down_1_2"], s12) + lateral_block(params["lateral_2_1"], s21)

    s23 = lateral_block(params["lateral_2_2"], s22)
    s13 = up_block(params["up_1_0"], s23) + lateral_block(params["lateral_1_2"], s12)
    s03 = up_block(params["up_0_0"], s13) + lateral_block(params["lateral_0_2"], s02)

    s24 = lateral_block(params["lateral_2_3"], s23)
    s14 = up_block(params["up_1_1"], s24) + lateral_block(params["lateral_1_3"], s13)
    s04 = up_block(params["up_0_1"], s14) + lateral_block(params["lateral_0_3"], s03)

    s25 = lateral_block(params["lateral_2_4"], s24)
    s15 = up_block(params["up_1_2"], s25) + lateral_block(params["lateral_1_4"], s14)
    s05 = up_block(params["up_0_2"], s15) + lateral_block(params["lateral_0_4"], s04)

    out = lateral_block(params["lateral_final"], s05)
    return out.astype(jnp.float32)


# ---------------------------------------------------------------------------
# Pure-JAX reference for the fused PReLU+conv kernel (unit check)
# ---------------------------------------------------------------------------
def _conv_reference(x, conv, alpha, *, apply_prelu, stride):
    h = x
    if apply_prelu:
        h = jnp.where(h >= 0, h, alpha[0] * h)
    h = h.astype(jnp.bfloat16)
    w = conv["w"].astype(jnp.bfloat16)
    out = lax.conv_general_dilated(
        h, w, window_strides=(stride, stride), padding=((1, 1), (1, 1)),
        dimension_numbers=("NHWC", "HWIO", "NHWC"),
        preferred_element_type=jnp.float32)
    return out + conv["b"].astype(jnp.float32)


if __name__ == "__main__":
    key = jax.random.PRNGKey(0)
    pkey, xkey, ckey = jax.random.split(key, 3)

    # --- kernel unit checks against lax.conv (stride 1/2, tiled/untiled) ---
    cx = jax.random.normal(jax.random.fold_in(ckey, 0), (2, 32, 16, 12),
                           jnp.float32)
    cconv = _conv_init(jax.random.fold_in(ckey, 1), 12, 24)
    calpha = jnp.full((1,), 0.25, jnp.float32)
    cases = [
        (1, True, None),   # stride 1, single row tile (t==0 and t==T-1 paths)
        (1, True, 8),      # stride 1, 4 row tiles (exercises halo pl.when)
        (1, False, 4),     # stride 1, no PReLU (skip-conv path), tiled
        (2, True, None),   # stride 2, single tile
        (2, True, 4),      # stride 2, tiled
    ]
    for stride, use_prelu, rt in cases:
        got = prelu_conv3x3(cx, cconv, calpha, apply_prelu=use_prelu,
                            stride=stride, row_tile=rt)
        want = _conv_reference(cx, cconv, calpha, apply_prelu=use_prelu,
                               stride=stride)
        jax.block_until_ready(got)
        assert got.shape == want.shape, (got.shape, want.shape)
        err = float(jnp.max(jnp.abs(got.astype(jnp.float32) - want)))
        assert err < 1e-1, (stride, use_prelu, rt, err)

    # bf16 inter-layer activation path (compile + run coverage)
    got_bf = prelu_conv3x3(cx.astype(jnp.bfloat16), cconv, calpha)
    jax.block_until_ready(got_bf)
    assert got_bf.dtype == jnp.bfloat16

    # --- full GridNet forward smoke test ---
    in_chs, out_chs = 4, 3
    grid_chs = (8, 16, 32)          # small scale streams for the smoke test
    params = init_gridnet(pkey, in_chs, out_chs, grid_chs)

    # PyTorch-style NCHW input, transposed to NHWC for the kernels.
    x_nchw = jax.random.normal(xkey, (2, in_chs, 16, 16), jnp.float32)
    x = jnp.transpose(x_nchw, (0, 2, 3, 1))

    fwd = jax.jit(gridnet_forward)
    y = fwd(params, x)
    jax.block_until_ready(y)

    assert y.shape == (2, 16, 16, out_chs), y.shape
    assert bool(jnp.all(jnp.isfinite(y)))
    print("KERNEL_OK")
</pallas_src>

<mosaic_0001>
module attributes {stable_mosaic.version = 11 : i64} {
  func.func @_prelu_conv3x3_kernel(%arg0: i32, %arg1: i32, %arg2: memref<1xf32, #tpu.memory_space<smem>>, %arg3: memref<1x32x16x12xf32, #tpu.memory_space<vmem>>, %arg4: memref<3x36x24xbf16, #tpu.memory_space<vmem>>, %arg5: memref<1x24xf32, #tpu.memory_space<vmem>>, %arg6: memref<1x32x16x24xbf16, #tpu.memory_space<vmem>>, %arg7: memref<34x18x12xbf16, #tpu.memory_space<vmem>>, %arg8: memref<34x16x36xbf16, #tpu.memory_space<vmem>>) attributes {dimension_semantics = [#tpu.dimension_semantics<parallel>, #tpu.dimension_semantics<parallel>], iteration_bounds = array<i64: 2, 1>, scalar_prefetch = 0 : i64, scratch_operands = 2 : i64, tpu.core_type = #tpu.core_type<tc>, window_params = [{transform_indices = @transform_0, window_bounds = array<i64: 1>}, {transform_indices = @transform_1, window_bounds = array<i64: 1, 32, 16, 12>}, {pipeline_mode = #tpu.pipeline_mode<synchronous>, transform_indices = @transform_2, window_bounds = array<i64: 3, 36, 24>}, {pipeline_mode = #tpu.pipeline_mode<synchronous>, transform_indices = @transform_3, window_bounds = array<i64: 1, 24>}, {transform_indices = @transform_4, window_bounds = array<i64: 1, 32, 16, 24>}]} {
    %c32_i32 = arith.constant 32 : i32
    %0 = arith.muli %arg1, %c32_i32 : i32
    %1 = tpu.assume_multiple %0, 32 : i32
    %cst = arith.constant 0.000000e+00 : bf16
    %2 = vector.broadcast %cst : bf16 to vector<34x1x12xbf16>
    %c0 = arith.constant 0 : index
    %c0_0 = arith.constant 0 : index
    %c0_1 = arith.constant 0 : index
    %3 = vector.load %arg7[%c0, %c0_0, %c0_1] : memref<34x18x12xbf16, #tpu.memory_space<vmem>>, vector<34x1x12xbf16>
    tpu.vector_store %arg7[%c0, %c0_0, %c0_1], %2 {strides = array<i32>} : memref<34x18x12xbf16, #tpu.memory_space<vmem>>, vector<34x1x12xbf16>,
    %c0_2 = arith.constant 0 : index
    %c17 = arith.constant 17 : index
    %c0_3 = arith.constant 0 : index
    %4 = vector.load %arg7[%c0_2, %c17, %c0_3] : memref<34x18x12xbf16, #tpu.memory_space<vmem>>, vector<34x1x12xbf16>
    tpu.vector_store %arg7[%c0_2, %c17, %c0_3], %2 {strides = array<i32>} : memref<34x18x12xbf16, #tpu.memory_space<vmem>>, vector<34x1x12xbf16>,
    %c0_4 = arith.constant 0 : index
    %5 = arith.index_cast %1 : i32 to index
    %c0_5 = arith.constant 0 : index
    %c0_6 = arith.constant 0 : index
    %6 = vector.load %arg3[%c0_4, %5, %c0_5, %c0_6] : memref<1x32x16x12xf32, #tpu.memory_space<vmem>>, vector<1x32x16x12xf32>
    %7 = vector.shape_cast %6 : vector<1x32x16x12xf32> to vector<32x16x12xf32>
    %c0_7 = arith.constant 0 : index
    %8 = memref.load %arg2[%c0_7] : memref<1xf32, #tpu.memory_space<smem>>
    %cst_8 = arith.constant 0.000000e+00 : f32
    %9 = vector.broadcast %cst_8 : f32 to vector<32x16x12xf32>
    %10 = arith.cmpf oge, %7, %9 : vector<32x16x12xf32>
    %11 = vector.broadcast %8 : f32 to vector<32x16x12xf32>
    %12 = arith.mulf %11, %7 : vector<32x16x12xf32>
    %13 = arith.select %10, %7, %12 : vector<32x16x12xi1>, vector<32x16x12xf32>
    %14 = arith.truncf %13 : vector<32x16x12xf32> to vector<32x16x12xbf16>
    %c1 = arith.constant 1 : index
    %c1_9 = arith.constant 1 : index
    %c0_10 = arith.constant 0 : index
    %15 = vector.load %arg7[%c1, %c1_9, %c0_10] : memref<34x18x12xbf16, #tpu.memory_space<vmem>>, vector<32x16x12xbf16>
    tpu.vector_store %arg7[%c1, %c1_9, %c0_10], %14 {strides = array<i32>} : memref<34x18x12xbf16, #tpu.memory_space<vmem>>, vector<32x16x12xbf16>,
    %c0_i32 = arith.constant 0 : i32
    %16 = arith.cmpi eq, %arg1, %c0_i32 : i32
    %17 = arith.extui %16 : i1 to i32
    %c0_i32_11 = arith.constant 0 : i32
    %18 = arith.cmpi ne, %17, %c0_i32_11 : i32
    scf.if %18 {
      %cst_60 = arith.constant 0.000000e+00 : bf16
      %59 = vector.broadcast %cst_60 : bf16 to vector<1x18x12xbf16>
      %c0_61 = arith.constant 0 : index
      %c0_62 = arith.constant 0 : index
      %c0_63 = arith.constant 0 : index
      %60 = vector.load %arg7[%c0_61, %c0_62, %c0_63] : memref<34x18x12xbf16, #tpu.memory_space<vmem>>, vector<1x18x12xbf16>
      tpu.vector_store %arg7[%c0_61, %c0_62, %c0_63], %59 {strides = array<i32>} : memref<34x18x12xbf16, #tpu.memory_space<vmem>>, vector<1x18x12xbf16>,
    } else {
    }
    %c0_i32_12 = arith.constant 0 : i32
    %19 = arith.cmpi sgt, %arg1, %c0_i32_12 : i32
    %20 = arith.extui %19 : i1 to i32
    %c0_i32_13 = arith.constant 0 : i32
    %21 = arith.cmpi ne, %20, %c0_i32_13 : i32
    scf.if %21 {
      %c1_i32 = arith.constant 1 : i32
      %59 = arith.subi %1, %c1_i32 : i32
      %c0_60 = arith.constant 0 : index
      %60 = arith.index_cast %59 : i32 to index
      %c0_61 = arith.constant 0 : index
      %c0_62 = arith.constant 0 : index
      %61 = vector.load %arg3[%c0_60, %60, %c0_61, %c0_62] : memref<1x32x16x12xf32, #tpu.memory_space<vmem>>, vector<1x1x16x12xf32>
      %62 = vector.shape_cast %61 : vector<1x1x16x12xf32> to vector<1x16x12xf32>
      %c0_63 = arith.constant 0 : index
      %63 = memref.load %arg2[%c0_63] : memref<1xf32, #tpu.memory_space<smem>>
      %cst_64 = arith.constant 0.000000e+00 : f32
      %64 = vector.broadcast %cst_64 : f32 to vector<1x16x12xf32>
      %65 = arith.cmpf oge, %62, %64 : vector<1x16x12xf32>
      %66 = vector.broadcast %63 : f32 to vector<1x16x12xf32>
      %67 = arith.mulf %66, %62 : vector<1x16x12xf32>
      %68 = arith.select %65, %62, %67 : vector<1x16x12xi1>, vector<1x16x12xf32>
      %69 = arith.truncf %68 : vector<1x16x12xf32> to vector<1x16x12xbf16>
      %c0_65 = arith.constant 0 : index
      %c1_66 = arith.constant 1 : index
      %c0_67 = arith.constant 0 : index
      %70 = vector.load %arg7[%c0_65, %c1_66, %c0_67] : memref<34x18x12xbf16, #tpu.memory_space<vmem>>, vector<1x16x12xbf16>
      tpu.vector_store %arg7[%c0_65, %c1_66, %c0_67], %69 {strides = array<i32>} : memref<34x18x12xbf16, #tpu.memory_space<vmem>>, vector<1x16x12xbf16>,
    } else {
    }
    %c0_i32_14 = arith.constant 0 : i32
    %22 = arith.cmpi eq, %arg1, %c0_i32_14 : i32
    %23 = arith.extui %22 : i1 to i32
    %c0_i32_15 = arith.constant 0 : i32
    %24 = arith.cmpi ne, %23, %c0_i32_15 : i32
    scf.if %24 {
      %cst_60 = arith.constant 0.000000e+00 : bf16
      %59 = vector.broadcast %cst_60 : bf16 to vector<1x18x12xbf16>
      %c33 = arith.constant 33 : index
      %c0_61 = arith.constant 0 : index
      %c0_62 = arith.constant 0 : index
      %60 = vector.load %arg7[%c33, %c0_61, %c0_62] : memref<34x18x12xbf16, #tpu.memory_space<vmem>>, vector<1x18x12xbf16>
      tpu.vector_store %arg7[%c33, %c0_61, %c0_62], %59 {strides = array<i32>} : memref<34x18x12xbf16, #tpu.memory_space<vmem>>, vector<1x18x12xbf16>,
    } else {
    }
    %c0_i32_16 = arith.constant 0 : i32
    %25 = arith.cmpi slt, %arg1, %c0_i32_16 : i32
    %26 = arith.extui %25 : i1 to i32
    %c0_i32_17 = arith.constant 0 : i32
    %27 = arith.cmpi ne, %26, %c0_i32_17 : i32
    scf.if %27 {
      %c32_i32_60 = arith.constant 32 : i32
      %59 = arith.addi %1, %c32_i32_60 : i32
      %c0_61 = arith.constant 0 : index
      %60 = arith.index_cast %59 : i32 to index
      %c0_62 = arith.constant 0 : index
      %c0_63 = arith.constant 0 : index
      %61 = vector.load %arg3[%c0_61, %60, %c0_62, %c0_63] : memref<1x32x16x12xf32, #tpu.memory_space<vmem>>, vector<1x1x16x12xf32>
      %62 = vector.shape_cast %61 : vector<1x1x16x12xf32> to vector<1x16x12xf32>
      %c0_64 = arith.constant 0 : index
      %63 = memref.load %arg2[%c0_64] : memref<1xf32, #tpu.memory_space<smem>>
      %cst_65 = arith.constant 0.000000e+00 : f32
      %64 = vector.broadcast %cst_65 : f32 to vector<1x16x12xf32>
      %65 = arith.cmpf oge, %62, %64 : vector<1x16x12xf32>
      %66 = vector.broadcast %63 : f32 to vector<1x16x12xf32>
      %67 = arith.mulf %66, %62 : vector<1x16x12xf32>
      %68 = arith.select %65, %62, %67 : vector<1x16x12xi1>, vector<1x16x12xf32>
      %69 = arith.truncf %68 : vector<1x16x12xf32> to vector<1x16x12xbf16>
      %c33 = arith.constant 33 : index
      %c1_66 = arith.constant 1 : index
      %c0_67 = arith.constant 0 : index
      %70 = vector.load %arg7[%c33, %c1_66, %c0_67] : memref<34x18x12xbf16, #tpu.memory_space<vmem>>, vector<1x16x12xbf16>
      tpu.vector_store %arg7[%c33, %c1_66, %c0_67], %69 {strides = array<i32>} : memref<34x18x12xbf16, #tpu.memory_space<vmem>>, vector<1x16x12xbf16>,
    } else {
    }
    %c0_18 = arith.constant 0 : index
    %c0_19 = arith.constant 0 : index
    %c0_20 = arith.constant 0 : index
    %28 = vector.load %arg7[%c0_18, %c0_19, %c0_20] : memref<34x18x12xbf16, #tpu.memory_space<vmem>>, vector<34x16x12xbf16>
    %c0_21 = arith.constant 0 : index
    %c0_22 = arith.constant 0 : index
    %c0_23 = arith.constant 0 : index
    %29 = vector.load %arg8[%c0_21, %c0_22, %c0_23] : memref<34x16x36xbf16, #tpu.memory_space<vmem>>, vector<34x16x12xbf16>
    tpu.vector_store %arg8[%c0_21, %c0_22, %c0_23], %28 {strides = array<i32>} : memref<34x16x36xbf16, #tpu.memory_space<vmem>>, vector<34x16x12xbf16>,
    %c0_24 = arith.constant 0 : index
    %c1_25 = arith.constant 1 : index
    %c0_26 = arith.constant 0 : index
    %30 = vector.load %arg7[%c0_24, %c1_25, %c0_26] : memref<34x18x12xbf16, #tpu.memory_space<vmem>>, vector<34x16x12xbf16>
    %c0_27 = arith.constant 0 : index
    %c0_28 = arith.constant 0 : index
    %c12 = arith.constant 12 : index
    %31 = vector.load %arg8[%c0_27, %c0_28, %c12] : memref<34x16x36xbf16, #tpu.memory_space<vmem>>, vector<34x16x12xbf16>
    tpu.vector_store %arg8[%c0_27, %c0_28, %c12], %30 {strides = array<i32>} : memref<34x16x36xbf16, #tpu.memory_space<vmem>>, vector<34x16x12xbf16>,
    %c0_29 = arith.constant 0 : index
    %c2 = arith.constant 2 : index
    %c0_30 = arith.constant 0 : index
    %32 = vector.load %arg7[%c0_29, %c2, %c0_30] : memref<34x18x12xbf16, #tpu.memory_space<vmem>>, vector<34x16x12xbf16>
    %c0_31 = arith.constant 0 : index
    %c0_32 = arith.constant 0 : index
    %c24 = arith.constant 24 : index
    %33 = vector.load %arg8[%c0_31, %c0_32, %c24] : memref<34x16x36xbf16, #tpu.memory_space<vmem>>, vector<34x16x12xbf16>
    tpu.vector_store %arg8[%c0_31, %c0_32, %c24], %32 {strides = array<i32>} : memref<34x16x36xbf16, #tpu.memory_space<vmem>>, vector<34x16x12xbf16>,
    %c0_33 = arith.constant 0 : index
    %c0_34 = arith.constant 0 : index
    %c0_35 = arith.constant 0 : index
    %34 = vector.load %arg8[%c0_33, %c0_34, %c0_35] : memref<34x16x36xbf16, #tpu.memory_space<vmem>>, vector<32x16x36xbf16>
    %c1_36 = arith.constant 1 : index
    %c0_37 = arith.constant 0 : index
    %c0_38 = arith.constant 0 : index
    %35 = vector.load %arg8[%c1_36, %c0_37, %c0_38] : memref<34x16x36xbf16, #tpu.memory_space<vmem>>, vector<32x16x36xbf16>
    %c2_39 = arith.constant 2 : index
    %c0_40 = arith.constant 0 : index
    %c0_41 = arith.constant 0 : index
    %36 = vector.load %arg8[%c2_39, %c0_40, %c0_41] : memref<34x16x36xbf16, #tpu.memory_space<vmem>>, vector<32x16x36xbf16>
    %37 = vector.shape_cast %34 : vector<32x16x36xbf16> to vector<512x36xbf16>
    %c0_42 = arith.constant 0 : index
    %c0_43 = arith.constant 0 : index
    %c0_44 = arith.constant 0 : index
    %38 = vector.load %arg4[%c0_42, %c0_43, %c0_44] : memref<3x36x24xbf16, #tpu.memory_space<vmem>>, vector<1x36x24xbf16>
    %39 = vector.shape_cast %38 : vector<1x36x24xbf16> to vector<36x24xbf16>
    %cst_45 = arith.constant dense<0.000000e+00> : vector<512x24xf32>
    %40 = tpu.matmul %37, %39, %cst_45 {dimension_numbers = #tpu.dot_dimension_numbers<[1], [0], [0], [1], [0, 0, 1, 1], [], []>} : vector<512x36xbf16>, vector<36x24xbf16>, vector<512x24xf32> -> vector<512x24xf32>
    %41 = vector.shape_cast %35 : vector<32x16x36xbf16> to vector<512x36xbf16>
    %c1_46 = arith.constant 1 : index
    %c0_47 = arith.constant 0 : index
    %c0_48 = arith.constant 0 : index
    %42 = vector.load %arg4[%c1_46, %c0_47, %c0_48] : memref<3x36x24xbf16, #tpu.memory_space<vmem>>, vector<1x36x24xbf16>
    %43 = vector.shape_cast %42 : vector<1x36x24xbf16> to vector<36x24xbf16>
    %cst_49 = arith.constant dense<0.000000e+00> : vector<512x24xf32>
    %44 = tpu.matmul %41, %43, %cst_49 {dimension_numbers = #tpu.dot_dimension_numbers<[1], [0], [0], [1], [0, 0, 1, 1], [], []>} : vector<512x36xbf16>, vector<36x24xbf16>, vector<512x24xf32> -> vector<512x24xf32>
    %45 = arith.addf %40, %44 : vector<512x24xf32>
    %46 = vector.shape_cast %36 : vector<32x16x36xbf16> to vector<512x36xbf16>
    %c2_50 = arith.constant 2 : index
    %c0_51 = arith.constant 0 : index
    %c0_52 = arith.constant 0 : index
    %47 = vector.load %arg4[%c2_50, %c0_51, %c0_52] : memref<3x36x24xbf16, #tpu.memory_space<vmem>>, vector<1x36x24xbf16>
    %48 = vector.shape_cast %47 : vector<1x36x24xbf16> to vector<36x24xbf16>
    %cst_53 = arith.constant dense<0.000000e+00> : vector<512x24xf32>
    %49 = tpu.matmul %46, %48, %cst_53 {dimension_numbers = #tpu.dot_dimension_numbers<[1], [0], [0], [1], [0, 0, 1, 1], [], []>} : vector<512x36xbf16>, vector<36x24xbf16>, vector<512x24xf32> -> vector<512x24xf32>
    %50 = arith.addf %45, %49 : vector<512x24xf32>
    %c0_54 = arith.constant 0 : index
    %c0_55 = arith.constant 0 : index
    %51 = vector.load %arg5[%c0_54, %c0_55] : memref<1x24xf32, #tpu.memory_space<vmem>>, vector<1x24xf32>
    %52 = vector.broadcast %51 : vector<1x24xf32> to vector<512x24xf32>
    %53 = arith.addf %50, %52 : vector<512x24xf32>
    %54 = vector.shape_cast %53 : vector<512x24xf32> to vector<32x16x24xf32>
    %55 = arith.truncf %54 : vector<32x16x24xf32> to vector<32x16x24xbf16>
    %c0_56 = arith.constant 0 : index
    %c0_57 = arith.constant 0 : index
    %c0_58 = arith.constant 0 : index
    %c0_59 = arith.constant 0 : index
    %56 = vector.load %arg6[%c0_56, %c0_57, %c0_58, %c0_59] : memref<1x32x16x24xbf16, #tpu.memory_space<vmem>>, vector<1x32x16x24xbf16>
    %57 = vector.shape_cast %56 : vector<1x32x16x24xbf16> to vector<32x16x24xbf16>
    %58 = vector.shape_cast %55 : vector<32x16x24xbf16> to vector<1x32x16x24xbf16>
    tpu.vector_store %arg6[%c0_56, %c0_57, %c0_58, %c0_59], %58 {strides = array<i32>} : memref<1x32x16x24xbf16, #tpu.memory_space<vmem>>, vector<1x32x16x24xbf16>,
    return
  }
  func.func @transform_0(%arg0: i32, %arg1: i32) -> i32 {
    %c0_i32 = arith.constant 0 : i32
    %c0_i32_0 = arith.constant 0 : i32
    return %c0_i32 : i32
  }
  func.func @transform_1(%arg0: i32, %arg1: i32) -> (i32, i32, i32, i32) {
    %c0_i32 = arith.constant 0 : i32
    %c0_i32_0 = arith.constant 0 : i32
    %c0_i32_1 = arith.constant 0 : i32
    %c0_i32_2 = arith.constant 0 : i32
    return %arg0, %c0_i32, %c0_i32_0, %c0_i32_1 : i32, i32, i32, i32
  }
  func.func @transform_2(%arg0: i32, %arg1: i32) -> (i32, i32, i32) {
    %c0_i32 = arith.constant 0 : i32
    %c0_i32_0 = arith.constant 0 : i32
    %c0_i32_1 = arith.constant 0 : i32
    %c0_i32_2 = arith.constant 0 : i32
    return %c0_i32, %c0_i32_0, %c0_i32_1 : i32, i32, i32
  }
  func.func @transform_3(%arg0: i32, %arg1: i32) -> (i32, i32) {
    %c0_i32 = arith.constant 0 : i32
    %c0_i32_0 = arith.constant 0 : i32
    %c0_i32_1 = arith.constant 0 : i32
    return %c0_i32, %c0_i32_0 : i32, i32
  }
  func.func @transform_4(%arg0: i32, %arg1: i32) -> (i32, i32, i32, i32) {
    %c0_i32 = arith.constant 0 : i32
    %c0_i32_0 = arith.constant 0 : i32
    %c0_i32_1 = arith.constant 0 : i32
    return %arg0, %arg1, %c0_i32, %c0_i32_0 : i32, i32, i32, i32
  }
}

</mosaic_0001>

<bundles_post_ra>
// kernel: tpu_custom_call.1
= control target key start
LH: loop header
LB: loop body
LE: loop exit
PB: predicated region body
PF: predicated region fallthrough
CT: control target
= control target key end

     0   :  { %s6875_s17 = smov 0   ;;  %s6877_s18 = smov 0   ;;  %s8589_s0 = inlined_call_operand.<no memory space> [shape: f32[1], index: 0, kind: input, shape index: {}]   ;;  %s8590_s1 = inlined_call_operand.vmem [shape: f32[2,32,16,12], index: 1, kind: input, shape index: {}]   ;;  %s8591_s2 = inlined_call_operand.vmem [shape: bf16[3,36,24], index: 2, kind: input, shape index: {}]   ;;  %s8592_s3 = inlined_call_operand.vmem [shape: f32[1,24], index: 3, kind: input, shape index: {}]   ;;  %s8593_s4 = inlined_call_operand.vmem [shape: bf16[2,32,16,24], index: 4, kind: output, shape index: {}]  }
   0x1   :  { %9 = sst [smem:[#allocation4]] %s8589_s0  ;;  %s6879_s19 = smov 0  }
   0x2 LB: > { %s27_s0 = sadd.s32 1, %s6838_s18  ;;  %p5596_p0 = scmp.ge.s32.totalorder %s6842_s19, 1  ;;  %s6842_s19 = sphi %s6879_s19, %s15_s19   ;;  %s6838_s18 = sphi %s6877_s18, %s8630_s18   ;;  %s6834_s17 = sphi %s6875_s17, %s8629_s17  }
   0x3   : > { %p29_p1 = scmp.ge.s32.totalorder %s27_s0, 2  ;;  %p177_p2 = scmp.lt.s32.totalorder %s6842_s19, 3 }
   0x5   : > { %s8632_s0 = smov (%p29_p1, %s27_s0), 0  ;;  %p178_p3 = pnand %p5596_p0, %p177_p2 }
   0x7   : > { %181 = sbr.rel (%p178_p3) target bundleno = 745 (0x2e9), region = 36 }
   0xe   : > { %vm226_vm0 = vcmask 90112   ;;  %vm227_vm1 = vsmask.f32 256  ;;  %v229_v0 = vld [vmem:[#allocation2] sm:$0x1]  ;;  %vm1530_vm2 = vcmask 93184  }
   0xf   : > { %vm6895_vm3 = vmand %vm226_vm0, %vm227_vm1  ;;  %vm331_vm4 = vsmask.f32 7938  ;;  %v333_v2 = vld [vmem:[#allocation2 + $0x8] sm:$0x1]  ;;  %v8594_v5 = vmov 0   ;;  %p208_p4 = scmp.lt.s32.totalorder %s6834_s17, 1 }
  0x10   : > { %v230_v3 = vsel %vm6895_vm3, 0, %v229_v0  ;;  %vm6903_vm5 = vmand %vm226_vm0, %vm331_vm4  ;;  %1762 = vst.msk [vmem:[#allocation2 + $0x4] sm:$0xf] %vm1530_vm2, %v8594_v5  ;;  %v232_v7 = vld [vmem:[#allocation2 + $0xc] sm:$0x1]  ;;  %s6923_s20 = sld [smem:[#allocation4]] }
  0x11   : > { %1820 = vst.msk [vmem:[#allocation2 + $0x190] sm:$0xf] %vm1530_vm2, %v8594_v5  ;;  %231 = vst [vmem:[#allocation2] sm:$0x1] %v230_v3  ;;  %v334_v6 = vsel %vm6903_vm5, 0, %v333_v2  ;;  %s8634_s17 = smov (!%p208_p4, %s6834_s17), 1 }
  0x12   : > { %v336_v8 = vld [vmem:[#allocation2 + $0x14] sm:$0x1]  ;;  %335 = vst [vmem:[#allocation2 + $0x8] sm:$0x1] %v334_v6  ;;  %1761 = vst.msk [vmem:[#allocation2] sm:$0xf] %vm1530_vm2, %v8594_v5 }
  0x13   : > { %v233_v9 = vsel %vm6895_vm3, 0, %v232_v7  ;;  %v337_v10 = vsel %vm6903_vm5, 0, %v336_v8  ;;  %1764 = vst.msk [vmem:[#allocation2 + $0x8] sm:$0x1] %vm226_vm0, %v8594_v5  ;;  %v235_v11 = vld [vmem:[#allocation2 + $0x18] sm:$0x1]  ;;  %vm6971_vm13 = vmand %vm1530_vm2, %vm331_vm4 }
  0x14   : > { %234 = vst [vmem:[#allocation2 + $0xc] sm:$0x1] %v233_v9  ;;  %338 = vst [vmem:[#allocation2 + $0x14] sm:$0x1] %v337_v10  ;;  %v339_v12 = vld [vmem:[#allocation2 + $0x20] sm:$0x1] }
  0x15   : > { %s6025_s21 = sshll.u32 %s8634_s17, 9  ;;  %v236_v13 = vsel %vm6895_vm3, 0, %v235_v11  ;;  %v340_v14 = vsel %vm6903_vm5, 0, %v339_v12  ;;  %v238_v15 = vld [vmem:[#allocation2 + $0x24] sm:$0x1]  ;;  %vm3475_vm7 = vcmask 1046528  }
  0x16   : > { %s6933_s24 = scalar_lea.vmem %s8590_s1, %s6025_s21  ;;  %237 = vst [vmem:[#allocation2 + $0x18] sm:$0x1] %v236_v13  ;;  %341 = vst [vmem:[#allocation2 + $0x20] sm:$0x1] %v340_v14  ;;  %v239_v16 = vsel %vm6895_vm3, 0, %v238_v15  ;;  %v6952_v28 = vstv %s6923_s20  ;;  %s6845_s25 = smov 24  }
  0x17   : > { %v342_v17 = vld [vmem:[#allocation2 + $0x2c] sm:$0x1]  ;;  %v241_v18 = vld [vmem:[#allocation2 + $0x30] sm:$0x1]  ;;  %vm2555_vm6 = vsmask.f32 7424 }
  0x18   : > { %v437_v19 = vld [vmem:[%s6933_s24] sm:$0xff]  ;;  %v438_v20 = vld [vmem:[%s6933_s24 + $0x8] sm:$0xff]  ;;  %v439_v21 = vld [vmem:[%s6933_s24 + $0x10] sm:$0xff]  ;;  %240 = vst [vmem:[#allocation2 + $0x24] sm:$0x1] %v239_v16  ;;  %v343_v22 = vsel %vm6903_vm5, 0, %v342_v17 }
  0x19   : > { %v242_v23 = vsel %vm6895_vm3, 0, %v241_v18  ;;  %vm887_vm8 = vsmask.f32 4368  ;;  %344 = vst [vmem:[#allocation2 + $0x2c] sm:$0x1] %v343_v22  ;;  %vm502_vm9 = vcmp.ge.f32.partialorder %v437_v19, 0.0  ;;  %v567_v30 = vmul.f32 %v6952_v28, %v437_v19 }
  0x1a   : > { %243 = vst [vmem:[#allocation2 + $0x30] sm:$0x1] %v242_v23  ;;  %vm503_vm10 = vcmp.ge.f32.partialorder %v438_v20, 0.0  ;;  %v440_v24 = vld [vmem:[%s6933_s24 + $0x18] sm:$0xff]  ;;  %vm504_vm11 = vcmp.ge.f32.partialorder %v439_v21, 0.0  ;;  %v6946_v25 = vld [vmem:[%s6933_s24 + $0x20] sm:$0xff]  ;;  %v568_v31 = vmul.f32 %v6952_v28, %v438_v20  ;;  %v569_v32 = vmul.f32 %v6952_v28, %v439_v21  ;;  %vm6978_vm14 = vmor %vm227_vm1, %vm887_vm8 }
  0x1b   : > { %v6949_v26 = vld [vmem:[%s6933_s24 + $0x28] sm:$0xff]  ;;  %v6639_v27 = vld [vmem:[#allocation2] sm:$0xff]   ;;  %8604 = vst [vmem:[#allocation5_spill] sm:$0xff] %v6952_v28  ;;  %vm505_vm12 = vcmp.ge.f32.partialorder %v440_v24, 0.0  ;;  %v570_v33 = vmul.f32 %v6952_v28, %v440_v24  ;;  %v571_v37 = vmul.f32 %v6952_v28, %v6946_v25  ;;  %v631_v41 = vsel %vm502_vm9, %v437_v19, %v567_v30  ;;  %s6846_s26 = smov 12   ;;  %s6026_s28 = sshll.u32 %s8634_s17, 8 }
  0x1c   : > { %v6640_v29 = vld [vmem:[#allocation2 + $0x8] ss:$0 sps:$4 sm:$0x11]   ;;  %v2557_v34 = vshrl.u32 %v6639_v27, 16  ;;  %v2559_v35 = vshll.u32 %v6639_v27, 16  ;;  %v572_v38 = vmul.f32 %v6952_v28, %v6949_v26  ;;  %v632_v42 = vsel %vm503_vm10, %v438_v20, %v568_v31  ;;  %v443_v31 = vld [vmem:[%s6933_s24 + $0x30] sm:$0xff]  ;;  %s8306_s5 = scalar_lea.vmem %s8593_s4, %s6026_s28 }
  0x1d   : > { %v6641_v36 = vld [vmem:[#allocation2] sm:$0xfe]   ;;  %v2564_v39 = vshll.u32 %v6640_v29, 16  ;;  %v6642_v40 = vld [vmem:[#allocation2 + $0x8] ss:$0 sps:$4 sm:$0x11]   ;;  %v633_v43 = vsel %vm504_vm11, %v439_v21, %v569_v32  ;;  %v6027_v46 = vpack.c.bf16 %v631_v41, %v631_v41  ;;  %v6028_v47 = vpack.c.bf16 %v632_v42, %v632_v42 }
  0x1e   : > { %v2561_v44 = vrot.slane %v2559_v35, 1  ;;  %v3476_v45 = vrot.slane %v6641_v36, 1  ;;  %v3477_v49 = vrot.slane %v6642_v40, 1  ;;  %v634_v50 = vsel %vm505_vm12, %v440_v24, %v570_v33  ;;  %v1532_v0 = vld [vmem:[#allocation2 + $0xc] sm:$0xf]  ;;  %v445_v41 = vld [vmem:[%s6933_s24 + $0x40] sm:$0xff] }
  0x1f   : > { %v2566_v48 = vrot.slane %v2564_v39, 1  ;;  %v6029_v51 = vpack.c.bf16 %v633_v43, %v633_v43  ;;  %v890_v53 = vshrl.u32 %v6027_v46, 16  ;;  %v893_v54 = vshll.u32 %v6027_v46, 16  ;;  %v1537_v6 = vld [vmem:[#allocation2 + $0x14] sm:$0x1]  ;;  %v446_v42 = vld [vmem:[%s6933_s24 + $0x48] sm:$0xff] }
  0x20   : > { %v2562_v52 = vor.u32 %v2561_v44, %v2557_v34  ;;  %v898_v55 = vshrl.u32 %v6028_v47, 16  ;;  %v3478_v56 = vsel %vm3475_vm7, %v3476_v45, %v3477_v49  ;;  %v901_v57 = vshll.u32 %v6028_v47, 16  ;;  %v1540_v14 = vld [vmem:[#allocation2 + $0x18] sm:$0xf]  ;;  %v1544_v22 = vld [vmem:[#allocation2 + $0x20] sm:$0x1] }
  0x21   : > { %v6030_v58 = vpack.c.bf16 %v634_v50, %v634_v50  ;;  %v907_v59 = vshrl.u32 %v6029_v51, 16  ;;  %3578 = vrot.lane.b32.xlu1 %v3478_v56, %s6845_s25  ;;  %v892_v61 = vrot.slane %v890_v53, 7  ;;  %v8605_v63 = vmov 0  ;;  %v345_v18 = vld [vmem:[#allocation2 + $0x38] sm:$0x1] }
  0x22   : > { %v2567_v60 = vsel %vm2555_vm6, %v2562_v52, %v2566_v48  ;;  %v900_v62 = vrot.slane %v898_v55, 7  ;;  %v8606_v63 = vsel %vm6971_vm13, 4294967295, %v8605_v63  ;;  %v910_v2 = vshll.u32 %v6029_v51, 16  ;;  %v444_v34 = vld [vmem:[%s6933_s24 + $0x38] sm:$0xff]  ;;  %v348_v36 = vld [vmem:[#allocation2 + $0x44] sm:$0x1] }
  0x23   : > { %8607 = vst [vmem:[#allocation6_spill] sm:$0xff] %v8606_v63  ;;  %2964 = vrot.lane.b32.xlu0 %v2567_v60, %s6846_s26  ;;  %v909_v7 = vrot.slane %v907_v59, 7  ;;  %v915_v8 = vshrl.u32 %v6030_v58, 16  ;;  %v918_v9 = vshll.u32 %v6030_v58, 16  ;;  %vm506_vm15 = vcmp.ge.f32.partialorder %v6946_v25, 0.0 }
  0x24   : > { %v895_v10 = vor.u32 %v893_v54, %v892_v61  ;;  %v896_v11 = vrot.slane %v892_v61, 4  ;;  %v903_v12 = vor.u32 %v901_v57, %v900_v62  ;;  %v905_v13 = vrot.slane %v900_v62, 4  ;;  %v244_v35 = vld [vmem:[#allocation2 + $0x3c] sm:$0x1]  ;;  %v1547_v50 = vld [vmem:[#allocation2 + $0x24] sm:$0xf] }
  0x25   : > { %v912_v15 = vor.u32 %v910_v2, %v909_v7  ;;  %v913_v16 = vrot.slane %v909_v7, 4  ;;  %v917_v17 = vrot.slane %v915_v8, 7  ;;  %vm507_vm1 = vcmp.ge.f32.partialorder %v6949_v26, 0.0 }
  0x26   : > { %v904_v19 = vsel %vm6978_vm14, %v896_v11, %v903_v12  ;;  %v1533_v20 = vsel %vm6971_vm13, %v895_v10, %v1532_v0  ;;  %v1538_v21 = vsel %vm6895_vm3, %v905_v13, %v1537_v6  ;;  %v635_v23 = vsel %vm506_vm15, %v6946_v25, %v571_v37 }
  0x27   : > { %1534 = vst [vmem:[#allocation2 + $0xc] sm:$0xf] %v1533_v20  ;;  %1536 = vst.msk [vmem:[#allocation2 + $0x10] sm:$0xf] %vm1530_vm2, %v904_v19  ;;  %v920_v24 = vor.u32 %v918_v9, %v917_v17  ;;  %v922_v27 = vrot.slane %v917_v17, 4  ;;  %v1541_v29 = vsel %vm6971_vm13, %v912_v15, %v1540_v14  ;;  %v636_v30 = vsel %vm507_vm1, %v6949_v26, %v572_v38 }
  0x28   : > { %1539 = vst [vmem:[#allocation2 + $0x14] sm:$0x1] %v1538_v21  ;;  %1542 = vst [vmem:[#allocation2 + $0x18] sm:$0xf] %v1541_v29  ;;  %v6031_v32 = vpack.c.bf16 %v635_v23, %v635_v23  ;;  %v6032_v33 = vpack.c.bf16 %v636_v30, %v636_v30  ;;  %v346_v25 = vsel %vm6903_vm5, 0, %v345_v18  ;;  %vm508_vm4 = vcmp.ge.f32.partialorder %v443_v31, 0.0 }
  0x29   : > { %v921_v37 = vsel %vm6978_vm14, %v913_v16, %v920_v24  ;;  %v1545_v39 = vsel %vm6895_vm3, %v922_v27, %v1544_v22  ;;  %347 = vst [vmem:[#allocation2 + $0x38] sm:$0x1] %v346_v25  ;;  %v573_v43 = vmul.f32 %v6952_v28, %v443_v31  ;;  %v574_v44 = vmul.f32 %v6952_v28, %v444_v34  ;;  %v1551_v16 = vld [vmem:[#allocation2 + $0x2c] sm:$0x1] }
  0x2a   : > { %1543 = vst.msk [vmem:[#allocation2 + $0x1c] sm:$0xf] %vm1530_vm2, %v921_v37  ;;  %1546 = vst [vmem:[#allocation2 + $0x20] sm:$0x1] %v1545_v39  ;;  %v924_v26 = vshrl.u32 %v6031_v32, 16  ;;  %v927_v38 = vshll.u32 %v6031_v32, 16  ;;  %v575_v51 = vmul.f32 %v6952_v28, %v445_v41  ;;  %v576_v53 = vmul.f32 %v6952_v28, %v446_v42 }
  0x2b   : > { %v932_v40 = vshrl.u32 %v6032_v33, 16  ;;  %v245_v45 = vsel %vm6895_vm3, 0, %v244_v35  ;;  %v349_v46 = vsel %vm6903_vm5, 0, %v348_v36  ;;  %v935_v49 = vshll.u32 %v6032_v33, 16 }
  0x2c   : > { %v926_v47 = vrot.slane %v924_v26, 7  ;;  %vm509_vm8 = vcmp.ge.f32.partialorder %v444_v34, 0.0  ;;  %246 = vst [vmem:[#allocation2 + $0x3c] sm:$0x1] %v245_v45  ;;  %350 = vst [vmem:[#allocation2 + $0x44] sm:$0x1] %v349_v46  ;;  %v637_v56 = vsel %vm508_vm4, %v443_v31, %v573_v43 }
  0x2d   : > { %v934_v48 = vrot.slane %v932_v40, 7  ;;  %vm510_vm9 = vcmp.ge.f32.partialorder %v445_v41, 0.0  ;;  %vm511_vm10 = vcmp.ge.f32.partialorder %v446_v42, 0.0  ;;  %v638_v57 = vsel %vm509_vm8, %v444_v34, %v574_v44  ;;  %v1554_v40 = vld [vmem:[#allocation2 + $0x30] sm:$0xf] }
  0x2e   : > { %v929_v52 = vor.u32 %v927_v38, %v926_v47  ;;  %v6643_v54 = vld [vmem:[#allocation2 + $0xc] sm:$0xff]   ;;  %v639_v2 = vsel %vm510_vm9, %v445_v41, %v575_v51  ;;  %v930_v7 = vrot.slane %v926_v47, 4  ;;  %v6033_v8 = vpack.c.bf16 %v637_v56, %v637_v56 }
  0x2f   : > { %v6644_v55 = vld [vmem:[#allocation2 + $0x14] ss:$0 sps:$4 sm:$0x11]   ;;  %v937_v58 = vor.u32 %v935_v49, %v934_v48  ;;  %v2569_v60 = vshrl.u32 %v6643_v54, 16  ;;  %v2571_v61 = vshll.u32 %v6643_v54, 16  ;;  %v6034_v9 = vpack.c.bf16 %v638_v57, %v638_v57 }
  0x30   : > { %v1548_v59 = vsel %vm6971_vm13, %v929_v52, %v1547_v50  ;;  %v2576_v62 = vshll.u32 %v6644_v55, 16  ;;  %v640_v10 = vsel %vm511_vm10, %v446_v42, %v576_v53  ;;  %v6647_v15 = vld [vmem:[#allocation2 + $0xc] sm:$0xfe]   ;;  %v6648_v18 = vld [vmem:[#allocation2 + $0x14] ss:$0 sps:$4 sm:$0x11]   ;;  %v6035_v20 = vpack.c.bf16 %v639_v2, %v639_v2 }
  0x31   : > { %v6645_v0 = vld [vmem:[#allocation2 + $0x18] sm:$0xff]   ;;  %1549 = vst [vmem:[#allocation2 + $0x24] sm:$0xf] %v1548_v59  ;;  %v6646_v6 = vld [vmem:[#allocation2 + $0x20] ss:$0 sps:$4 sm:$0x11]   ;;  %v938_v19 = vsel %vm6978_vm14, %v930_v7, %v937_v58  ;;  %v6036_v24 = vpack.c.bf16 %v640_v10, %v640_v10 }
  0x32   : > { %v2573_v11 = vrot.slane %v2571_v61, 1  ;;  %v2578_v12 = vrot.slane %v2576_v62, 1  ;;  %v2581_v13 = vshrl.u32 %v6645_v0, 16  ;;  %v2583_v14 = vshll.u32 %v6645_v0, 16  ;;  %1550 = vst.msk [vmem:[#allocation2 + $0x28] sm:$0xf] %vm1530_vm2, %v938_v19 }
  0x33   : > { %v2588_v17 = vshll.u32 %v6646_v6, 16  ;;  %v3479_v23 = vrot.slane %v6647_v15, 1  ;;  %v3480_v29 = vrot.slane %v6648_v18, 1  ;;  %v6649_v30 = vld [vmem:[#allocation2 + $0x18] sm:$0xfe]   ;;  %v939_v31 = vrot.slane %v934_v48, 4 }
  0x34   : > { %v2574_v21 = vor.u32 %v2573_v11, %v2569_v60  ;;  %v2585_v22 = vrot.slane %v2583_v14, 1  ;;  %v941_v32 = vshrl.u32 %v6033_v8, 16  ;;  %v6650_v34 = vld [vmem:[#allocation2 + $0x20] ss:$0 sps:$4 sm:$0x11]   ;;  %v944_v35 = vshll.u32 %v6033_v8, 16 }
  0x35   : > { %v2590_v27 = vrot.slane %v2588_v17, 1  ;;  %v949_v36 = vshrl.u32 %v6034_v9, 16  ;;  %v3481_v37 = vsel %vm3475_vm7, %v3479_v23, %v3480_v29  ;;  %v3482_v39 = vrot.slane %v6649_v30, 1  ;;  %v1558_v47 = vld [vmem:[#allocation2 + $0x38] sm:$0x1]  ;;  %v447_v55 = vld [vmem:[%s6933_s24 + $0x50] sm:$0xff] }
  0x36   : > { %v2579_v33 = vsel %vm2555_vm6, %v2574_v21, %v2578_v12  ;;  %v2586_v25 = vor.u32 %v2585_v22, %v2581_v13  ;;  %v1552_v26 = vsel %vm6895_vm3, %v939_v31, %v1551_v16  ;;  %v943_v38 = vrot.slane %v941_v32, 7  ;;  %v247_v54 = vld [vmem:[#allocation2 + $0x48] sm:$0x1]  ;;  %v351_v59 = vld [vmem:[#allocation2 + $0x50] sm:$0x1]  ;;  %v448_v6 = vld [vmem:[%s6933_s24 + $0x58] sm:$0xff] }
  0x37   : > { %2966 = vrot.lane.b32.xlu0 %v2579_v33, %s6846_s26  ;;  %v3483_v42 = vrot.slane %v6650_v34, 1  ;;  %1553 = vst [vmem:[#allocation2 + $0x2c] sm:$0x1] %v1552_v26  ;;  %v951_v43 = vrot.slane %v949_v36, 7  ;;  %v952_v44 = vshll.u32 %v6034_v9, 16  ;;  %v958_v48 = vshrl.u32 %v6035_v20, 16 }
  0x38   : > { %v2591_v41 = vsel %vm2555_vm6, %v2586_v25, %v2590_v27  ;;  %v946_v45 = vor.u32 %v944_v35, %v943_v38  ;;  %v947_v46 = vrot.slane %v943_v38, 4  ;;  %v961_v49 = vshll.u32 %v6035_v20, 16  ;;  %v1561_v2 = vld [vmem:[#allocation2 + $0x3c] sm:$0xf]  ;;  %v1565_v11 = vld [vmem:[#allocation2 + $0x44] sm:$0x1] }
  0x39   : > { %2968 = vrot.lane.b32.xlu1 %v2591_v41, %s6846_s26  ;;  %v3484_v50 = vsel %vm3475_vm7, %v3482_v39, %v3483_v42  ;;  %v954_v51 = vor.u32 %v952_v44, %v951_v43  ;;  %v956_v52 = vrot.slane %v951_v43, 4  ;;  %v966_v53 = vshrl.u32 %v6036_v24, 16  ;;  %v6651_v56 = vld [vmem:[#allocation2 + $0x24] sm:$0xff]   ;;  %v250_v12 = vld [vmem:[#allocation2 + $0x54] sm:$0x1]  ;;  %v7065_v43 = vld [vmem:[%s6933_s24 + $0x78] sm:$0xff] }
  0x3a   : > { %v1555_v57 = vsel %vm6971_vm13, %v946_v45, %v1554_v40  ;;  %v960_v58 = vrot.slane %v958_v48, 7  ;;  %v969_v0 = vshll.u32 %v6036_v24, 16  ;;  %v2593_v7 = vshrl.u32 %v6651_v56, 16  ;;  %v6655_v13 = vld [vmem:[#allocation2 + $0x24] sm:$0xfe]   ;;  %v7061_v40 = vld [vmem:[%s6933_s24 + $0x70] sm:$0xff] }
  0x3b   : > { %3580 = vrot.lane.b32.xlu0 %v3481_v37, %s6845_s25  ;;  %v955_v60 = vsel %vm6978_vm14, %v947_v46, %v954_v51  ;;  %1556 = vst [vmem:[#allocation2 + $0x30] sm:$0xf] %v1555_v57  ;;  %v1559_v61 = vsel %vm6895_vm3, %v956_v52, %v1558_v47  ;;  %v968_v62 = vrot.slane %v966_v53, 7  ;;  %v2595_v8 = vshll.u32 %v6651_v56, 16  ;;  %v354_v18 = vld [vmem:[#allocation2 + $0x5c] sm:$0x1] }
  0x3c   : > { %1557 = vst.msk [vmem:[#allocation2 + $0x34] sm:$0xf] %vm1530_vm2, %v955_v60  ;;  %1560 = vst [vmem:[#allocation2 + $0x38] sm:$0x1] %v1559_v61  ;;  %v963_v9 = vor.u32 %v961_v49, %v960_v58  ;;  %v964_v10 = vrot.slane %v960_v58, 4  ;;  %v248_v16 = vsel %vm6895_vm3, 0, %v247_v54  ;;  %v577_v17 = vmul.f32 %v6952_v28, %v447_v55 }
  0x3d   : > { %3582 = vrot.lane.b32.xlu1 %v3484_v50, %s6845_s25  ;;  %v971_v14 = vor.u32 %v969_v0, %v968_v62  ;;  %v973_v15 = vrot.slane %v968_v62, 4  ;;  %v2597_v20 = vrot.slane %v2595_v8, 1  ;;  %249 = vst [vmem:[#allocation2 + $0x48] sm:$0x1] %v248_v16  ;;  %v578_v22 = vmul.f32 %v6952_v28, %v448_v6  ;;  %v449_v32 = vld [vmem:[%s6933_s24 + $0x60] sm:$0xff]  ;;  %v450_v36 = vld [vmem:[%s6933_s24 + $0x68] sm:$0xff] }
  0x3e   : > { %v6652_v19 = vld [vmem:[#allocation2 + $0x2c] ss:$0 sps:$4 sm:$0x11]   ;;  %v1562_v21 = vsel %vm6971_vm13, %v963_v9, %v1561_v2  ;;  %v352_v29 = vsel %vm6903_vm5, 0, %v351_v59  ;;  %vm512_vm11 = vcmp.ge.f32.partialorder %v447_v55, 0.0  ;;  %vm513_vm12 = vcmp.ge.f32.partialorder %v448_v6, 0.0 }
  0x3f   : > { %v6656_v23 = vld [vmem:[#allocation2 + $0x2c] ss:$0 sps:$4 sm:$0x11]   ;;  %v972_v24 = vsel %vm6978_vm14, %v964_v10, %v971_v14  ;;  %1563 = vst [vmem:[#allocation2 + $0x3c] sm:$0xf] %v1562_v21  ;;  %v1566_v27 = vsel %vm6895_vm3, %v973_v15, %v1565_v11  ;;  %v2598_v30 = vor.u32 %v2597_v20, %v2593_v7  ;;  %v2600_v31 = vshll.u32 %v6652_v19, 16 }
  0x40   : > { %1564 = vst.msk [vmem:[#allocation2 + $0x40] sm:$0xf] %vm1530_vm2, %v972_v24  ;;  %1567 = vst [vmem:[#allocation2 + $0x44] sm:$0x1] %v1566_v27  ;;  %v3485_v33 = vrot.slane %v6655_v13, 1  ;;  %v3486_v25 = vrot.slane %v6656_v23, 1  ;;  %v641_v34 = vsel %vm512_vm11, %v447_v55, %v577_v17  ;;  %v642_v39 = vsel %vm513_vm12, %v448_v6, %v578_v22 }
  0x41   : > { %353 = vst [vmem:[#allocation2 + $0x50] sm:$0x1] %v352_v29  ;;  %v251_v35 = vsel %vm6895_vm3, 0, %v250_v12  ;;  %v2602_v37 = vrot.slane %v2600_v31, 1  ;;  %v6037_v26 = vpack.c.bf16 %v641_v34, %v641_v34  ;;  %v355_v38 = vsel %vm6903_vm5, 0, %v354_v18  ;;  %v7068_v44 = vld [vmem:[%s6933_s24 + $0x80] sm:$0xff] }
  0x42   : > { %252 = vst [vmem:[#allocation2 + $0x54] sm:$0x1] %v251_v35  ;;  %356 = vst [vmem:[#allocation2 + $0x5c] sm:$0x1] %v355_v38  ;;  %vm514_vm15 = vcmp.ge.f32.partialorder %v449_v32, 0.0  ;;  %v579_v42 = vmul.f32 %v6952_v28, %v449_v32  ;;  %v6038_v51 = vpack.c.bf16 %v642_v39, %v642_v39  ;;  %v3487_v53 = vsel %vm3475_vm7, %v3485_v33, %v3486_v25 }
  0x43   : > { %v6653_v41 = vld [vmem:[#allocation2 + $0x30] sm:$0xff]   ;;  %v2603_v45 = vsel %vm2555_vm6, %v2598_v30, %v2602_v37  ;;  %v6654_v46 = vld [vmem:[#allocation2 + $0x38] ss:$0 sps:$4 sm:$0x11]   ;;  %v975_v47 = vshrl.u32 %v6037_v26, 16  ;;  %v580_v55 = vmul.f32 %v6952_v28, %v450_v36  ;;  %v7077_v59 = vmul.f32 %v6952_v28, %v7061_v40 }
  0x44   : > { %2970 = vrot.lane.b32.xlu0 %v2603_v45, %s6846_s26  ;;  %v2605_v48 = vshrl.u32 %v6653_v41, 16  ;;  %v2607_v49 = vshll.u32 %v6653_v41, 16  ;;  %v6657_v50 = vld [vmem:[#allocation2 + $0x30] sm:$0xfe]   ;;  %v2612_v52 = vshll.u32 %v6654_v46, 16  ;;  %v643_v58 = vsel %vm514_vm15, %v449_v32, %v579_v42 }
  0x45   : > { %v6658_v54 = vld [vmem:[#allocation2 + $0x38] ss:$0 sps:$4 sm:$0x11]   ;;  %v3488_v57 = vrot.slane %v6657_v50, 1  ;;  %v7081_v2 = vmul.f32 %v6952_v28, %v7065_v43  ;;  %v7085_v6 = vmul.f32 %v6952_v28, %v7068_v44  ;;  %v977_v8 = vrot.slane %v975_v47, 7 }
  0x46   : > { %v2609_v56 = vrot.slane %v2607_v49, 1  ;;  %v2614_v60 = vrot.slane %v2612_v52, 1  ;;  %v3489_v61 = vrot.slane %v6658_v54, 1  ;;  %v978_v9 = vshll.u32 %v6037_v26, 16  ;;  %v1568_v11 = vld [vmem:[#allocation2 + $0x48] sm:$0xf] }
  0x47   : > { %v6659_v62 = vld [vmem:[#allocation2 + $0x3c] sm:$0xff]   ;;  %v6660_v0 = vld [vmem:[#allocation2 + $0x44] ss:$0 sps:$4 sm:$0x11]   ;;  %v983_v10 = vshrl.u32 %v6038_v51, 16  ;;  %v6039_v16 = vpack.c.bf16 %v643_v58, %v643_v58  ;;  %v981_v19 = vrot.slane %v977_v8, 4 }
  0x48   : > { %v2610_v7 = vor.u32 %v2609_v56, %v2605_v48  ;;  %3584 = vrot.lane.b32.xlu0 %v3487_v53, %s6845_s25  ;;  %v2617_v12 = vshrl.u32 %v6659_v62, 16  ;;  %v2619_v13 = vshll.u32 %v6659_v62, 16  ;;  %v2624_v14 = vshll.u32 %v6660_v0, 16  ;;  %v1572_v15 = vld [vmem:[#allocation2 + $0x50] sm:$0x1]  ;;  %v454_v58 = vld [vmem:[%s6933_s24 + $0x88] sm:$0xff] }
  0x49   : > { %v980_v18 = vor.u32 %v978_v9, %v977_v8  ;;  %v985_v20 = vrot.slane %v983_v10, 7  ;;  %v986_v23 = vshll.u32 %v6038_v51, 16  ;;  %vm515_vm1 = vcmp.ge.f32.partialorder %v450_v36, 0.0  ;;  %v6663_v30 = vld [vmem:[#allocation2 + $0x3c] sm:$0xfe]  }
  0x4a   : > { %v2615_v17 = vsel %vm2555_vm6, %v2610_v7, %v2614_v60  ;;  %v2621_v21 = vrot.slane %v2619_v13, 1  ;;  %v2626_v22 = vrot.slane %v2624_v14, 1  ;;  %v3490_v24 = vsel %vm3475_vm7, %v3488_v57, %v3489_v61  ;;  %v6664_v31 = vld [vmem:[#allocation2 + $0x44] ss:$0 sps:$4 sm:$0x11]  }
  0x4b   : > { %2972 = vrot.lane.b32.xlu1 %v2615_v17, %s6846_s26  ;;  %v990_v27 = vrot.slane %v985_v20, 4  ;;  %v1569_v29 = vsel %vm6971_vm13, %v980_v18, %v1568_v11  ;;  %v644_v32 = vsel %vm515_vm1, %v450_v36, %v580_v55  ;;  %v988_v25 = vor.u32 %v986_v23, %v985_v20  ;;  %v253_v37 = vld [vmem:[#allocation2 + $0x60] sm:$0x1]  ;;  %v357_v39 = vld [vmem:[#allocation2 + $0x68] sm:$0x1]  ;;  %v7130_v17 = vld [vmem:[%s6933_s24 + $0x90] sm:$0xff] }
  0x4c   : > { %v2622_v33 = vor.u32 %v2621_v21, %v2617_v12  ;;  %1570 = vst [vmem:[#allocation2 + $0x48] sm:$0xf] %v1569_v29  ;;  %v6040_v34 = vpack.c.bf16 %v644_v32, %v644_v32  ;;  %v992_v35 = vshrl.u32 %v6039_v16, 16  ;;  %v3491_v38 = vrot.slane %v6663_v30, 1  ;;  %v256_v48 = vld [vmem:[#allocation2 + $0x6c] sm:$0x1] }
  0x4d   : > { %v1573_v26 = vsel %vm6895_vm3, %v990_v27, %v1572_v15  ;;  %v3492_v41 = vrot.slane %v6664_v31, 1  ;;  %v995_v42 = vshll.u32 %v6039_v16, 16  ;;  %v989_v36 = vsel %vm6978_vm14, %v981_v19, %v988_v25  ;;  %v360_v49 = vld [vmem:[#allocation2 + $0x74] sm:$0x1]  ;;  %v1579_v60 = vld [vmem:[#allocation2 + $0x5c] sm:$0x1] }
  0x4e   : > { %v2627_v45 = vsel %vm2555_vm6, %v2622_v33, %v2626_v22  ;;  %1574 = vst [vmem:[#allocation2 + $0x50] sm:$0x1] %v1573_v26  ;;  %v994_v46 = vrot.slane %v992_v35, 7  ;;  %v1000_v47 = vshrl.u32 %v6040_v34, 16  ;;  %1571 = vst.msk [vmem:[#allocation2 + $0x4c] sm:$0xf] %vm1530_vm2, %v989_v36  ;;  %v584_v11 = vmul.f32 %v6952_v28, %v454_v58 }
  0x4f   : > { %3586 = vrot.lane.b32.xlu1 %v3490_v24, %s6845_s25  ;;  %2974 = vrot.lane.b32.xlu0 %v2627_v45, %s6846_s26  ;;  %v3493_v50 = vsel %vm3475_vm7, %v3491_v38, %v3492_v41  ;;  %v1003_v51 = vshll.u32 %v6040_v34, 16  ;;  %v1575_v52 = vld [vmem:[#allocation2 + $0x54] sm:$0xf]  ;;  %v254_v53 = vsel %vm6895_vm3, 0, %v253_v37  ;;  %v358_v54 = vsel %vm6903_vm5, 0, %v357_v39  ;;  %v7137_v25 = vld [vmem:[%s6933_s24 + $0xa0] sm:$0xff] }
  0x50   : > { %v997_v55 = vor.u32 %v995_v42, %v994_v46  ;;  %v998_v56 = vrot.slane %v994_v46, 4  ;;  %v1002_v57 = vrot.slane %v1000_v47, 7  ;;  %255 = vst [vmem:[#allocation2 + $0x60] sm:$0x1] %v254_v53  ;;  %359 = vst [vmem:[#allocation2 + $0x68] sm:$0x1] %v358_v54  ;;  %v585_v45 = vmul.f32 %v6952_v28, %v7130_v17 }
  0x51   : > { %vm516_vm4 = vcmp.ge.f32.partialorder %v7061_v40, 0.0  ;;  %vm517_vm8 = vcmp.ge.f32.partialorder %v7065_v43, 0.0  ;;  %v257_v62 = vsel %vm6895_vm3, 0, %v256_v48  ;;  %v361_v0 = vsel %vm6903_vm5, 0, %v360_v49  ;;  %v363_v54 = vld [vmem:[#allocation2 + $0x80] sm:$0x1] }
  0x52   : > { %v645_v61 = vsel %vm516_vm4, %v7061_v40, %v7077_v59  ;;  %v1005_v7 = vor.u32 %v1003_v51, %v1002_v57  ;;  %v1007_v8 = vrot.slane %v1002_v57, 4  ;;  %v1576_v9 = vsel %vm6971_vm13, %v997_v55, %v1575_v52  ;;  %258 = vst [vmem:[#allocation2 + $0x6c] sm:$0x1] %v257_v62  ;;  %362 = vst [vmem:[#allocation2 + $0x74] sm:$0x1] %v361_v0 }
  0x53   : > { %v646_v10 = vsel %vm517_vm8, %v7065_v43, %v7081_v2  ;;  %3588 = vrot.lane.b32.xlu0 %v3493_v50, %s6845_s25  ;;  %1577 = vst [vmem:[#allocation2 + $0x54] sm:$0xf] %v1576_v9  ;;  %v6041_v40 = vpack.c.bf16 %v645_v61, %v645_v61  ;;  %vm518_vm9 = vcmp.ge.f32.partialorder %v7068_v44, 0.0  ;;  %vm519_vm10 = vcmp.ge.f32.partialorder %v454_v58, 0.0  ;;  %v259_v50 = vld [vmem:[#allocation2 + $0x78] sm:$0x1] }
  0x54   : > { %v6042_v59 = vpack.c.bf16 %v646_v10, %v646_v10  ;;  %v1006_v12 = vsel %vm6978_vm14, %v998_v56, %v1005_v7  ;;  %v1580_v13 = vsel %vm6895_vm3, %v1007_v8, %v1579_v60  ;;  %v647_v43 = vsel %vm518_vm9, %v7068_v44, %v7085_v6  ;;  %v7134_v6 = vld [vmem:[%s6933_s24 + $0x98] sm:$0xff]  ;;  %v262_v0 = vld [vmem:[#allocation2 + $0x84] sm:$0x1] }
  0x55   : > { %v6662_v2 = vld [vmem:[#allocation2 + $0x50] ss:$0 sps:$4 sm:$0x11]   ;;  %1578 = vst.msk [vmem:[#allocation2 + $0x58] sm:$0xf] %vm1530_vm2, %v1006_v12  ;;  %v1009_v14 = vshrl.u32 %v6041_v40, 16  ;;  %v6043_v21 = vpack.c.bf16 %v647_v43, %v647_v43  ;;  %v648_v44 = vsel %vm519_vm10, %v454_v58, %v584_v11  ;;  %v586_v55 = vmul.f32 %v6952_v28, %v7134_v6 }
  0x56   : > { %1581 = vst [vmem:[#allocation2 + $0x5c] sm:$0x1] %v1580_v13  ;;  %v6661_v15 = vld [vmem:[#allocation2 + $0x48] sm:$0xff]   ;;  %v1012_v16 = vshll.u32 %v6041_v40, 16  ;;  %v2636_v18 = vshll.u32 %v6662_v2, 16  ;;  %v1017_v27 = vshrl.u32 %v6042_v59, 16  ;;  %v6044_v49 = vpack.c.bf16 %v648_v44, %v648_v44 }
  0x57   : > { %v6665_v19 = vld [vmem:[#allocation2 + $0x48] sm:$0xfe]   ;;  %v1011_v20 = vrot.slane %v1009_v14, 7  ;;  %v2629_v22 = vshrl.u32 %v6661_v15, 16  ;;  %v2631_v23 = vshll.u32 %v6661_v15, 16  ;;  %v1020_v39 = vshll.u32 %v6042_v59, 16 }
  0x58   : > { %v6666_v24 = vld [vmem:[#allocation2 + $0x50] ss:$0 sps:$4 sm:$0x11]   ;;  %v2638_v29 = vrot.slane %v2636_v18, 1  ;;  %v3494_v30 = vrot.slane %v6665_v19, 1  ;;  %v1019_v37 = vrot.slane %v1017_v27, 7  ;;  %v587_v56 = vmul.f32 %v6952_v28, %v7137_v25 }
  0x59   : > { %v1014_v31 = vor.u32 %v1012_v16, %v1011_v20  ;;  %v1015_v32 = vrot.slane %v1011_v20, 4  ;;  %v1582_v33 = vld [vmem:[#allocation2 + $0x60] sm:$0xf]  ;;  %v2633_v34 = vrot.slane %v2631_v23, 1  ;;  %v3495_v35 = vrot.slane %v6666_v24, 1  ;;  %v458_v59 = vld [vmem:[%s6933_s24 + $0xa8] sm:$0xff] }
  0x5a   : > { %v1586_v38 = vld [vmem:[#allocation2 + $0x68] sm:$0x1]  ;;  %v1026_v41 = vshrl.u32 %v6043_v21, 16  ;;  %v1029_v42 = vshll.u32 %v6043_v21, 16  ;;  %v1022_v47 = vor.u32 %v1020_v39, %v1019_v37  ;;  %v1024_v48 = vrot.slane %v1019_v37, 4 }
  0x5b   : > { %v1583_v26 = vsel %vm6971_vm13, %v1014_v31, %v1582_v33  ;;  %v2634_v36 = vor.u32 %v2633_v34, %v2629_v22  ;;  %v3496_v51 = vsel %vm3475_vm7, %v3494_v30, %v3495_v35  ;;  %v1034_v13 = vshrl.u32 %v6044_v49, 16  ;;  %v1589_v2 = vld [vmem:[#allocation2 + $0x6c] sm:$0xf]  ;;  %v1593_v22 = vld [vmem:[#allocation2 + $0x74] sm:$0x1] }
  0x5c   : > { %v6667_v46 = vld [vmem:[#allocation2 + $0x54] sm:$0xff]   ;;  %1584 = vst [vmem:[#allocation2 + $0x60] sm:$0xf] %v1583_v26  ;;  %v1028_v53 = vrot.slane %v1026_v41, 7  ;;  %v1023_v61 = vsel %vm6978_vm14, %v1015_v32, %v1022_v47  ;;  %v1587_v8 = vsel %vm6895_vm3, %v1024_v48, %v1586_v38  ;;  %v1037_v43 = vshll.u32 %v6044_v49, 16 }
  0x5d   : > { %v6668_v52 = vld [vmem:[#allocation2 + $0x5c] ss:$0 sps:$4 sm:$0x11]   ;;  %v2639_v57 = vsel %vm2555_vm6, %v2634_v36, %v2638_v29  ;;  %v2641_v58 = vshrl.u32 %v6667_v46, 16  ;;  %v2643_v60 = vshll.u32 %v6667_v46, 16  ;;  %v260_v18 = vsel %vm6895_vm3, 0, %v259_v50 }
  0x5e   : > { %v6671_v62 = vld [vmem:[#allocation2 + $0x54] sm:$0xfe]   ;;  %2976 = vrot.lane.b32.xlu1 %v2639_v57, %s6846_s26  ;;  %v2648_v7 = vshll.u32 %v6668_v52, 16  ;;  %1585 = vst.msk [vmem:[#allocation2 + $0x64] sm:$0xf] %vm1530_vm2, %v1023_v61  ;;  %v1031_v10 = vor.u32 %v1029_v42, %v1028_v53  ;;  %v1032_v40 = vrot.slane %v1028_v53, 4  ;;  %v588_v44 = vmul.f32 %v6952_v28, %v458_v59 }
  0x5f   : > { %v6672_v9 = vld [vmem:[#allocation2 + $0x5c] ss:$0 sps:$4 sm:$0x11]   ;;  %v2645_v11 = vrot.slane %v2643_v60, 1  ;;  %1588 = vst [vmem:[#allocation2 + $0x68] sm:$0x1] %v1587_v8 }
  0x60   : > { %v3497_v12 = vrot.slane %v6671_v62, 1  ;;  %v2650_v14 = vrot.slane %v2648_v7, 1  ;;  %v3498_v15 = vrot.slane %v6672_v9, 1  ;;  %v1590_v16 = vsel %vm6971_vm13, %v1031_v10, %v1589_v2  ;;  %v366_v19 = vld [vmem:[#allocation2 + $0x8c] sm:$0x1]  ;;  %v7187_v7 = vld [vmem:[%s6933_s24 + $0xb8] sm:$0xff] }
  0x61   : > { %v2646_v20 = vor.u32 %v2645_v11, %v2641_v58  ;;  %v1036_v21 = vrot.slane %v1034_v13, 7  ;;  %1591 = vst [vmem:[#allocation2 + $0x6c] sm:$0xf] %v1590_v16  ;;  %261 = vst [vmem:[#allocation2 + $0x78] sm:$0x1] %v260_v18  ;;  %v364_v23 = vsel %vm6903_vm5, 0, %v363_v54 }
  0x62   : > { %vm520_vm11 = vcmp.ge.f32.partialorder %v7130_v17, 0.0  ;;  %3590 = vrot.lane.b32.xlu1 %v3496_v51, %s6845_s25  ;;  %365 = vst [vmem:[#allocation2 + $0x80] sm:$0x1] %v364_v23  ;;  %vm521_vm12 = vcmp.ge.f32.partialorder %v7134_v6, 0.0  ;;  %v263_v27 = vsel %vm6895_vm3, 0, %v262_v0  ;;  %v3499_v33 = vsel %vm3475_vm7, %v3497_v12, %v3498_v15  ;;  %v7184_v0 = vld [vmem:[%s6933_s24 + $0xb0] sm:$0xff] }
  0x63   : > { %v649_v24 = vsel %vm520_vm11, %v7130_v17, %v585_v45  ;;  %v2651_v29 = vsel %vm2555_vm6, %v2646_v20, %v2650_v14  ;;  %v1039_v30 = vor.u32 %v1037_v43, %v1036_v21  ;;  %v1041_v31 = vrot.slane %v1036_v21, 4  ;;  %264 = vst [vmem:[#allocation2 + $0x84] sm:$0x1] %v263_v27  ;;  %v265_v14 = vld [vmem:[#allocation2 + $0x90] sm:$0x1] }
  0x64   : > { %v650_v32 = vsel %vm521_vm12, %v7134_v6, %v586_v55  ;;  %2978 = vrot.lane.b32.xlu0 %v2651_v29, %s6846_s26  ;;  %v6045_v34 = vpack.c.bf16 %v649_v24, %v649_v24  ;;  %v367_v17 = vsel %vm6903_vm5, 0, %v366_v19  ;;  %vm522_vm15 = vcmp.ge.f32.partialorder %v7137_v25, 0.0  ;;  %v369_v19 = vld [vmem:[#allocation2 + $0x98] sm:$0x1] }
  0x65   : > { %v6669_v35 = vld [vmem:[#allocation2 + $0x60] sm:$0xff]   ;;  %v1040_v37 = vsel %vm6978_vm14, %v1032_v40, %v1039_v30  ;;  %v1594_v39 = vsel %vm6895_vm3, %v1041_v31, %v1593_v22  ;;  %368 = vst [vmem:[#allocation2 + $0x8c] sm:$0x1] %v367_v17  ;;  %vm523_vm1 = vcmp.ge.f32.partialorder %v458_v59, 0.0  ;;  %v651_v6 = vsel %vm522_vm15, %v7137_v25, %v587_v56 }
  0x66   : > { %v6670_v26 = vld [vmem:[#allocation2 + $0x68] ss:$0 sps:$4 sm:$0x11]   ;;  %1592 = vst.msk [vmem:[#allocation2 + $0x70] sm:$0xf] %vm1530_vm2, %v1040_v37  ;;  %v6046_v38 = vpack.c.bf16 %v650_v32, %v650_v32  ;;  %v1043_v41 = vshrl.u32 %v6045_v34, 16  ;;  %v652_v42 = vsel %vm523_vm1, %v458_v59, %v588_v44  ;;  %v6047_v47 = vpack.c.bf16 %v651_v6, %v651_v6 }
  0x67   : > { %1595 = vst [vmem:[#allocation2 + $0x74] sm:$0x1] %v1594_v39  ;;  %v2653_v45 = vshrl.u32 %v6669_v35, 16  ;;  %v2655_v36 = vshll.u32 %v6669_v35, 16  ;;  %v6673_v46 = vld [vmem:[#allocation2 + $0x60] sm:$0xfe]   ;;  %v6048_v50 = vpack.c.bf16 %v652_v42, %v652_v42  ;;  %v589_v20 = vmul.f32 %v6952_v28, %v7184_v0 }
  0x68   : > { %v2660_v48 = vshll.u32 %v6670_v26, 16  ;;  %3592 = vrot.lane.b32.xlu0 %v3499_v33, %s6845_s25  ;;  %v6674_v49 = vld [vmem:[#allocation2 + $0x68] ss:$0 sps:$4 sm:$0x11]   ;;  %v1045_v25 = vrot.slane %v1043_v41, 7  ;;  %v1046_v52 = vshll.u32 %v6045_v34, 16  ;;  %v590_v21 = vmul.f32 %v6952_v28, %v7187_v7 }
  0x69   : > { %v2657_v51 = vrot.slane %v2655_v36, 1  ;;  %v3500_v54 = vrot.slane %v6673_v46, 1  ;;  %v1051_v55 = vshrl.u32 %v6046_v38, 16  ;;  %v1054_v56 = vshll.u32 %v6046_v38, 16  ;;  %v1596_v57 = vld [vmem:[#allocation2 + $0x78] sm:$0xf] }
  0x6a   : > { %v2662_v53 = vrot.slane %v2660_v48, 1  ;;  %v3501_v60 = vrot.slane %v6674_v49, 1  ;;  %v1048_v61 = vor.u32 %v1046_v52, %v1045_v25  ;;  %v1060_v62 = vshrl.u32 %v6047_v47, 16  ;;  %v1600_v10 = vld [vmem:[#allocation2 + $0x80] sm:$0x1] }
  0x6b   : > { %v2658_v58 = vor.u32 %v2657_v51, %v2653_v45  ;;  %v1049_v8 = vrot.slane %v1045_v25, 4  ;;  %v1053_v9 = vrot.slane %v1051_v55, 7  ;;  %v1063_v40 = vshll.u32 %v6047_v47, 16  ;;  %v1603_v2 = vld [vmem:[#allocation2 + $0x84] sm:$0xf]  ;;  %v462_v51 = vld [vmem:[%s6933_s24 + $0xc8] sm:$0xff] }
  0x6c   : > { %v1068_v59 = vshrl.u32 %v6048_v50, 16  ;;  %v1597_v13 = vsel %vm6971_vm13, %v1048_v61, %v1596_v57  ;;  %v1062_v43 = vrot.slane %v1060_v62, 7  ;;  %v3502_v22 = vsel %vm3475_vm7, %v3500_v54, %v3501_v60  ;;  %v461_v34 = vld [vmem:[%s6933_s24 + $0xc0] sm:$0xff]  ;;  %v268_v6 = vld [vmem:[#allocation2 + $0x9c] sm:$0x1] }
  0x6d   : > { %v2663_v11 = vsel %vm2555_vm6, %v2658_v58, %v2662_v53  ;;  %v6675_v12 = vld [vmem:[#allocation2 + $0x6c] sm:$0xff]   ;;  %v1056_v16 = vor.u32 %v1054_v56, %v1053_v9  ;;  %v1058_v18 = vrot.slane %v1053_v9, 4  ;;  %1598 = vst [vmem:[#allocation2 + $0x78] sm:$0xf] %v1597_v13  ;;  %v1071_v39 = vshll.u32 %v6048_v50, 16 }
  0x6e   : > { %2980 = vrot.lane.b32.xlu1 %v2663_v11, %s6846_s26  ;;  %v6676_v15 = vld [vmem:[#allocation2 + $0x74] ss:$0 sps:$4 sm:$0x11]   ;;  %v2665_v23 = vshrl.u32 %v6675_v12, 16  ;;  %v2667_v24 = vshll.u32 %v6675_v12, 16  ;;  %v1065_v44 = vor.u32 %v1063_v40, %v1062_v43  ;;  %v1066_v33 = vrot.slane %v1062_v43, 4 }
  0x6f   : > { %v6679_v27 = vld [vmem:[#allocation2 + $0x6c] sm:$0xfe]   ;;  %v2672_v29 = vshll.u32 %v6676_v15, 16  ;;  %v1057_v30 = vsel %vm6978_vm14, %v1049_v8, %v1056_v16  ;;  %v1601_v31 = vsel %vm6895_vm3, %v1058_v18, %v1600_v10  ;;  %v6680_v32 = vld [vmem:[#allocation2 + $0x74] ss:$0 sps:$4 sm:$0x11]   ;;  %v591_v25 = vmul.f32 %v6952_v28, %v461_v34 }
  0x70   : > { %v2669_v17 = vrot.slane %v2667_v24, 1  ;;  %1599 = vst.msk [vmem:[#allocation2 + $0x7c] sm:$0xf] %vm1530_vm2, %v1057_v30  ;;  %1602 = vst [vmem:[#allocation2 + $0x80] sm:$0x1] %v1601_v31  ;;  %v3503_v35 = vrot.slane %v6679_v27, 1  ;;  %v1604_v41 = vsel %vm6971_vm13, %v1065_v44, %v1603_v2  ;;  %v592_v62 = vmul.f32 %v6952_v28, %v462_v51 }
  0x71   : > { %v1070_v37 = vrot.slane %v1068_v59, 7  ;;  %v2674_v26 = vrot.slane %v2672_v29, 1  ;;  %v3504_v38 = vrot.slane %v6680_v32, 1  ;;  %v1607_v42 = vld [vmem:[#allocation2 + $0x8c] sm:$0x1]  ;;  %v266_v45 = vsel %vm6895_vm3, 0, %v265_v14 }
  0x72   : > { %3594 = vrot.lane.b32.xlu1 %v3502_v22, %s6845_s25  ;;  %v2670_v36 = vor.u32 %v2669_v17, %v2665_v23  ;;  %1605 = vst [vmem:[#allocation2 + $0x84] sm:$0xf] %v1604_v41  ;;  %267 = vst [vmem:[#allocation2 + $0x90] sm:$0x1] %v266_v45  ;;  %v370_v48 = vsel %vm6903_vm5, 0, %v369_v19  ;;  %vm524_vm4 = vcmp.ge.f32.partialorder %v7184_v0, 0.0 }
  0x73   : > { %v1073_v46 = vor.u32 %v1071_v39, %v1070_v37  ;;  %v1075_v47 = vrot.slane %v1070_v37, 4  ;;  %v372_v49 = vld [vmem:[#allocation2 + $0xa4] sm:$0x1]  ;;  %371 = vst [vmem:[#allocation2 + $0x98] sm:$0x1] %v370_v48  ;;  %vm525_vm8 = vcmp.ge.f32.partialorder %v7187_v7, 0.0  ;;  %v653_v56 = vsel %vm524_vm4, %v7184_v0, %v589_v20 }
  0x74   : > { %v269_v50 = vsel %vm6895_vm3, 0, %v268_v6  ;;  %v271_v52 = vld [vmem:[#allocation2 + $0xa8] sm:$0x1]  ;;  %v2675_v53 = vsel %vm2555_vm6, %v2670_v36, %v2674_v26  ;;  %v654_v57 = vsel %vm525_vm8, %v7187_v7, %v590_v21  ;;  %v6049_v58 = vpack.c.bf16 %v653_v56, %v653_v56  ;;  %v7233_v8 = vld [vmem:[%s6933_s24 + $0xd0] sm:$0xff]  ;;  %v7236_v59 = vld [vmem:[%s6933_s24 + $0xd8] sm:$0xff] }
  0x75   : > { %v1074_v54 = vsel %vm6978_vm14, %v1066_v33, %v1073_v46  ;;  %v1608_v55 = vsel %vm6895_vm3, %v1075_v47, %v1607_v42  ;;  %270 = vst [vmem:[#allocation2 + $0x9c] sm:$0x1] %v269_v50  ;;  %2982 = vrot.lane.b32.xlu0 %v2675_v53, %s6846_s26  ;;  %v373_v60 = vsel %vm6903_vm5, 0, %v372_v49  ;;  %vm526_vm9 = vcmp.ge.f32.partialorder %v461_v34, 0.0  ;;  %v7239_v11 = vld [vmem:[%s6933_s24 + $0xe0] sm:$0xff]  ;;  %v7243_v15 = vld [vmem:[%s6933_s24 + $0xe8] sm:$0xff] }
  0x76   : > { %1606 = vst.msk [vmem:[#allocation2 + $0x88] sm:$0xf] %vm1530_vm2, %v1074_v54  ;;  %1609 = vst [vmem:[#allocation2 + $0x8c] sm:$0x1] %v1608_v55  ;;  %v3505_v61 = vsel %vm3475_vm7, %v3503_v35, %v3504_v38  ;;  %vm527_vm10 = vcmp.ge.f32.partialorder %v462_v51, 0.0  ;;  %v272_v0 = vsel %vm6895_vm3, 0, %v271_v52  ;;  %v6050_v7 = vpack.c.bf16 %v654_v57, %v654_v57 }
  0x77   : > { %374 = vst [vmem:[#allocation2 + $0xa4] sm:$0x1] %v373_v60  ;;  %v6677_v9 = vld [vmem:[#allocation2 + $0x78] sm:$0xff]   ;;  %v1077_v10 = vshrl.u32 %v6049_v58, 16  ;;  %v655_v40 = vsel %vm526_vm9, %v461_v34, %v591_v25  ;;  %273 = vst [vmem:[#allocation2 + $0xa8] sm:$0x1] %v272_v0  ;;  %v656_v19 = vsel %vm527_vm10, %v462_v51, %v592_v62  ;;  %v7248_v21 = vmul.f32 %v6952_v28, %v7233_v8 }
  0x78   : > { %v6678_v12 = vld [vmem:[#allocation2 + $0x80] ss:$0 sps:$4 sm:$0x11]   ;;  %v1080_v13 = vshll.u32 %v6049_v58, 16  ;;  %v2677_v43 = vshrl.u32 %v6677_v9, 16  ;;  %v2679_v2 = vshll.u32 %v6677_v9, 16  ;;  %v6051_v20 = vpack.c.bf16 %v655_v40, %v655_v40 }
  0x79   : > { %3596 = vrot.lane.b32.xlu0 %v3505_v61, %s6845_s25  ;;  %v6681_v14 = vld [vmem:[#allocation2 + $0x78] sm:$0xfe]   ;;  %v2684_v16 = vshll.u32 %v6678_v12, 16  ;;  %v6682_v18 = vld [vmem:[#allocation2 + $0x80] ss:$0 sps:$4 sm:$0x11]   ;;  %v594_v31 = vmul.f32 %v6952_v28, %v7236_v59  ;;  %v7254_v32 = vmul.f32 %v6952_v28, %v7239_v11  ;;  %v6052_v38 = vpack.c.bf16 %v656_v19, %v656_v19 }
  0x7a   : > { %v2681_v22 = vrot.slane %v2679_v2, 1  ;;  %v3506_v23 = vrot.slane %v6681_v14, 1  ;;  %v1079_v24 = vrot.slane %v1077_v10, 7  ;;  %v1085_v27 = vshrl.u32 %v6050_v7, 16  ;;  %v1610_v44 = vld [vmem:[#allocation2 + $0x90] sm:$0xf] }
  0x7b   : > { %v2686_v29 = vrot.slane %v2684_v16, 1  ;;  %v3507_v30 = vrot.slane %v6682_v18, 1  ;;  %v1088_v6 = vshll.u32 %v6050_v7, 16  ;;  %v1614_v26 = vld [vmem:[#allocation2 + $0x98] sm:$0x1]  ;;  %v1094_v41 = vshrl.u32 %v6051_v20, 16 }
  0x7c   : > { %v2682_v33 = vor.u32 %v2681_v22, %v2677_v43  ;;  %v1082_v35 = vor.u32 %v1080_v13, %v1079_v24  ;;  %v1083_v37 = vrot.slane %v1079_v24, 4  ;;  %v1087_v39 = vrot.slane %v1085_v27, 7  ;;  %v375_v48 = vld [vmem:[#allocation2 + $0xb0] sm:$0x1]  ;;  %v1617_v0 = vld [vmem:[#allocation2 + $0x9c] sm:$0xf] }
  0x7d   : > { %v6683_v34 = vld [vmem:[#allocation2 + $0x84] sm:$0xff]   ;;  %v6684_v17 = vld [vmem:[#allocation2 + $0x8c] ss:$0 sps:$4 sm:$0x11]   ;;  %v7258_v42 = vmul.f32 %v6952_v28, %v7243_v15  ;;  %v1096_v52 = vrot.slane %v1094_v41, 7  ;;  %v3508_v53 = vsel %vm3475_vm7, %v3506_v23, %v3507_v30  ;;  %v1097_v57 = vshll.u32 %v6051_v20, 16 }
  0x7e   : > { %v2687_v45 = vsel %vm2555_vm6, %v2682_v33, %v2686_v29  ;;  %v2689_v36 = vshrl.u32 %v6683_v34, 16  ;;  %v2691_v46 = vshll.u32 %v6683_v34, 16  ;;  %v2696_v47 = vshll.u32 %v6684_v17, 16  ;;  %v6687_v25 = vld [vmem:[#allocation2 + $0x84] sm:$0xfe]  }
  0x7f   : > { %2984 = vrot.lane.b32.xlu1 %v2687_v45, %s6846_s26  ;;  %v1090_v49 = vor.u32 %v1088_v6, %v1087_v39  ;;  %v1092_v50 = vrot.slane %v1087_v39, 4  ;;  %v1611_v51 = vsel %vm6971_vm13, %v1082_v35, %v1610_v44  ;;  %v6688_v56 = vld [vmem:[#allocation2 + $0x8c] ss:$0 sps:$4 sm:$0x11]   ;;  %v3509_v61 = vrot.slane %v6687_v25, 1 }
  0x80   : > { %v2693_v54 = vrot.slane %v2691_v46, 1  ;;  %v2698_v55 = vrot.slane %v2696_v47, 1  ;;  %1612 = vst [vmem:[#allocation2 + $0x90] sm:$0xf] %v1611_v51  ;;  %v1100_v62 = vrot.slane %v1096_v52, 4  ;;  %v3510_v7 = vrot.slane %v6688_v56, 1 }
  0x81   : > { %v1091_v58 = vsel %vm6978_vm14, %v1083_v37, %v1090_v49  ;;  %v1615_v60 = vsel %vm6895_vm3, %v1092_v50, %v1614_v26  ;;  %v1099_v10 = vor.u32 %v1097_v57, %v1096_v52  ;;  %v1102_v40 = vshrl.u32 %v6052_v38, 16  ;;  %v274_v12 = vld [vmem:[#allocation2 + $0xb4] sm:$0x1]  ;;  %v378_v13 = vld [vmem:[#allocation2 + $0xbc] sm:$0x1] }
  0x82   : > { %v2694_v9 = vor.u32 %v2693_v54, %v2689_v36  ;;  %1613 = vst.msk [vmem:[#allocation2 + $0x94] sm:$0xf] %vm1530_vm2, %v1091_v58  ;;  %1616 = vst [vmem:[#allocation2 + $0x98] sm:$0x1] %v1615_v60  ;;  %v1105_v43 = vshll.u32 %v6052_v38, 16  ;;  %v376_v2 = vsel %vm6903_vm5, 0, %v375_v48  ;;  %v3511_v16 = vsel %vm3475_vm7, %v3509_v61, %v3510_v7 }
  0x83   : > { %3598 = vrot.lane.b32.xlu1 %v3508_v53, %s6845_s25  ;;  %vm528_vm11 = vcmp.ge.f32.partialorder %v7233_v8, 0.0  ;;  %vm529_vm12 = vcmp.ge.f32.partialorder %v7236_v59, 0.0  ;;  %v1104_v18 = vrot.slane %v1102_v40, 7  ;;  %v1618_v19 = vsel %vm6971_vm13, %v1099_v10, %v1617_v0  ;;  %377 = vst [vmem:[#allocation2 + $0xb0] sm:$0x1] %v376_v2  ;;  %v7300_v46 = vld [vmem:[%s6933_s24 + $0xf0] sm:$0xff] }
  0x84   : > { %v2699_v14 = vsel %vm2555_vm6, %v2694_v9, %v2698_v55  ;;  %1619 = vst [vmem:[#allocation2 + $0x9c] sm:$0xf] %v1618_v19  ;;  %v1621_v20 = vld [vmem:[#allocation2 + $0xa4] sm:$0x1]  ;;  %v657_v22 = vsel %vm528_vm11, %v7233_v8, %v7248_v21  ;;  %v658_v23 = vsel %vm529_vm12, %v7236_v59, %v594_v31  ;;  %v275_v24 = vsel %vm6895_vm3, 0, %v274_v12  ;;  %v468_v55 = vld [vmem:[%s6933_s24 + $0xf8] sm:$0xff] }
  0x85   : > { %2986 = vrot.lane.b32.xlu0 %v2699_v14, %s6846_s26  ;;  %v379_v27 = vsel %vm6903_vm5, 0, %v378_v13  ;;  %v1107_v44 = vor.u32 %v1105_v43, %v1104_v18  ;;  %v1109_v29 = vrot.slane %v1104_v18, 4  ;;  %v6053_v30 = vpack.c.bf16 %v657_v22, %v657_v22  ;;  %276 = vst [vmem:[#allocation2 + $0xb4] sm:$0x1] %v275_v24  ;;  %v1624_v35 = vld [vmem:[#allocation2 + $0xa8] sm:$0xf] }
  0x86   : > { %v6054_v33 = vpack.c.bf16 %v658_v23, %v658_v23  ;;  %380 = vst [vmem:[#allocation2 + $0xbc] sm:$0x1] %v379_v27  ;;  %vm530_vm15 = vcmp.ge.f32.partialorder %v7239_v11, 0.0  ;;  %vm531_vm1 = vcmp.ge.f32.partialorder %v7243_v15, 0.0  ;;  %v277_v61 = vld [vmem:[#allocation2 + $0xc0] sm:$0x1]  ;;  %v597_v10 = vmul.f32 %v6952_v28, %v7300_v46 }
  0x87   : > { %v1108_v8 = vsel %vm6978_vm14, %v1100_v62, %v1107_v44  ;;  %v1622_v59 = vsel %vm6895_vm3, %v1109_v29, %v1621_v20  ;;  %v1111_v21 = vshrl.u32 %v6053_v30, 16  ;;  %v1114_v31 = vshll.u32 %v6053_v30, 16  ;;  %v381_v2 = vld [vmem:[#allocation2 + $0xc8] sm:$0x1] }
  0x88   : > { %1620 = vst.msk [vmem:[#allocation2 + $0xa0] sm:$0xf] %vm1530_vm2, %v1108_v8  ;;  %1623 = vst [vmem:[#allocation2 + $0xa4] sm:$0x1] %v1622_v59  ;;  %v1119_v17 = vshrl.u32 %v6054_v33, 16  ;;  %v659_v37 = vsel %vm530_vm15, %v7239_v11, %v7254_v32  ;;  %v660_v39 = vsel %vm531_vm1, %v7243_v15, %v7258_v42  ;;  %v1122_v42 = vshll.u32 %v6054_v33, 16 }
  0x89   : > { %v6685_v34 = vld [vmem:[#allocation2 + $0x90] sm:$0xff]   ;;  %3600 = vrot.lane.b32.xlu0 %v3511_v16, %s6845_s25  ;;  %v6686_v6 = vld [vmem:[#allocation2 + $0x98] ss:$0 sps:$4 sm:$0x11]   ;;  %v1113_v26 = vrot.slane %v1111_v21, 7  ;;  %v6055_v36 = vpack.c.bf16 %v659_v37, %v659_v37  ;;  %v6056_v50 = vpack.c.bf16 %v660_v39, %v660_v39  ;;  %v598_v14 = vmul.f32 %v6952_v28, %v468_v55 }
  0x8a   : > { %v2701_v38 = vshrl.u32 %v6685_v34, 16  ;;  %v2703_v41 = vshll.u32 %v6685_v34, 16  ;;  %v6689_v45 = vld [vmem:[#allocation2 + $0x90] sm:$0xfe]   ;;  %v2708_v47 = vshll.u32 %v6686_v6, 16  ;;  %v1121_v11 = vrot.slane %v1119_v17, 7 }
  0x8b   : > { %v6690_v48 = vld [vmem:[#allocation2 + $0x98] ss:$0 sps:$4 sm:$0x11]   ;;  %v1116_v49 = vor.u32 %v1114_v31, %v1113_v26  ;;  %v3512_v25 = vrot.slane %v6689_v45, 1  ;;  %v1117_v52 = vrot.slane %v1113_v26, 4  ;;  %v1128_v58 = vshrl.u32 %v6055_v36, 16 }
  0x8c   : > { %v2705_v51 = vrot.slane %v2703_v41, 1  ;;  %v1628_v32 = vld [vmem:[#allocation2 + $0xb0] sm:$0x1]  ;;  %v2710_v53 = vrot.slane %v2708_v47, 1  ;;  %v3513_v15 = vrot.slane %v6690_v48, 1  ;;  %v1126_v57 = vrot.slane %v1121_v11, 4 }
  0x8d   : > { %v1625_v54 = vsel %vm6971_vm13, %v1116_v49, %v1624_v35  ;;  %v1131_v60 = vshll.u32 %v6055_v36, 16  ;;  %v1124_v0 = vor.u32 %v1122_v42, %v1121_v11  ;;  %v1136_v9 = vshrl.u32 %v6056_v50, 16  ;;  %v1631_v7 = vld [vmem:[#allocation2 + $0xb4] sm:$0xf]  ;;  %v1635_v59 = vld [vmem:[#allocation2 + $0xbc] sm:$0x1] }
  0x8e   : > { %v2706_v56 = vor.u32 %v2705_v51, %v2701_v38  ;;  %1626 = vst [vmem:[#allocation2 + $0xa8] sm:$0xf] %v1625_v54  ;;  %v1629_v13 = vsel %vm6895_vm3, %v1126_v57, %v1628_v32  ;;  %v1130_v43 = vrot.slane %v1128_v58, 7  ;;  %v3514_v16 = vsel %vm3475_vm7, %v3512_v25, %v3513_v15  ;;  %v280_v37 = vld [vmem:[#allocation2 + $0xcc] sm:$0x1]  ;;  %v469_v11 = vld [vmem:[%s6933_s24 + $0x100] sm:$0xff] }
  0x8f   : > { %v6691_v62 = vld [vmem:[#allocation2 + $0x9c] sm:$0xff]   ;;  %v6692_v12 = vld [vmem:[#allocation2 + $0xa4] ss:$0 sps:$4 sm:$0x11]   ;;  %v1125_v20 = vsel %vm6978_vm14, %v1117_v52, %v1124_v0  ;;  %1630 = vst [vmem:[#allocation2 + $0xb0] sm:$0x1] %v1629_v13 }
  0x90   : > { %v2711_v40 = vsel %vm2555_vm6, %v2706_v56, %v2710_v53  ;;  %v2713_v18 = vshrl.u32 %v6691_v62, 16  ;;  %v2715_v19 = vshll.u32 %v6691_v62, 16  ;;  %v6695_v22 = vld [vmem:[#allocation2 + $0x9c] sm:$0xfe]   ;;  %v2720_v23 = vshll.u32 %v6692_v12, 16  ;;  %v470_v32 = vld [vmem:[%s6933_s24 + $0x108] sm:$0xff] }
  0x91   : > { %2988 = vrot.lane.b32.xlu1 %v2711_v40, %s6846_s26  ;;  %1627 = vst.msk [vmem:[#allocation2 + $0xac] sm:$0xf] %vm1530_vm2, %v1125_v20  ;;  %v6696_v24 = vld [vmem:[#allocation2 + $0xa4] ss:$0 sps:$4 sm:$0x11]   ;;  %v1133_v27 = vor.u32 %v1131_v60, %v1130_v43  ;;  %v1134_v44 = vrot.slane %v1130_v43, 4 }
  0x92   : > { %v1138_v29 = vrot.slane %v1136_v9, 7  ;;  %v2717_v30 = vrot.slane %v2715_v19, 1  ;;  %v3515_v33 = vrot.slane %v6695_v22, 1  ;;  %v1139_v8 = vshll.u32 %v6056_v50, 16  ;;  %v384_v54 = vld [vmem:[#allocation2 + $0xd4] sm:$0x1] }
  0x93   : > { %v278_v21 = vsel %vm6895_vm3, 0, %v277_v61  ;;  %v2722_v31 = vrot.slane %v2720_v23, 1  ;;  %v3516_v34 = vrot.slane %v6696_v24, 1  ;;  %v1632_v35 = vsel %vm6971_vm13, %v1133_v27, %v1631_v7  ;;  %v7342_v43 = vld [vmem:[%s6933_s24 + $0x118] sm:$0xff]  ;;  %v6791_v5 = vld [vmem:[#allocation2 + $0x90] sm:$0xff]  }
  0x94   : > { %v1143_v17 = vrot.slane %v1138_v29, 4  ;;  %279 = vst [vmem:[#allocation2 + $0xc0] sm:$0x1] %v278_v21  ;;  %v2718_v39 = vor.u32 %v2717_v30, %v2713_v18  ;;  %v1141_v6 = vor.u32 %v1139_v8, %v1138_v29  ;;  %1633 = vst [vmem:[#allocation2 + $0xb4] sm:$0xf] %v1632_v35  ;;  %v382_v26 = vsel %vm6903_vm5, 0, %v381_v2 }
  0x95   : > { %3602 = vrot.lane.b32.xlu1 %v3514_v16, %s6845_s25  ;;  %vm532_vm4 = vcmp.ge.f32.partialorder %v7300_v46, 0.0  ;;  %383 = vst [vmem:[#allocation2 + $0xc8] sm:$0x1] %v382_v26  ;;  %vm533_vm8 = vcmp.ge.f32.partialorder %v468_v55, 0.0  ;;  %v281_v51 = vsel %vm6895_vm3, 0, %v280_v37  ;;  %v3517_v25 = vsel %vm3475_vm7, %v3515_v33, %v3516_v34 }
  0x96   : > { %v1636_v38 = vsel %vm6895_vm3, %v1143_v17, %v1635_v59  ;;  %v661_v41 = vsel %vm532_vm4, %v7300_v46, %v597_v10  ;;  %v2723_v45 = vsel %vm2555_vm6, %v2718_v39, %v2722_v31  ;;  %v1142_v36 = vsel %vm6978_vm14, %v1134_v44, %v1141_v6  ;;  %v6694_v49 = vld [vmem:[#allocation2 + $0xb0] ss:$0 sps:$4 sm:$0x11]   ;;  %282 = vst [vmem:[#allocation2 + $0xcc] sm:$0x1] %v281_v51 }
  0x97   : > { %1637 = vst [vmem:[#allocation2 + $0xbc] sm:$0x1] %v1636_v38  ;;  %v662_v47 = vsel %vm533_vm8, %v468_v55, %v598_v14  ;;  %v6057_v48 = vpack.c.bf16 %v661_v41, %v661_v41  ;;  %2990 = vrot.lane.b32.xlu0 %v2723_v45, %s6846_s26  ;;  %1634 = vst.msk [vmem:[#allocation2 + $0xb8] sm:$0xf] %vm1530_vm2, %v1142_v36  ;;  %v2732_v53 = vshll.u32 %v6694_v49, 16  ;;  %v7338_v55 = vld [vmem:[%s6933_s24 + $0x110] sm:$0xff] }
  0x98   : > { %v6058_v50 = vpack.c.bf16 %v662_v47, %v662_v47  ;;  %v6693_v46 = vld [vmem:[#allocation2 + $0xa8] sm:$0xff]   ;;  %v6698_v58 = vld [vmem:[#allocation2 + $0xb0] ss:$0 sps:$4 sm:$0x11]   ;;  %v599_v16 = vmul.f32 %v6952_v28, %v469_v11  ;;  %v600_v18 = vmul.f32 %v6952_v28, %v470_v32  ;;  %v385_v24 = vsel %vm6903_vm5, 0, %v384_v54  ;;  %v473_v47 = vld [vmem:[%s6933_s24 + $0x120] sm:$0xff] }
  0x99   : > { %v1145_v52 = vshrl.u32 %v6057_v48, 16  ;;  %v6697_v15 = vld [vmem:[#allocation2 + $0xa8] sm:$0xfe]   ;;  %v1148_v42 = vshll.u32 %v6057_v48, 16  ;;  %v2725_v56 = vshrl.u32 %v6693_v46, 16  ;;  %v2727_v57 = vshll.u32 %v6693_v46, 16 }
  0x9a   : > { %v2734_v61 = vrot.slane %v2732_v53, 1  ;;  %v3518_v62 = vrot.slane %v6697_v15, 1  ;;  %v1153_v0 = vshrl.u32 %v6058_v50, 16  ;;  %v1156_v9 = vshll.u32 %v6058_v50, 16  ;;  %v283_v27 = vld [vmem:[#allocation2 + $0xd8] sm:$0x1] }
  0x9b   : > { %v1147_v60 = vrot.slane %v1145_v52, 7  ;;  %3604 = vrot.lane.b32.xlu0 %v3517_v25, %s6845_s25  ;;  %v2729_v7 = vrot.slane %v2727_v57, 1  ;;  %v3519_v10 = vrot.slane %v6698_v58, 1  ;;  %v1638_v13 = vld [vmem:[#allocation2 + $0xc0] sm:$0xf]  ;;  %v601_v44 = vmul.f32 %v6952_v28, %v7338_v55 }
  0x9c   : > { %v1155_v14 = vrot.slane %v1153_v0, 7  ;;  %v1642_v23 = vld [vmem:[#allocation2 + $0xc8] sm:$0x1]  ;;  %386 = vst [vmem:[#allocation2 + $0xd4] sm:$0x1] %v385_v24  ;;  %v602_v59 = vmul.f32 %v6952_v28, %v7342_v43  ;;  %vm534_vm9 = vcmp.ge.f32.partialorder %v469_v11, 0.0 }
  0x9d   : > { %v1150_v40 = vor.u32 %v1148_v42, %v1147_v60  ;;  %v1151_v12 = vrot.slane %v1147_v60, 4  ;;  %v2730_v19 = vor.u32 %v2729_v7, %v2725_v56  ;;  %v387_v8 = vld [vmem:[#allocation2 + $0xe0] sm:$0x1]  ;;  %v3520_v31 = vsel %vm3475_vm7, %v3518_v62, %v3519_v10  ;;  %v286_v36 = vld [vmem:[#allocation2 + $0xe4] sm:$0x1] }
  0x9e   : > { %v6700_v2 = vld [vmem:[#allocation2 + $0xbc] ss:$0 sps:$4 sm:$0x11]   ;;  %v6699_v20 = vld [vmem:[#allocation2 + $0xb4] sm:$0xff]   ;;  %v1158_v30 = vor.u32 %v1156_v9, %v1155_v14  ;;  %v1160_v33 = vrot.slane %v1155_v14, 4  ;;  %vm535_vm10 = vcmp.ge.f32.partialorder %v470_v32, 0.0  ;;  %v663_v45 = vsel %vm534_vm9, %v469_v11, %v599_v16 }
  0x9f   : > { %v1639_v22 = vsel %vm6971_vm13, %v1150_v40, %v1638_v13  ;;  %v2744_v29 = vshll.u32 %v6700_v2, 16  ;;  %v2735_v21 = vsel %vm2555_vm6, %v2730_v19, %v2734_v61  ;;  %v2737_v34 = vshrl.u32 %v6699_v20, 16  ;;  %v6703_v35 = vld [vmem:[#allocation2 + $0xb4] sm:$0xfe]   ;;  %v390_v46 = vld [vmem:[#allocation2 + $0xec] sm:$0x1] }
  0xa0   : > { %1640 = vst [vmem:[#allocation2 + $0xc0] sm:$0xf] %v1639_v22  ;;  %v2739_v17 = vshll.u32 %v6699_v20, 16  ;;  %2992 = vrot.lane.b32.xlu1 %v2735_v21, %s6846_s26  ;;  %v1159_v39 = vsel %vm6978_vm14, %v1151_v12, %v1158_v30  ;;  %v1643_v6 = vsel %vm6895_vm3, %v1160_v33, %v1642_v23  ;;  %v6704_v26 = vld [vmem:[#allocation2 + $0xbc] ss:$0 sps:$4 sm:$0x11]   ;;  %v664_v49 = vsel %vm535_vm10, %v470_v32, %v600_v18 }
  0xa1   : > { %v2746_v37 = vrot.slane %v2744_v29, 1  ;;  %1641 = vst.msk [vmem:[#allocation2 + $0xc4] sm:$0xf] %vm1530_vm2, %v1159_v39  ;;  %1644 = vst [vmem:[#allocation2 + $0xc8] sm:$0x1] %v1643_v6  ;;  %v3521_v41 = vrot.slane %v6703_v35, 1  ;;  %v6059_v50 = vpack.c.bf16 %v663_v45, %v663_v45  ;;  %v6060_v52 = vpack.c.bf16 %v664_v49, %v664_v49 }
  0xa2   : > { %v2741_v38 = vrot.slane %v2739_v17, 1  ;;  %v3522_v48 = vrot.slane %v6704_v26, 1  ;;  %v284_v51 = vsel %vm6895_vm3, 0, %v283_v27  ;;  %v388_v53 = vsel %vm6903_vm5, 0, %v387_v8  ;;  %v474_v32 = vld [vmem:[%s6933_s24 + $0x128] sm:$0xff] }
  0xa3   : > { %285 = vst [vmem:[#allocation2 + $0xd8] sm:$0x1] %v284_v51  ;;  %vm536_vm11 = vcmp.ge.f32.partialorder %v7338_v55, 0.0  ;;  %v1162_v11 = vshrl.u32 %v6059_v50, 16  ;;  %v1165_v15 = vshll.u32 %v6059_v50, 16  ;;  %vm537_vm12 = vcmp.ge.f32.partialorder %v7342_v43, 0.0 }
  0xa4   : > { %v2742_v25 = vor.u32 %v2741_v38, %v2737_v34  ;;  %3606 = vrot.lane.b32.xlu1 %v3520_v31, %s6845_s25  ;;  %389 = vst [vmem:[#allocation2 + $0xe0] sm:$0x1] %v388_v53  ;;  %v603_v42 = vmul.f32 %v6952_v28, %v473_v47  ;;  %v1170_v56 = vshrl.u32 %v6060_v52, 16  ;;  %v1173_v57 = vshll.u32 %v6060_v52, 16  ;;  %v1645_v58 = vld [vmem:[#allocation2 + $0xcc] sm:$0xf] }
  0xa5   : > { %v665_v60 = vsel %vm536_vm11, %v7338_v55, %v601_v44  ;;  %v3523_v61 = vsel %vm3475_vm7, %v3521_v41, %v3522_v48  ;;  %v1164_v62 = vrot.slane %v1162_v11, 7  ;;  %v1649_v0 = vld [vmem:[#allocation2 + $0xd4] sm:$0x1]  ;;  %v666_v9 = vsel %vm537_vm12, %v7342_v43, %v602_v59  ;;  %v289_v26 = vld [vmem:[#allocation2 + $0xf0] sm:$0x1] }
  0xa6   : > { %v2747_v54 = vsel %vm2555_vm6, %v2742_v25, %v2746_v37  ;;  %v287_v7 = vsel %vm6895_vm3, 0, %v286_v36  ;;  %v1172_v10 = vrot.slane %v1170_v56, 7  ;;  %v6061_v40 = vpack.c.bf16 %v665_v60, %v665_v60  ;;  %v6762_v25 = vld [vmem:[%s8591_s2] sm:$0xff]   ;;  %v393_v60 = vld [vmem:[#allocation2 + $0xf8] sm:$0x1] }
  0xa7   : > { %2994 = vrot.lane.b32.xlu0 %v2747_v54, %s6846_s26  ;;  %288 = vst [vmem:[#allocation2 + $0xe4] sm:$0x1] %v287_v7  ;;  %v391_v12 = vsel %vm6903_vm5, 0, %v390_v46  ;;  %vm538_vm15 = vcmp.ge.f32.partialorder %v473_v47, 0.0  ;;  %v1167_v55 = vor.u32 %v1165_v15, %v1164_v62  ;;  %v1168_v2 = vrot.slane %v1164_v62, 4  ;;  %v6761_v46 = vld [vmem:[%s8591_s2 + $0x14] sm:$0xff]   ;;  %6334 = vmatprep.subr.bf16.mxu0 %v6762_v25 }
  0xa8   : > { %v6701_v13 = vld [vmem:[#allocation2 + $0xc0] sm:$0xff]   ;;  %v6062_v14 = vpack.c.bf16 %v666_v9, %v666_v9  ;;  %392 = vst [vmem:[#allocation2 + $0xec] sm:$0x1] %v391_v12  ;;  %v667_v16 = vsel %vm538_vm15, %v473_v47, %v603_v42  ;;  %v6702_v18 = vld [vmem:[#allocation2 + $0xc8] ss:$0 sps:$4 sm:$0x11]   ;;  %v1175_v19 = vor.u32 %v1173_v57, %v1172_v10  ;;  %v604_v43 = vmul.f32 %v6952_v28, %v474_v32 }
  0xa9   : > { %v1177_v20 = vrot.slane %v1172_v10, 4  ;;  %v2749_v22 = vshrl.u32 %v6701_v13, 16  ;;  %v2751_v23 = vshll.u32 %v6701_v13, 16  ;;  %v6705_v24 = vld [vmem:[#allocation2 + $0xc0] sm:$0xfe]   ;;  %v1646_v27 = vsel %vm6971_vm13, %v1167_v55, %v1645_v58  ;;  %v475_v42 = vld [vmem:[%s6933_s24 + $0x130] sm:$0xff]  ;;  %6264 = vmatprep.subr.bf16.mxu1 %v6761_v46  ;;  %6335 = vmatpush3.bf16.msra.mxu0 %v6762_v25 }
  0xaa   : > { %v6063_v44 = vpack.c.bf16 %v667_v16, %v667_v16  ;;  %v2756_v29 = vshll.u32 %v6702_v18, 16  ;;  %v6706_v30 = vld [vmem:[#allocation2 + $0xc8] ss:$0 sps:$4 sm:$0x11]   ;;  %v1176_v33 = vsel %vm6978_vm14, %v1168_v2, %v1175_v19  ;;  %1647 = vst [vmem:[#allocation2 + $0xcc] sm:$0xf] %v1646_v27  ;;  %6265 = vmatpush3.bf16.msra.mxu1 %v6761_v46 }
  0xab   : > { %3608 = vrot.lane.b32.xlu0 %v3523_v61, %s6845_s25  ;;  %v1650_v8 = vsel %vm6895_vm3, %v1177_v20, %v1649_v0  ;;  %v1179_v59 = vshrl.u32 %v6061_v40, 16  ;;  %v2753_v21 = vrot.slane %v2751_v23, 1  ;;  %v3524_v31 = vrot.slane %v6705_v24, 1  ;;  %1648 = vst.msk [vmem:[#allocation2 + $0xd0] sm:$0xf] %vm1530_vm2, %v1176_v33  ;;  %v476_v61 = vld [vmem:[%s6933_s24 + $0x138] sm:$0xff] }
  0xac   : > { %1651 = vst [vmem:[#allocation2 + $0xd4] sm:$0x1] %v1650_v8  ;;  %v1182_v34 = vshll.u32 %v6061_v40, 16  ;;  %v1187_v17 = vshrl.u32 %v6062_v14, 16  ;;  %v2758_v35 = vrot.slane %v2756_v29, 1  ;;  %v3525_v37 = vrot.slane %v6706_v30, 1 }
  0xad   : > { %v1181_v39 = vrot.slane %v1179_v59, 7  ;;  %v1190_v6 = vshll.u32 %v6062_v14, 16  ;;  %v2754_v38 = vor.u32 %v2753_v21, %v2749_v22  ;;  %v1652_v45 = vld [vmem:[#allocation2 + $0xd8] sm:$0xf]  ;;  %vm539_vm1 = vcmp.ge.f32.partialorder %v474_v32, 0.0  ;;  %v6768_v33 = vld [vmem:[%s8591_s2 + $0x1c] sm:$0xff]  }
  0xae   : > { %v1189_v41 = vrot.slane %v1187_v17, 7  ;;  %v1196_v36 = vshrl.u32 %v6063_v44, 16  ;;  %v3526_v47 = vsel %vm3475_vm7, %v3524_v31, %v3525_v37  ;;  %v1656_v50 = vld [vmem:[#allocation2 + $0xe0] sm:$0x1]  ;;  %v668_v51 = vsel %vm539_vm1, %v474_v32, %v604_v43  ;;  %v1659_v57 = vld [vmem:[#allocation2 + $0xe4] sm:$0xf]  ;;  %6266 = vmatprep.subr.bf16.mxu1 %v6768_v33 }
  0xaf   : > { %v1184_v48 = vor.u32 %v1182_v34, %v1181_v39  ;;  %v1185_v49 = vrot.slane %v1181_v39, 4  ;;  %v2759_v52 = vsel %vm2555_vm6, %v2754_v38, %v2758_v35  ;;  %v6064_v15 = vpack.c.bf16 %v668_v51, %v668_v51  ;;  %v1663_v13 = vld [vmem:[#allocation2 + $0xec] sm:$0x1]  ;;  %v292_v22 = vld [vmem:[#allocation2 + $0xfc] sm:$0x1]  ;;  %6267 = vmatpush3.bf16.msra.mxu1 %v6768_v33 }
  0xb0   : > { %v1192_v53 = vor.u32 %v1190_v6, %v1189_v41  ;;  %v1194_v11 = vrot.slane %v1189_v41, 4  ;;  %2996 = vrot.lane.b32.xlu1 %v2759_v52, %s6846_s26  ;;  %v1198_v32 = vrot.slane %v1196_v36, 7  ;;  %v1199_v56 = vshll.u32 %v6063_v44, 16  ;;  %v6769_v8 = vld [vmem:[%s8591_s2 + $0x8] sm:$0xff]   ;;  %v396_v17 = vld [vmem:[#allocation2 + $0x104] sm:$0x1] }
  0xb1   : > { %v1653_v54 = vsel %vm6971_vm13, %v1184_v48, %v1652_v45  ;;  %v290_v58 = vsel %vm6895_vm3, 0, %v289_v26  ;;  %v1204_v9 = vshrl.u32 %v6064_v15, 16  ;;  %v1207_v7 = vshll.u32 %v6064_v15, 16  ;;  %6336 = vmatprep.subr.bf16.mxu0 %v6769_v8  ;;  %v7430_v45 = vpop.permute.xlu0 %2964  ;;  %v7439_v51 = vld [vmem:[%s6933_s24 + $0x148] sm:$0xff] }
  0xb2   : > { %v1193_v62 = vsel %vm6978_vm14, %v1185_v49, %v1192_v53  ;;  %1654 = vst [vmem:[#allocation2 + $0xd8] sm:$0xf] %v1653_v54  ;;  %v1657_v0 = vsel %vm6895_vm3, %v1194_v11, %v1656_v50  ;;  %291 = vst [vmem:[#allocation2 + $0xf0] sm:$0x1] %v290_v58  ;;  %v6707_v10 = vld [vmem:[#allocation2 + $0xcc] sm:$0xff]   ;;  %v1201_v40 = vor.u32 %v1199_v56, %v1198_v32  ;;  %v1202_v12 = vrot.slane %v1198_v32, 4 }
  0xb3   : > { %1655 = vst.msk [vmem:[#allocation2 + $0xdc] sm:$0xf] %vm1530_vm2, %v1193_v62  ;;  %1658 = vst [vmem:[#allocation2 + $0xe0] sm:$0x1] %v1657_v0  ;;  %v1206_v2 = vrot.slane %v1204_v9, 7  ;;  %v605_v14 = vmul.f32 %v6952_v28, %v475_v42  ;;  %v2761_v16 = vshrl.u32 %v6707_v10, 16  ;;  %v606_v43 = vmul.f32 %v6952_v28, %v476_v61  ;;  %6337 = vmatpush3.bf16.msra.mxu0 %v6769_v8 }
  0xb4   : > { %v6708_v55 = vld [vmem:[#allocation2 + $0xd4] ss:$0 sps:$4 sm:$0x11]   ;;  %3610 = vrot.lane.b32.xlu1 %v3526_v47, %s6845_s25  ;;  %v2763_v18 = vshll.u32 %v6707_v10, 16  ;;  %v6711_v19 = vld [vmem:[#allocation2 + $0xcc] sm:$0xfe]   ;;  %v1660_v20 = vsel %vm6971_vm13, %v1201_v40, %v1659_v57 }
  0xb5   : > { %v2768_v23 = vshll.u32 %v6708_v55, 16  ;;  %v6712_v24 = vld [vmem:[#allocation2 + $0xd4] ss:$0 sps:$4 sm:$0x11]   ;;  %v1209_v27 = vor.u32 %v1207_v7, %v1206_v2  ;;  %v1211_v44 = vrot.slane %v1206_v2, 4  ;;  %v394_v29 = vsel %vm6903_vm5, 0, %v393_v60  ;;  %v7449_v7 = vpop.permute.xlu1 %3578 }
  0xb6   : > { %1661 = vst [vmem:[#allocation2 + $0xe4] sm:$0xf] %v1660_v20  ;;  %v2765_v30 = vrot.slane %v2763_v18, 1  ;;  %395 = vst [vmem:[#allocation2 + $0xf8] sm:$0x1] %v394_v29  ;;  %vm540_vm4 = vcmp.ge.f32.partialorder %v475_v42, 0.0  ;;  %v608_v2 = vmul.f32 %v6952_v28, %v7439_v51 }
  0xb7   : > { %vm541_vm8 = vcmp.ge.f32.partialorder %v476_v61, 0.0  ;;  %v2770_v59 = vrot.slane %v2768_v23, 1  ;;  %v3527_v21 = vrot.slane %v6711_v19, 1  ;;  %v1210_v31 = vsel %vm6978_vm14, %v1202_v12, %v1209_v27  ;;  %v7436_v50 = vld [vmem:[%s6933_s24 + $0x140] sm:$0xff]  ;;  %v7444_v57 = vld [vmem:[%s6933_s24 + $0x150] sm:$0xff]  ;;  %v7447_v58 = vld [vmem:[%s6933_s24 + $0x158] sm:$0xff] }
  0xb8   : > { %v1664_v34 = vsel %vm6895_vm3, %v1211_v44, %v1663_v13  ;;  %v2766_v35 = vor.u32 %v2765_v30, %v2761_v16  ;;  %v3528_v37 = vrot.slane %v6712_v24, 1  ;;  %1662 = vst.msk [vmem:[#allocation2 + $0xe8] sm:$0xf] %vm1530_vm2, %v1210_v31  ;;  %v669_v39 = vsel %vm540_vm4, %v475_v42, %v605_v14  ;;  %v7456_v14 = vpop.permute.xlu0 %2966  ;;  %v295_v20 = vld [vmem:[#allocation2 + $0x108] sm:$0x1] }
  0xb9   : > { %1665 = vst [vmem:[#allocation2 + $0xec] sm:$0x1] %v1664_v34  ;;  %v670_v6 = vsel %vm541_vm8, %v476_v61, %v606_v43  ;;  %v6065_v38 = vpack.c.bf16 %v669_v39, %v669_v39  ;;  %v293_v41 = vsel %vm6895_vm3, 0, %v292_v22  ;;  %v397_v49 = vsel %vm6903_vm5, 0, %v396_v17  ;;  %v1666_v9 = vld [vmem:[#allocation2 + $0xf0] sm:$0xf] }
  0xba   : > { %v6709_v26 = vld [vmem:[#allocation2 + $0xd8] sm:$0xff]   ;;  %v2771_v36 = vsel %vm2555_vm6, %v2766_v35, %v2770_v59  ;;  %v6710_v47 = vld [vmem:[#allocation2 + $0xe0] ss:$0 sps:$4 sm:$0x11]   ;;  %v6066_v48 = vpack.c.bf16 %v670_v6, %v670_v6  ;;  %294 = vst [vmem:[#allocation2 + $0xfc] sm:$0x1] %v293_v41  ;;  %v3529_v11 = vsel %vm3475_vm7, %v3527_v21, %v3528_v37  ;;  %v607_v55 = vmul.f32 %v6952_v28, %v7436_v50  ;;  %v7473_v41 = vpop.permute.xlu1 %2968 }
  0xbb   : > { %2998 = vrot.lane.b32.xlu0 %v2771_v36, %s6846_s26  ;;  %v2773_v46 = vshrl.u32 %v6709_v26, 16  ;;  %v2775_v25 = vshll.u32 %v6709_v26, 16  ;;  %v6713_v52 = vld [vmem:[#allocation2 + $0xd8] sm:$0xfe]   ;;  %398 = vst [vmem:[#allocation2 + $0x104] sm:$0x1] %v397_v49  ;;  %v609_v43 = vmul.f32 %v6952_v28, %v7444_v57  ;;  %v610_v22 = vmul.f32 %v6952_v28, %v7447_v58 }
  0xbc   : > { %v2780_v53 = vshll.u32 %v6710_v47, 16  ;;  %v6714_v15 = vld [vmem:[#allocation2 + $0xe0] ss:$0 sps:$4 sm:$0x11]   ;;  %v3530_v54 = vrot.slane %v6713_v52, 1  ;;  %v1213_v32 = vshrl.u32 %v6065_v38, 16  ;;  %v7480_v49 = vpop.permute.xlu0 %3580 }
  0xbd   : > { %v2777_v42 = vrot.slane %v2775_v25, 1  ;;  %v1216_v56 = vshll.u32 %v6065_v38, 16  ;;  %v3531_v61 = vrot.slane %v6714_v15, 1  ;;  %v1221_v62 = vshrl.u32 %v6066_v48, 16  ;;  %v1670_v13 = vld [vmem:[#allocation2 + $0xf8] sm:$0x1] }
  0xbe   : > { %v2782_v60 = vrot.slane %v2780_v53, 1  ;;  %v1224_v0 = vshll.u32 %v6066_v48, 16  ;;  %v1215_v12 = vrot.slane %v1213_v32, 7  ;;  %vm542_vm9 = vcmp.ge.f32.partialorder %v7436_v50, 0.0  ;;  %v399_v35 = vld [vmem:[#allocation2 + $0x110] sm:$0x1] }
  0xbf   : > { %v2778_v10 = vor.u32 %v2777_v42, %v2773_v46  ;;  %3612 = vrot.lane.b32.xlu0 %v3529_v11, %s6845_s25  ;;  %v6715_v40 = vld [vmem:[#allocation2 + $0xe4] sm:$0xff]   ;;  %v3532_v16 = vsel %vm3475_vm7, %v3530_v54, %v3531_v61  ;;  %v1223_v19 = vrot.slane %v1221_v62, 7  ;;  %vm543_vm10 = vcmp.ge.f32.partialorder %v7439_v51, 0.0  ;;  %v298_v53 = vld [vmem:[#allocation2 + $0x114] sm:$0x1]  ;;  %v7500_v62 = vld [vmem:[%s6933_s24 + $0x178] sm:$0xff] }
  0xc0   : > { %v6716_v18 = vld [vmem:[#allocation2 + $0xec] ss:$0 sps:$4 sm:$0x11]   ;;  %v2785_v24 = vshrl.u32 %v6715_v40, 16  ;;  %v2787_v27 = vshll.u32 %v6715_v40, 16  ;;  %v1218_v44 = vor.u32 %v1216_v56, %v1215_v12  ;;  %v1219_v33 = vrot.slane %v1215_v12, 4 }
  0xc1   : > { %v2783_v23 = vsel %vm2555_vm6, %v2778_v10, %v2782_v60  ;;  %v6719_v29 = vld [vmem:[#allocation2 + $0xe4] sm:$0xfe]   ;;  %v2792_v30 = vshll.u32 %v6716_v18, 16  ;;  %v1226_v8 = vor.u32 %v1224_v0, %v1223_v19  ;;  %v1228_v59 = vrot.slane %v1223_v19, 4  ;;  %v402_v42 = vld [vmem:[#allocation2 + $0x11c] sm:$0x1] }
  0xc2   : > { %3000 = vrot.lane.b32.xlu1 %v2783_v23, %s6846_s26  ;;  %v6720_v21 = vld [vmem:[#allocation2 + $0xec] ss:$0 sps:$4 sm:$0x11]   ;;  %v2789_v31 = vrot.slane %v2787_v27, 1  ;;  %v1667_v34 = vsel %vm6971_vm13, %v1218_v44, %v1666_v9  ;;  %v3533_v17 = vrot.slane %v6719_v29, 1  ;;  %v481_v37 = vld [vmem:[%s6933_s24 + $0x160] sm:$0xff]  ;;  %v671_v47 = vsel %vm542_vm9, %v7436_v50, %v607_v55 }
  0xc3   : > { %v2794_v39 = vrot.slane %v2792_v30, 1  ;;  %v1227_v6 = vsel %vm6978_vm14, %v1219_v33, %v1226_v8  ;;  %1668 = vst [vmem:[#allocation2 + $0xf0] sm:$0xf] %v1667_v34  ;;  %v1671_v26 = vsel %vm6895_vm3, %v1228_v59, %v1670_v13  ;;  %v3534_v38 = vrot.slane %v6720_v21, 1  ;;  %v7497_v61 = vld [vmem:[%s6933_s24 + $0x170] sm:$0xff] }
  0xc4   : > { %v2790_v36 = vor.u32 %v2789_v31, %v2785_v24  ;;  %1669 = vst.msk [vmem:[#allocation2 + $0xf4] sm:$0xf] %vm1530_vm2, %v1227_v6  ;;  %1672 = vst [vmem:[#allocation2 + $0xf8] sm:$0x1] %v1671_v26  ;;  %v296_v48 = vsel %vm6895_vm3, 0, %v295_v20  ;;  %v672_v46 = vsel %vm543_vm10, %v7439_v51, %v608_v2  ;;  %v6067_v25 = vpack.c.bf16 %v671_v47, %v671_v47  ;;  %v7491_v51 = vld [vmem:[%s6933_s24 + $0x168] sm:$0xff] }
  0xc5   : > { %297 = vst [vmem:[#allocation2 + $0x108] sm:$0x1] %v296_v48  ;;  %v400_v52 = vsel %vm6903_vm5, 0, %v399_v35  ;;  %v611_v50 = vmul.f32 %v6952_v28, %v481_v37  ;;  %v6068_v15 = vpack.c.bf16 %v672_v46, %v672_v46  ;;  %vm544_vm11 = vcmp.ge.f32.partialorder %v7444_v57, 0.0  ;;  %v1673_v10 = vld [vmem:[#allocation2 + $0xfc] sm:$0xf] }
  0xc6   : > { %3614 = vrot.lane.b32.xlu1 %v3532_v16, %s6845_s25  ;;  %v2795_v11 = vsel %vm2555_vm6, %v2790_v36, %v2794_v39  ;;  %401 = vst [vmem:[#allocation2 + $0x110] sm:$0x1] %v400_v52  ;;  %vm545_vm12 = vcmp.ge.f32.partialorder %v7447_v58, 0.0  ;;  %v3535_v54 = vsel %vm3475_vm7, %v3533_v17, %v3534_v38  ;;  %v1230_v32 = vshrl.u32 %v6067_v25, 16  ;;  %v1677_v55 = vld [vmem:[#allocation2 + $0x104] sm:$0x1] }
  0xc7   : > { %3002 = vrot.lane.b32.xlu0 %v2795_v11, %s6846_s26  ;;  %v1233_v56 = vshll.u32 %v6067_v25, 16  ;;  %v673_v60 = vsel %vm544_vm11, %v7444_v57, %v609_v43  ;;  %v1238_v0 = vshrl.u32 %v6068_v15, 16  ;;  %v1241_v9 = vshll.u32 %v6068_v15, 16  ;;  %v7507_v57 = vpop.permute.xlu1 %3582  ;;  %v7509_v43 = vpop.permute.xlu0 %2970  ;;  %v301_v46 = vld [vmem:[#allocation2 + $0x120] sm:$0x1] }
  0xc8   : > { %v674_v40 = vsel %vm545_vm12, %v7447_v58, %v610_v22  ;;  %v6069_v12 = vpack.c.bf16 %v673_v60, %v673_v60  ;;  %v1232_v13 = vrot.slane %v1230_v32, 7  ;;  %v299_v2 = vsel %vm6895_vm3, 0, %v298_v53 }
  0xc9   : > { %v403_v16 = vsel %vm6903_vm5, 0, %v402_v42  ;;  %vm546_vm15 = vcmp.ge.f32.partialorder %v481_v37, 0.0  ;;  %v1240_v18 = vrot.slane %v1238_v0, 7  ;;  %300 = vst [vmem:[#allocation2 + $0x114] sm:$0x1] %v299_v2  ;;  %v6070_v24 = vpack.c.bf16 %v674_v40, %v674_v40 }
  0xca   : > { %v1247_v19 = vshrl.u32 %v6069_v12, 16  ;;  %404 = vst [vmem:[#allocation2 + $0x11c] sm:$0x1] %v403_v16  ;;  %v675_v20 = vsel %vm546_vm15, %v481_v37, %v611_v50  ;;  %v1235_v22 = vor.u32 %v1233_v56, %v1232_v13  ;;  %v1236_v23 = vrot.slane %v1232_v13, 4  ;;  %v405_v0 = vld [vmem:[#allocation2 + $0x128] sm:$0x1] }
  0xcb   : > { %v6717_v58 = vld [vmem:[#allocation2 + $0xf0] sm:$0xff]   ;;  %3616 = vrot.lane.b32.xlu0 %v3535_v54, %s6845_s25  ;;  %v612_v27 = vmul.f32 %v6952_v28, %v7491_v51  ;;  %v6718_v44 = vld [vmem:[#allocation2 + $0xf8] ss:$0 sps:$4 sm:$0x11]   ;;  %v1243_v29 = vor.u32 %v1241_v9, %v1240_v18  ;;  %v1245_v30 = vrot.slane %v1240_v18, 4  ;;  %v613_v33 = vmul.f32 %v6952_v28, %v7497_v61  ;;  %v7525_v25 = vpop.permute.xlu1 %2972  ;;  %v7527_v42 = vpop.permute.xlu0 %3584 }
  0xcc   : > { %v614_v8 = vmul.f32 %v6952_v28, %v7500_v62  ;;  %v2797_v59 = vshrl.u32 %v6717_v58, 16  ;;  %v2799_v21 = vshll.u32 %v6717_v58, 16  ;;  %v6721_v31 = vld [vmem:[#allocation2 + $0xf0] sm:$0xfe]   ;;  %v1674_v34 = vsel %vm6971_vm13, %v1235_v22, %v1673_v10  ;;  %v1680_v15 = vld [vmem:[#allocation2 + $0x108] sm:$0xf] }
  0xcd   : > { %v6071_v17 = vpack.c.bf16 %v675_v20, %v675_v20  ;;  %v2804_v35 = vshll.u32 %v6718_v44, 16  ;;  %v6722_v37 = vld [vmem:[#allocation2 + $0xf8] ss:$0 sps:$4 sm:$0x11]   ;;  %v1244_v39 = vsel %vm6978_vm14, %v1236_v23, %v1243_v29  ;;  %1675 = vst [vmem:[#allocation2 + $0xfc] sm:$0xf] %v1674_v34  ;;  %v1678_v6 = vsel %vm6895_vm3, %v1245_v30, %v1677_v55 }
  0xce   : > { %v1249_v26 = vrot.slane %v1247_v19, 7  ;;  %v2801_v38 = vrot.slane %v2799_v21, 1  ;;  %v3536_v36 = vrot.slane %v6721_v31, 1  ;;  %1676 = vst.msk [vmem:[#allocation2 + $0x100] sm:$0xf] %vm1530_vm2, %v1244_v39  ;;  %v1250_v47 = vshll.u32 %v6069_v12, 16 }
  0xcf   : > { %1679 = vst [vmem:[#allocation2 + $0x104] sm:$0x1] %v1678_v6  ;;  %v1255_v48 = vshrl.u32 %v6070_v24, 16  ;;  %v2806_v52 = vrot.slane %v2804_v35, 1  ;;  %v3537_v53 = vrot.slane %v6722_v37, 1  ;;  %v1258_v11 = vshll.u32 %v6070_v24, 16  ;;  %v7546_v24 = vpop.permute.xlu1 %3586  ;;  %v7551_v21 = vpop.permute.xlu0 %2974 }
  0xd0   : > { %v1253_v50 = vrot.slane %v1249_v26, 4  ;;  %v2802_v54 = vor.u32 %v2801_v38, %v2797_v59  ;;  %v1252_v32 = vor.u32 %v1250_v47, %v1249_v26  ;;  %v1684_v60 = vld [vmem:[#allocation2 + $0x110] sm:$0x1]  ;;  %vm547_vm1 = vcmp.ge.f32.partialorder %v7491_v51, 0.0  ;;  %v1687_v18 = vld [vmem:[#allocation2 + $0x114] sm:$0xf] }
  0xd1   : > { %v1257_v56 = vrot.slane %v1255_v48, 7  ;;  %v3538_v9 = vsel %vm3475_vm7, %v3536_v36, %v3537_v53  ;;  %v676_v10 = vsel %vm547_vm1, %v7491_v51, %v612_v27  ;;  %v1264_v40 = vshrl.u32 %v6071_v17, 16 }
  0xd2   : > { %v1267_v12 = vshll.u32 %v6071_v17, 16  ;;  %v2807_v13 = vsel %vm2555_vm6, %v2802_v54, %v2806_v52  ;;  %v1681_v16 = vsel %vm6971_vm13, %v1252_v32, %v1680_v15  ;;  %v6072_v19 = vpack.c.bf16 %v676_v10, %v676_v10  ;;  %v485_v52 = vld [vmem:[%s6933_s24 + $0x180] sm:$0xff]  ;;  %v486_v10 = vld [vmem:[%s6933_s24 + $0x188] sm:$0xff] }
  0xd3   : > { %v1260_v55 = vor.u32 %v1258_v11, %v1257_v56  ;;  %v1262_v2 = vrot.slane %v1257_v56, 4  ;;  %3004 = vrot.lane.b32.xlu1 %v2807_v13, %s6846_s26  ;;  %1682 = vst [vmem:[#allocation2 + $0x108] sm:$0xf] %v1681_v16  ;;  %v1266_v20 = vrot.slane %v1264_v40, 7  ;;  %v302_v58 = vsel %vm6895_vm3, 0, %v301_v46  ;;  %v7559_v15 = vpop.permute.xlu1 %2976  ;;  %v7563_v40 = vpop.permute.xlu0 %3588 }
  0xd4   : > { %v406_v51 = vsel %vm6903_vm5, 0, %v405_v0  ;;  %303 = vst [vmem:[#allocation2 + $0x120] sm:$0x1] %v302_v58  ;;  %vm548_vm4 = vcmp.ge.f32.partialorder %v7497_v61, 0.0  ;;  %vm549_vm8 = vcmp.ge.f32.partialorder %v7500_v62, 0.0  ;;  %v1272_v34 = vshrl.u32 %v6072_v19, 16 }
  0xd5   : > { %v1261_v22 = vsel %vm6978_vm14, %v1253_v50, %v1260_v55  ;;  %v1685_v23 = vsel %vm6895_vm3, %v1262_v2, %v1684_v60  ;;  %407 = vst [vmem:[#allocation2 + $0x128] sm:$0x1] %v406_v51  ;;  %v6723_v27 = vld [vmem:[#allocation2 + $0xfc] sm:$0xff]   ;;  %v1269_v44 = vor.u32 %v1267_v12, %v1266_v20  ;;  %v1270_v29 = vrot.slane %v1266_v20, 4  ;;  %v408_v2 = vld [vmem:[#allocation2 + $0x134] sm:$0x1] }
  0xd6   : > { %1683 = vst.msk [vmem:[#allocation2 + $0x10c] sm:$0xf] %vm1530_vm2, %v1261_v22  ;;  %1686 = vst [vmem:[#allocation2 + $0x110] sm:$0x1] %v1685_v23  ;;  %v677_v30 = vsel %vm548_vm4, %v7497_v61, %v613_v33  ;;  %v678_v59 = vsel %vm549_vm8, %v7500_v62, %v614_v8  ;;  %v2809_v35 = vshrl.u32 %v6723_v27, 16  ;;  %v2811_v37 = vshll.u32 %v6723_v27, 16 }
  0xd7   : > { %v6724_v31 = vld [vmem:[#allocation2 + $0x104] ss:$0 sps:$4 sm:$0x11]   ;;  %v6073_v17 = vpack.c.bf16 %v677_v30, %v677_v30  ;;  %3618 = vrot.lane.b32.xlu1 %v3538_v9, %s6845_s25  ;;  %v6727_v39 = vld [vmem:[#allocation2 + $0xfc] sm:$0xfe]   ;;  %v1688_v6 = vsel %vm6971_vm13, %v1269_v44, %v1687_v18  ;;  %v7556_v26 = vpack.c.bf16 %v678_v59, %v678_v59  ;;  %v1274_v33 = vrot.slane %v1272_v34, 7 }
  0xd8   : > { %v2816_v38 = vshll.u32 %v6724_v31, 16  ;;  %v6728_v61 = vld [vmem:[#allocation2 + $0x104] ss:$0 sps:$4 sm:$0x11]   ;;  %v1275_v62 = vshll.u32 %v6072_v19, 16  ;;  %v2813_v36 = vrot.slane %v2811_v37, 1  ;;  %v615_v27 = vmul.f32 %v6952_v28, %v485_v52 }
  0xd9   : > { %1689 = vst [vmem:[#allocation2 + $0x114] sm:$0xf] %v1688_v6  ;;  %v1691_v8 = vld [vmem:[#allocation2 + $0x11c] sm:$0x1]  ;;  %v3539_v47 = vrot.slane %v6727_v39, 1  ;;  %v1281_v48 = vshrl.u32 %v6073_v17, 16  ;;  %v616_v34 = vmul.f32 %v6952_v28, %v486_v10 }
  0xda   : > { %v1284_v46 = vshll.u32 %v6073_v17, 16  ;;  %v2818_v53 = vrot.slane %v2816_v38, 1  ;;  %v3540_v50 = vrot.slane %v6728_v61, 1  ;;  %v1277_v11 = vor.u32 %v1275_v62, %v1274_v33  ;;  %v304_v9 = vld [vmem:[#allocation2 + $0x12c] sm:$0x1]  ;;  %v7580_v38 = vpop.permute.xlu1 %3590 }
  0xdb   : > { %v2814_v54 = vor.u32 %v2813_v36, %v2809_v35  ;;  %v1279_v32 = vrot.slane %v1274_v33, 4  ;;  %v1283_v56 = vrot.slane %v1281_v48, 7  ;;  %v1289_v60 = vshrl.u32 %v7556_v26, 16  ;;  %v1694_v0 = vld [vmem:[#allocation2 + $0x120] sm:$0xf]  ;;  %8610 = vst [vmem:[#allocation7_spill] sm:$0xff] %v7580_v38 }
  0xdc   : > { %v1278_v13 = vsel %vm6978_vm14, %v1270_v29, %v1277_v11  ;;  %v1292_v55 = vshll.u32 %v7556_v26, 16  ;;  %v307_v44 = vld [vmem:[#allocation2 + $0x138] sm:$0x1]  ;;  %v3541_v30 = vsel %vm3475_vm7, %v3539_v47, %v3540_v50  ;;  %v1698_v39 = vld [vmem:[#allocation2 + $0x128] sm:$0x1]  ;;  %v305_v6 = vsel %vm6895_vm3, 0, %v304_v9 }
  0xdd   : > { %v6725_v12 = vld [vmem:[#allocation2 + $0x108] sm:$0xff]   ;;  %v2819_v16 = vsel %vm2555_vm6, %v2814_v54, %v2818_v53  ;;  %v6726_v18 = vld [vmem:[#allocation2 + $0x110] ss:$0 sps:$4 sm:$0x11]   ;;  %1690 = vst.msk [vmem:[#allocation2 + $0x118] sm:$0xf] %vm1530_vm2, %v1278_v13  ;;  %v1692_v19 = vsel %vm6895_vm3, %v1279_v32, %v1691_v8  ;;  %v1286_v20 = vor.u32 %v1284_v46, %v1283_v56  ;;  %v7584_v8 = vpop.permute.xlu0 %2978 }
  0xde   : > { %v1287_v58 = vrot.slane %v1283_v56, 4  ;;  %3006 = vrot.lane.b32.xlu0 %v2819_v16, %s6846_s26  ;;  %v2821_v51 = vshrl.u32 %v6725_v12, 16  ;;  %v2823_v22 = vshll.u32 %v6725_v12, 16  ;;  %v6729_v23 = vld [vmem:[#allocation2 + $0x108] sm:$0xfe]   ;;  %v2828_v29 = vshll.u32 %v6726_v18, 16 }
  0xdf   : > { %1693 = vst [vmem:[#allocation2 + $0x11c] sm:$0x1] %v1692_v19  ;;  %v6730_v59 = vld [vmem:[#allocation2 + $0x110] ss:$0 sps:$4 sm:$0x11]   ;;  %v1695_v31 = vsel %vm6971_vm13, %v1286_v20, %v1694_v0  ;;  %v3542_v35 = vrot.slane %v6729_v23, 1 }
  0xe0   : > { %v2825_v17 = vrot.slane %v2823_v22, 1  ;;  %v1291_v37 = vrot.slane %v1289_v60, 7  ;;  %1696 = vst [vmem:[#allocation2 + $0x120] sm:$0xf] %v1695_v31  ;;  %v411_v26 = vld [vmem:[#allocation2 + $0x140] sm:$0x1]  ;;  %v7604_v19 = vpop.permute.xlu1 %2980 }
  0xe1   : > { %v2830_v61 = vrot.slane %v2828_v29, 1  ;;  %v3543_v33 = vrot.slane %v6730_v59, 1  ;;  %306 = vst [vmem:[#allocation2 + $0x12c] sm:$0x1] %v305_v6  ;;  %v409_v62 = vsel %vm6903_vm5, 0, %v408_v2  ;;  %vm550_vm9 = vcmp.ge.f32.partialorder %v485_v52, 0.0  ;;  %v7608_v23 = vpop.permute.xlu0 %3592 }
  0xe2   : > { %v2826_v36 = vor.u32 %v2825_v17, %v2821_v51  ;;  %3620 = vrot.lane.b32.xlu0 %v3541_v30, %s6845_s25  ;;  %v1294_v47 = vor.u32 %v1292_v55, %v1291_v37  ;;  %v1296_v48 = vrot.slane %v1291_v37, 4  ;;  %410 = vst [vmem:[#allocation2 + $0x134] sm:$0x1] %v409_v62  ;;  %vm551_vm10 = vcmp.ge.f32.partialorder %v486_v10, 0.0  ;;  %v487_v46 = vld [vmem:[%s6933_s24 + $0x190] sm:$0xff]  ;;  %v488_v54 = vld [vmem:[%s6933_s24 + $0x198] sm:$0xff] }
  0xe3   : > { %v679_v53 = vsel %vm550_vm9, %v485_v52, %v615_v27  ;;  %v680_v50 = vsel %vm551_vm10, %v486_v10, %v616_v34  ;;  %v308_v11 = vsel %vm6895_vm3, 0, %v307_v44  ;;  %v412_v12 = vsel %vm6903_vm5, 0, %v411_v26  ;;  %v7602_v18 = vld [vmem:[%s6933_s24 + $0x1a0] sm:$0xff]  ;;  %8611 = vst [vmem:[#allocation8_spill] sm:$0xff] %v7608_v23  ;;  %v7612_v6 = vld [vmem:[%s6933_s24 + $0x1a8] sm:$0xff] }
  0xe4   : > { %v2831_v32 = vsel %vm2555_vm6, %v2826_v36, %v2830_v61  ;;  %v6731_v56 = vld [vmem:[#allocation2 + $0x114] sm:$0xff]   ;;  %v1295_v60 = vsel %vm6978_vm14, %v1287_v58, %v1294_v47  ;;  %v1699_v0 = vsel %vm6895_vm3, %v1296_v48, %v1698_v39  ;;  %v6075_v9 = vpack.c.bf16 %v679_v53, %v679_v53  ;;  %309 = vst [vmem:[#allocation2 + $0x138] sm:$0x1] %v308_v11  ;;  %v6806_v3 = vld [vmem:[#allocation2 + $0x108] sm:$0xff]  }
  0xe5   : > { %3008 = vrot.lane.b32.xlu1 %v2831_v32, %s6846_s26  ;;  %1697 = vst.msk [vmem:[#allocation2 + $0x124] sm:$0xf] %vm1530_vm2, %v1295_v60  ;;  %1700 = vst [vmem:[#allocation2 + $0x128] sm:$0x1] %v1699_v0  ;;  %v6076_v10 = vpack.c.bf16 %v680_v50, %v680_v50  ;;  %v3544_v13 = vsel %vm3475_vm7, %v3542_v35, %v3543_v33  ;;  %v2833_v55 = vshrl.u32 %v6731_v56, 16  ;;  %v2835_v2 = vshll.u32 %v6731_v56, 16  ;;  %v7617_v32 = vpop.permute.xlu1 %3594 }
  0xe6   : > { %v6732_v52 = vld [vmem:[#allocation2 + $0x11c] ss:$0 sps:$4 sm:$0x11]   ;;  %v6735_v16 = vld [vmem:[#allocation2 + $0x114] sm:$0xfe]   ;;  %v617_v51 = vmul.f32 %v6952_v28, %v487_v46  ;;  %v618_v22 = vmul.f32 %v6952_v28, %v488_v54  ;;  %v1298_v29 = vshrl.u32 %v6075_v9, 16  ;;  %v619_v36 = vmul.f32 %v6952_v28, %v7602_v18 }
  0xe7   : > { %413 = vst [vmem:[#allocation2 + $0x140] sm:$0x1] %v412_v12  ;;  %v2840_v20 = vshll.u32 %v6732_v52, 16  ;;  %v6736_v58 = vld [vmem:[#allocation2 + $0x11c] ss:$0 sps:$4 sm:$0x11]  }
  0xe8   : > { %v2837_v27 = vrot.slane %v2835_v2, 1  ;;  %v3545_v44 = vrot.slane %v6735_v16, 1  ;;  %v1301_v30 = vshll.u32 %v6075_v9, 16  ;;  %v3546_v31 = vrot.slane %v6736_v58, 1  ;;  %v1701_v39 = vld [vmem:[#allocation2 + $0x12c] sm:$0xf] }
  0xe9   : > { %3622 = vrot.lane.b32.xlu1 %v3544_v13, %s6845_s25  ;;  %v2842_v59 = vrot.slane %v2840_v20, 1  ;;  %v1306_v34 = vshrl.u32 %v6076_v10, 16  ;;  %v1309_v17 = vshll.u32 %v6076_v10, 16  ;;  %v1300_v37 = vrot.slane %v1298_v29, 7  ;;  %v1705_v61 = vld [vmem:[#allocation2 + $0x134] sm:$0x1]  ;;  %v7622_v10 = vpop.permute.xlu0 %2982 }
  0xea   : > { %v2838_v35 = vor.u32 %v2837_v27, %v2833_v55  ;;  %vm552_vm11 = vcmp.ge.f32.partialorder %v487_v46, 0.0  ;;  %vm553_vm12 = vcmp.ge.f32.partialorder %v488_v54, 0.0  ;;  %8612 = vst [vmem:[#allocation9_spill] sm:$0xff] %v7617_v32  ;;  %v310_v52 = vld [vmem:[#allocation2 + $0x144] sm:$0x1]  ;;  %v3547_v55 = vsel %vm3475_vm7, %v3545_v44, %v3546_v31  ;;  %v6794_v32 = vld [vmem:[#allocation2 + $0xb4] sm:$0xff]  }
  0xeb   : > { %v1308_v26 = vrot.slane %v1306_v34, 7  ;;  %v681_v33 = vsel %vm552_vm11, %v487_v46, %v617_v51  ;;  %v682_v62 = vsel %vm553_vm12, %v488_v54, %v618_v22  ;;  %v1303_v53 = vor.u32 %v1301_v30, %v1300_v37  ;;  %v414_v46 = vld [vmem:[#allocation2 + $0x14c] sm:$0x1]  ;;  %v1708_v31 = vld [vmem:[#allocation2 + $0x138] sm:$0xf] }
  0xec   : > { %v2843_v47 = vsel %vm2555_vm6, %v2838_v35, %v2842_v59  ;;  %v6733_v48 = vld [vmem:[#allocation2 + $0x120] sm:$0xff]   ;;  %v1304_v50 = vrot.slane %v1300_v37, 4  ;;  %v6077_v11 = vpack.c.bf16 %v681_v33, %v681_v33  ;;  %v6734_v56 = vld [vmem:[#allocation2 + $0x128] ss:$0 sps:$4 sm:$0x11]   ;;  %v6078_v9 = vpack.c.bf16 %v682_v62, %v682_v62 }
  0xed   : > { %3010 = vrot.lane.b32.xlu0 %v2843_v47, %s6846_s26  ;;  %v1311_v60 = vor.u32 %v1309_v17, %v1308_v26  ;;  %v1313_v0 = vrot.slane %v1308_v26, 4  ;;  %v620_v54 = vmul.f32 %v6952_v28, %v7612_v6  ;;  %v2845_v12 = vshrl.u32 %v6733_v48, 16  ;;  %v6737_v2 = vld [vmem:[#allocation2 + $0x120] sm:$0xfe]   ;;  %v313_v34 = vld [vmem:[#allocation2 + $0x150] sm:$0x1] }
  0xee   : > { %v2847_v13 = vshll.u32 %v6733_v48, 16  ;;  %v1702_v16 = vsel %vm6971_vm13, %v1303_v53, %v1701_v39  ;;  %v2852_v20 = vshll.u32 %v6734_v56, 16  ;;  %v6738_v58 = vld [vmem:[#allocation2 + $0x128] ss:$0 sps:$4 sm:$0x11]   ;;  %v1315_v27 = vshrl.u32 %v6077_v11, 16  ;;  %v7640_v56 = vpop.permute.xlu0 %3596 }
  0xef   : > { %v1312_v51 = vsel %vm6978_vm14, %v1304_v50, %v1311_v60  ;;  %1703 = vst [vmem:[#allocation2 + $0x12c] sm:$0xf] %v1702_v16  ;;  %v1706_v22 = vsel %vm6895_vm3, %v1313_v0, %v1705_v61  ;;  %v3548_v30 = vrot.slane %v6737_v2, 1  ;;  %v1318_v44 = vshll.u32 %v6077_v11, 16  ;;  %v1712_v26 = vld [vmem:[#allocation2 + $0x140] sm:$0x1] }
  0xf0   : > { %v2849_v29 = vrot.slane %v2847_v13, 1  ;;  %1704 = vst.msk [vmem:[#allocation2 + $0x130] sm:$0xf] %vm1530_vm2, %v1312_v51  ;;  %1707 = vst [vmem:[#allocation2 + $0x134] sm:$0x1] %v1706_v22  ;;  %v1323_v59 = vshrl.u32 %v6078_v9, 16 }
  0xf1   : > { %v2854_v17 = vrot.slane %v2852_v20, 1  ;;  %3624 = vrot.lane.b32.xlu0 %v3547_v55, %s6845_s25  ;;  %v3549_v35 = vrot.slane %v6738_v58, 1  ;;  %v1317_v37 = vrot.slane %v1315_v27, 7  ;;  %v1326_v39 = vshll.u32 %v6078_v9, 16  ;;  %v417_v48 = vld [vmem:[#allocation2 + $0x158] sm:$0x1]  ;;  %v7637_v53 = vpop.permute.xlu1 %2984 }
  0xf2   : > { %v2850_v33 = vor.u32 %v2849_v29, %v2845_v12  ;;  %v1325_v61 = vrot.slane %v1323_v59, 7  ;;  %v311_v62 = vsel %vm6895_vm3, 0, %v310_v52  ;;  %v415_v47 = vsel %vm6903_vm5, 0, %v414_v46  ;;  %8613 = vst [vmem:[#allocation10_spill] sm:$0xff] %v7640_v56  ;;  %v491_v52 = vld [vmem:[%s6933_s24 + $0x1b0] sm:$0xff]  ;;  %v492_v2 = vld [vmem:[%s6933_s24 + $0x1b8] sm:$0xff] }
  0xf3   : > { %v1320_v50 = vor.u32 %v1318_v44, %v1317_v37  ;;  %v1321_v11 = vrot.slane %v1317_v37, 4  ;;  %312 = vst [vmem:[#allocation2 + $0x144] sm:$0x1] %v311_v62  ;;  %416 = vst [vmem:[#allocation2 + $0x14c] sm:$0x1] %v415_v47  ;;  %vm554_vm15 = vcmp.ge.f32.partialorder %v7602_v18, 0.0  ;;  %v3550_v16 = vsel %vm3475_vm7, %v3548_v30, %v3549_v35 }
  0xf4   : > { %v2855_v60 = vsel %vm2555_vm6, %v2850_v33, %v2854_v17  ;;  %v1328_v0 = vor.u32 %v1326_v39, %v1325_v61  ;;  %v1330_v9 = vrot.slane %v1325_v61, 4  ;;  %vm555_vm1 = vcmp.ge.f32.partialorder %v7612_v6, 0.0  ;;  %v7662_v27 = vld [vmem:[%s6933_s24 + $0x1c0] sm:$0xff]  ;;  %v6793_v56 = vld [vmem:[#allocation2 + $0xa8] sm:$0xff]  }
  0xf5   : > { %3012 = vrot.lane.b32.xlu1 %v2855_v60, %s6846_s26  ;;  %v1709_v46 = vsel %vm6971_vm13, %v1320_v50, %v1708_v31  ;;  %v683_v12 = vsel %vm554_vm15, %v7602_v18, %v619_v36  ;;  %v684_v13 = vsel %vm555_vm1, %v7612_v6, %v620_v54  ;;  %v314_v55 = vsel %vm6895_vm3, 0, %v313_v34  ;;  %v7664_v29 = vpop.permute.xlu1 %3598  ;;  %v7669_v34 = vld [vmem:[%s6933_s24 + $0x1c8] sm:$0xff] }
  0xf6   : > { %v1329_v20 = vsel %vm6978_vm14, %v1321_v11, %v1328_v0  ;;  %1710 = vst [vmem:[#allocation2 + $0x138] sm:$0xf] %v1709_v46  ;;  %v1713_v58 = vsel %vm6895_vm3, %v1330_v9, %v1712_v26  ;;  %v6079_v51 = vpack.c.bf16 %v683_v12, %v683_v12  ;;  %315 = vst [vmem:[#allocation2 + $0x150] sm:$0x1] %v314_v55  ;;  %v418_v36 = vsel %vm6903_vm5, 0, %v417_v48 }
  0xf7   : > { %v6739_v18 = vld [vmem:[#allocation2 + $0x12c] sm:$0xff]   ;;  %1711 = vst.msk [vmem:[#allocation2 + $0x13c] sm:$0xf] %vm1530_vm2, %v1329_v20  ;;  %1714 = vst [vmem:[#allocation2 + $0x140] sm:$0x1] %v1713_v58  ;;  %v6080_v6 = vpack.c.bf16 %v684_v13, %v684_v13  ;;  %v621_v31 = vmul.f32 %v6952_v28, %v491_v52  ;;  %v7671_v17 = vpop.permute.xlu0 %2986  ;;  %v622_v33 = vmul.f32 %v6952_v28, %v492_v2  ;;  %vm556_vm4 = vcmp.ge.f32.partialorder %v491_v52, 0.0 }
  0xf8   : > { %v6740_v54 = vld [vmem:[#allocation2 + $0x134] ss:$0 sps:$4 sm:$0x11]   ;;  %v1332_v22 = vshrl.u32 %v6079_v51, 16  ;;  %419 = vst [vmem:[#allocation2 + $0x158] sm:$0x1] %v418_v36  ;;  %v7676_v55 = vmul.f32 %v6952_v28, %v7662_v27 }
  0xf9   : > { %8614 = vst [vmem:[#allocation11_spill] sm:$0xff] %v7664_v29  ;;  %3626 = vrot.lane.b32.xlu1 %v3550_v16, %s6845_s25  ;;  %v2857_v30 = vshrl.u32 %v6739_v18, 16  ;;  %v2859_v44 = vshll.u32 %v6739_v18, 16  ;;  %v6743_v59 = vld [vmem:[#allocation2 + $0x12c] sm:$0xfe]   ;;  %v2864_v35 = vshll.u32 %v6740_v54, 16  ;;  %v685_v58 = vsel %vm556_vm4, %v491_v52, %v621_v31 }
  0xfa   : > { %v6744_v37 = vld [vmem:[#allocation2 + $0x134] ss:$0 sps:$4 sm:$0x11]   ;;  %v1334_v39 = vrot.slane %v1332_v22, 7  ;;  %v1335_v26 = vshll.u32 %v6079_v51, 16  ;;  %v3551_v62 = vrot.slane %v6743_v59, 1  ;;  %v7682_v51 = vmul.f32 %v6952_v28, %v7669_v34 }
  0xfb   : > { %v2861_v61 = vrot.slane %v2859_v44, 1  ;;  %v1340_v47 = vshrl.u32 %v6080_v6, 16  ;;  %v1343_v48 = vshll.u32 %v6080_v6, 16  ;;  %v1715_v50 = vld [vmem:[#allocation2 + $0x144] sm:$0xf]  ;;  %v2866_v11 = vrot.slane %v2864_v35, 1  ;;  %v7687_v28 = vpop.permute.xlu0 %3600 }
  0xfc   : > { %v3552_v60 = vrot.slane %v6744_v37, 1  ;;  %v1337_v0 = vor.u32 %v1335_v26, %v1334_v39  ;;  %v1338_v9 = vrot.slane %v1334_v39, 4  ;;  %v1719_v46 = vld [vmem:[#allocation2 + $0x14c] sm:$0x1]  ;;  %8615 = vst [vmem:[#allocation12_spill] sm:$0xff] %v7676_v55  ;;  %vm557_vm8 = vcmp.ge.f32.partialorder %v492_v2, 0.0 }
  0xfd   : > { %v2862_v12 = vor.u32 %v2861_v61, %v2857_v30  ;;  %v1342_v13 = vrot.slane %v1340_v47, 7  ;;  %8616 = vst [vmem:[#allocation13_spill] sm:$0xff] %v7682_v51  ;;  %v686_v30 = vsel %vm557_vm8, %v492_v2, %v622_v33  ;;  %v6755_v44 = vld [vmem:[#allocation2] sm:$0xff]   ;;  %v6760_v59 = vld [vmem:[#allocation2 + $0xc] sm:$0xff]   ;;  %v6763_v35 = vld [vmem:[#allocation2 + $0x18] sm:$0xff]   ;;  %vm2146_vm9 = vcmask 97280  }
  0xfe   : > { %v6741_v16 = vld [vmem:[#allocation2 + $0x138] sm:$0xff]   ;;  %v1716_v20 = vsel %vm6971_vm13, %v1337_v0, %v1715_v50  ;;  %v6742_v36 = vld [vmem:[#allocation2 + $0x140] ss:$0 sps:$4 sm:$0x11]   ;;  %v6774_v37 = vld [vmem:[#allocation2 + $0x24] sm:$0xff]   ;;  %8617 = vst [vmem:[#allocation14_spill] sm:$0xff] %v7687_v28  ;;  %v3553_v55 = vsel %vm3475_vm7, %v3551_v62, %v3552_v60 }
  0xff   : > { %v2867_v6 = vsel %vm2555_vm6, %v2862_v12, %v2866_v11  ;;  %v1345_v54 = vor.u32 %v1343_v48, %v1342_v13  ;;  %v1347_v22 = vrot.slane %v1342_v13, 4  ;;  %1717 = vst [vmem:[#allocation2 + $0x144] sm:$0xf] %v1716_v20  ;;  %v6777_v39 = vld [vmem:[#allocation2 + $0x30] sm:$0xff]   ;;  %v6783_v26 = vld [vmem:[#allocation2 + $0x3c] sm:$0xff]   ;;  %v6784_v52 = vld [vmem:[#allocation2 + $0x48] sm:$0xff]   ;;  %v6081_v12 = vpack.c.bf16 %v685_v58, %v685_v58 }
 0x100   : > { %v6785_v31 = vld [vmem:[#allocation2 + $0x54] sm:$0xff]   ;;  %v6786_v61 = vld [vmem:[#allocation2 + $0x60] sm:$0xff]   ;;  %v6787_v47 = vld [vmem:[#allocation2 + $0x6c] sm:$0xff]   ;;  %3014 = vrot.lane.b32.xlu0 %v2867_v6, %s6846_s26  ;;  %v2869_v48 = vshrl.u32 %v6741_v16, 16  ;;  %v2871_v2 = vshll.u32 %v6741_v16, 16  ;;  %v7690_v13 = vpack.c.bf16 %v686_v30, %v686_v30  ;;  %v2876_v51 = vshll.u32 %v6742_v36, 16 }
 0x101   : > { %v6788_v50 = vld [vmem:[#allocation2 + $0x78] sm:$0xff]   ;;  %v6790_v0 = vld [vmem:[#allocation2 + $0x84] sm:$0xff]   ;;  %v6746_v63 = vld [vmem:[#allocation2 + $0x140] ss:$0 sps:$4 sm:$0x11]   ;;  %v1346_v29 = vsel %vm6978_vm14, %v1338_v9, %v1345_v54  ;;  %v1720_v28 = vsel %vm6895_vm3, %v1347_v22, %v1719_v46  ;;  %v1349_v16 = vshrl.u32 %v6081_v12, 16 }
 0x102   : > { %v6792_v11 = vld [vmem:[#allocation2 + $0x9c] sm:$0xff]   ;;  %v2873_v6 = vrot.slane %v2871_v2, 1  ;;  %1718 = vst.msk [vmem:[#allocation2 + $0x148] sm:$0xf] %vm1530_vm2, %v1346_v29  ;;  %1721 = vst [vmem:[#allocation2 + $0x14c] sm:$0x1] %v1720_v28 }
 0x103   : > { %v7684_v18 = vpop.permute.xlu1 %2988  ;;  %v6745_v33 = vld [vmem:[#allocation2 + $0x138] sm:$0xfe]   ;;  %v1352_v58 = vshll.u32 %v6081_v12, 16  ;;  %v420_v30 = vld [vmem:[#allocation2 + $0x164] sm:$0x1]  ;;  %v2878_v36 = vrot.slane %v2876_v51, 1 }
 0x104   : > { %v316_v20 = vld [vmem:[#allocation2 + $0x15c] sm:$0x1]  ;;  %v3554_v23 = vrot.slane %v6745_v33, 1  ;;  %v3555_v38 = vrot.slane %v6746_v63, 1  ;;  %v1357_v62 = vshrl.u32 %v7690_v13, 16  ;;  %v1360_v60 = vshll.u32 %v7690_v13, 16  ;;  %3628 = vrot.lane.b32.xlu0 %v3553_v55, %s6845_s25 }
 0x105   : > { %v7700_v9 = vld [vmem:[#allocation2 + $0x150] sm:$0xf]  ;;  %v7702_v54 = vld [vmem:[#allocation2 + $0x168] sm:$0x1]  ;;  %v2874_v46 = vor.u32 %v2873_v6, %v2869_v48  ;;  %v7705_v22 = vrot.slane %v1349_v16, 7  ;;  %vm3066_vm10 = vcmask 195680  }
 0x106   : > { %v7707_v29 = vld [vmem:[#allocation2 + $0x158] sm:$0x1]  ;;  %v6796_v63 = vld [vmem:[#allocation2 + $0xc0] sm:$0xff]   ;;  %v7712_v51 = vsel %vm3475_vm7, %v3554_v23, %v3555_v38  ;;  %v7714_v2 = vrot.slane %v1357_v62, 7  ;;  %2147 = vst.msk [vmem:[#allocation3] sm:$0xff] %vm2146_vm9, %v6755_v44  ;;  %vm3680_vm11 = vcmask 294080  }
 0x107   : > { %v7709_v28 = vpop.permute.xlu1 %3602  ;;  %v317_v55 = vsel %vm6895_vm3, 0, %v316_v20  ;;  %v7719_v48 = vld [vmem:[#allocation2 + $0x170] sm:$0x1]  ;;  %2148 = vst.msk [vmem:[#allocation3 + $0x8] sm:$0xff] %vm2146_vm9, %v6760_v59  ;;  %2149 = vst.msk [vmem:[#allocation3 + $0x10] sm:$0xff] %vm2146_vm9, %v6763_v35  ;;  %v2879_v44 = vsel %vm2555_vm6, %v2874_v46, %v2878_v36  ;;  %v1354_v59 = vor.u32 %v1352_v58, %v7705_v22  ;;  %v1355_v35 = vrot.slane %v7705_v22, 4 }
 0x108   : > { %2150 = vst.msk [vmem:[#allocation3 + $0x18] sm:$0xff] %vm2146_vm9, %v6774_v37  ;;  %2151 = vst.msk [vmem:[#allocation3 + $0x20] sm:$0xff] %vm2146_vm9, %v6777_v39  ;;  %v6797_v23 = vld [vmem:[#allocation2 + $0xcc] sm:$0xff]   ;;  %3016 = vrot.lane.b32.xlu1 %v2879_v44, %s6846_s26  ;;  %vm558_vm12 = vcmp.ge.f32.partialorder %v7662_v27, 0.0  ;;  %vm559_vm15 = vcmp.ge.f32.partialorder %v7669_v34, 0.0  ;;  %vm3839_vm8 = vcmask 293888  }
 0x109   : > { %2152 = vst.msk [vmem:[#allocation3 + $0x28] sm:$0xff] %vm2146_vm9, %v6783_v26  ;;  %2153 = vst.msk [vmem:[#allocation3 + $0x30] sm:$0xff] %vm2146_vm9, %v6784_v52  ;;  %v2991_v38 = vpop.permute.xlu0 %2990  ;;  %v424_v26 = vsel %vm6903_vm5, 0, %v7719_v48 }
 0x10a   : > { %2154 = vst.msk [vmem:[#allocation3 + $0x38] sm:$0xff] %vm2146_vm9, %v6785_v31  ;;  %2155 = vst.msk [vmem:[#allocation3 + $0x40] sm:$0xff] %vm2146_vm9, %v6786_v61  ;;  %v6751_v61 = vld [vmem:[#allocation2 + $0x144] sm:$0xfe]  }
 0x10b   : > { %2156 = vst.msk [vmem:[#allocation3 + $0x48] sm:$0xff] %vm2146_vm9, %v6787_v47  ;;  %2157 = vst.msk [vmem:[#allocation3 + $0x50] sm:$0xff] %vm2146_vm9, %v6788_v50  ;;  %v8627_v47 = vld [vmem:[#allocation5_spill] sm:$0xff]  ;;  %v3557_v6 = vrot.slane %v6751_v61, 1  ;;  %v325_v61 = vld [vmem:[#allocation2 + $0x180] sm:$0x1] }
 0x10c   : > { %2158 = vst.msk [vmem:[#allocation3 + $0x58] sm:$0xff] %vm2146_vm9, %v6790_v0  ;;  %2159 = vst.msk [vmem:[#allocation3 + $0x60] sm:$0xff] %vm2146_vm9, %v6791_v5  ;;  %v421_v5 = vsel %vm6903_vm5, 0, %v420_v30  ;;  %3630 = vrot.lane.b32.xlu1 %v7712_v51, %s6845_s25  ;;  %v7833_v30 = vld [vmem:[%s6933_s24 + $0x1e0] sm:$0xff] }
 0x10d   : > { %2160 = vst.msk [vmem:[#allocation3 + $0x68] sm:$0xff] %vm2146_vm9, %v6792_v11  ;;  %2161 = vst.msk [vmem:[#allocation3 + $0x70] sm:$0xff] %vm2146_vm9, %v6793_v56  ;;  %v6747_v56 = vld [vmem:[#allocation2 + $0x144] sm:$0xff]   ;;  %v3605_v39 = vpop.permute.xlu0 %3604  ;;  %v6752_v11 = vld [vmem:[#allocation2 + $0x14c] ss:$0 sps:$4 sm:$0x11]  }
 0x10e   : > { %2162 = vst.msk [vmem:[#allocation3 + $0x78] sm:$0xff] %vm2146_vm9, %v6794_v32  ;;  %318 = vst [vmem:[#allocation2 + $0x15c] sm:$0x1] %v317_v55  ;;  %v320_v32 = vsel %vm6895_vm3, 0, %v7702_v54  ;;  %v2881_v52 = vshrl.u32 %v6747_v56, 16  ;;  %v2883_v31 = vshll.u32 %v6747_v56, 16 }
 0x10f   : > { %3067 = vst.msk [vmem:[#allocation3] sm:$0xff] %vm3066_vm10, %v7430_v45  ;;  %3068 = vst.msk [vmem:[#allocation3 + $0x8] sm:$0xff] %vm3066_vm10, %v7456_v14  ;;  %v1362_v45 = vor.u32 %v1360_v60, %v7714_v2  ;;  %v1364_v14 = vrot.slane %v7714_v2, 4  ;;  %v3558_v62 = vrot.slane %v6752_v11, 1 }
 0x110   : > { %3069 = vst.msk [vmem:[#allocation3 + $0x10] sm:$0xff] %vm3066_vm10, %v7473_v41  ;;  %3070 = vst.msk [vmem:[#allocation3 + $0x18] sm:$0xff] %vm3066_vm10, %v7509_v43  ;;  %v8619_v41 = vld [vmem:[#allocation8_spill] sm:$0xff]  ;;  %v8622_v43 = vld [vmem:[#allocation11_spill] sm:$0xff]  ;;  %v2885_v20 = vrot.slane %v2883_v31, 1 }
 0x111   : > { %3071 = vst.msk [vmem:[#allocation3 + $0x20] sm:$0xff] %vm3066_vm10, %v7525_v25  ;;  %3072 = vst.msk [vmem:[#allocation3 + $0x28] sm:$0xff] %vm3066_vm10, %v7551_v21  ;;  %v8623_v25 = vld [vmem:[#allocation14_spill] sm:$0xff]  ;;  %v1723_v21 = vsel %vm6971_vm13, %v1354_v59, %v7700_v9 }
 0x112   : > { %3073 = vst.msk [vmem:[#allocation3 + $0x30] sm:$0xff] %vm3066_vm10, %v7559_v15  ;;  %3074 = vst.msk [vmem:[#allocation3 + $0x38] sm:$0xff] %vm3066_vm10, %v7584_v8  ;;  %v8625_v15 = vld [vmem:[#allocation12_spill] sm:$0xff]  ;;  %v8626_v8 = vld [vmem:[#allocation13_spill] sm:$0xff]  ;;  %v2886_v54 = vor.u32 %v2885_v20, %v2881_v52  ;;  %v2993_v51 = vpop.permute.xlu1 %2992 }
 0x113   : > { %3075 = vst.msk [vmem:[#allocation3 + $0x40] sm:$0xff] %vm3066_vm10, %v7604_v19  ;;  %3076 = vst.msk [vmem:[#allocation3 + $0x48] sm:$0xff] %vm3066_vm10, %v7622_v10  ;;  %v688_v19 = vsel %vm559_vm15, %v7669_v34, %v8626_v8  ;;  %v495_v10 = vld [vmem:[%s6933_s24 + $0x1d0] sm:$0xff]  ;;  %v6748_v34 = vld [vmem:[#allocation2 + $0x14c] ss:$0 sps:$4 sm:$0x11]  }
 0x114   : > { %3077 = vst.msk [vmem:[#allocation3 + $0x50] sm:$0xff] %vm3066_vm10, %v7637_v53  ;;  %3078 = vst.msk [vmem:[#allocation3 + $0x58] sm:$0xff] %vm3066_vm10, %v7671_v17  ;;  %v496_v53 = vld [vmem:[%s6933_s24 + $0x1d8] sm:$0xff]  ;;  %v1363_v17 = vsel %vm6978_vm14, %v1355_v35, %v1362_v45  ;;  %v6084_v37 = vpack.c.bf16 %v688_v19, %v688_v19  ;;  %v625_v50 = vmul.f32 %v8627_v47, %v495_v10  ;;  %v2888_v0 = vshll.u32 %v6748_v34, 16 }
 0x115   : > { %3079 = vst.msk [vmem:[#allocation3 + $0x60] sm:$0xff] %vm3066_vm10, %v7684_v18  ;;  %3080 = vst.msk [vmem:[#allocation3 + $0x68] sm:$0xff] %vm3066_vm10, %v2991_v38  ;;  %v626_v13 = vmul.f32 %v8627_v47, %v496_v53  ;;  %v1729_v9 = vld [vmem:[#allocation2 + $0x15c] sm:$0xf]  ;;  %vm560_vm1 = vcmp.ge.f32.partialorder %v495_v10, 0.0  ;;  %vm561_vm4 = vcmp.ge.f32.partialorder %v496_v53, 0.0  ;;  %v627_v38 = vmul.f32 %v8627_v47, %v7833_v30 }
 0x116   : > { %2163 = vst.msk [vmem:[#allocation3 + $0x80] sm:$0xff] %vm2146_vm9, %v6796_v63  ;;  %422 = vst [vmem:[#allocation2 + $0x164] sm:$0x1] %v421_v5  ;;  %v1374_v16 = vshrl.u32 %v6084_v37, 16  ;;  %v1377_v58 = vshll.u32 %v6084_v37, 16  ;;  %v2890_v36 = vrot.slane %v2888_v0, 1  ;;  %v3607_v8 = vpop.permute.xlu1 %3606 }
 0x117   : > { %3681 = vst.msk [vmem:[#allocation3] sm:$0xff] %vm3680_vm11, %v7449_v7  ;;  %3682 = vst.msk [vmem:[#allocation3 + $0x8] sm:$0xff] %vm3680_vm11, %v7480_v49  ;;  %v8618_v7 = vld [vmem:[#allocation7_spill] sm:$0xff]  ;;  %v8620_v49 = vld [vmem:[#allocation9_spill] sm:$0xff]  ;;  %v690_v48 = vsel %vm561_vm4, %v496_v53, %v626_v13 }
 0x118   : > { %3683 = vst.msk [vmem:[#allocation3 + $0x10] sm:$0xff] %vm3680_vm11, %v7507_v57  ;;  %3684 = vst.msk [vmem:[#allocation3 + $0x18] sm:$0xff] %vm3680_vm11, %v7527_v42  ;;  %v8621_v57 = vld [vmem:[#allocation10_spill] sm:$0xff]  ;;  %v6798_v42 = vld [vmem:[#allocation2 + $0xd8] sm:$0xff]   ;;  %v1376_v46 = vrot.slane %v1374_v16, 7  ;;  %v2891_v44 = vsel %vm2555_vm6, %v2886_v54, %v2890_v36 }
 0x119   : > { %3685 = vst.msk [vmem:[#allocation3 + $0x20] sm:$0xff] %vm3680_vm11, %v7546_v24  ;;  %3686 = vst.msk [vmem:[#allocation3 + $0x28] sm:$0xff] %vm3680_vm11, %v7563_v40  ;;  %v687_v40 = vsel %vm558_vm12, %v7662_v27, %v8625_v15  ;;  %v1727_v27 = vsel %vm6895_vm3, %v1364_v14, %v7707_v29  ;;  %v689_v29 = vsel %vm560_vm1, %v495_v10, %v625_v50  ;;  %v7836_v63 = vld [vmem:[%s6933_s24 + $0x1e8] sm:$0xff]  ;;  %v322_v14 = vld [vmem:[#allocation2 + $0x174] sm:$0x1]  ;;  %3018 = vrot.lane.b32.xlu0 %v2891_v44, %s6846_s26 }
 0x11a   : > { %3687 = vst.msk [vmem:[#allocation3 + $0x30] sm:$0xff] %vm3680_vm11, %v8618_v7  ;;  %3688 = vst.msk [vmem:[#allocation3 + $0x38] sm:$0xff] %vm3680_vm11, %v8619_v41  ;;  %v6083_v18 = vpack.c.bf16 %v687_v40, %v687_v40  ;;  %v1379_v35 = vor.u32 %v1377_v58, %v1376_v46  ;;  %v1381_v5 = vrot.slane %v1376_v46, 4  ;;  %v6085_v45 = vpack.c.bf16 %v689_v29, %v689_v29  ;;  %v429_v16 = vld [vmem:[#allocation2 + $0x188] sm:$0x1] }
 0x11b   : > { %3689 = vst.msk [vmem:[#allocation3 + $0x40] sm:$0xff] %vm3680_vm11, %v8620_v49  ;;  %3690 = vst.msk [vmem:[#allocation3 + $0x48] sm:$0xff] %vm3680_vm11, %v8621_v57  ;;  %v3559_v41 = vsel %vm3475_vm7, %v3557_v6, %v3558_v62  ;;  %v6086_v57 = vpack.c.bf16 %v690_v48, %v690_v48  ;;  %v628_v56 = vmul.f32 %v8627_v47, %v7836_v63  ;;  %v323_v31 = vsel %vm6895_vm3, 0, %v322_v14 }
 0x11c   : > { %3691 = vst.msk [vmem:[#allocation3 + $0x50] sm:$0xff] %vm3680_vm11, %v8622_v43  ;;  %3692 = vst.msk [vmem:[#allocation3 + $0x58] sm:$0xff] %vm3680_vm11, %v8623_v25  ;;  %v1366_v33 = vshrl.u32 %v6083_v18, 16  ;;  %v1369_v12 = vshll.u32 %v6083_v18, 16  ;;  %v426_v43 = vld [vmem:[#allocation2 + $0x17c] sm:$0x1] }
 0x11d   : > { %3693 = vst.msk [vmem:[#allocation3 + $0x60] sm:$0xff] %vm3680_vm11, %v7709_v28  ;;  %1724 = vst [vmem:[#allocation2 + $0x150] sm:$0xf] %v1723_v21  ;;  %v1733_v22 = vld [vmem:[#allocation2 + $0x164] sm:$0x1]  ;;  %v1383_v10 = vshrl.u32 %v6085_v45, 16  ;;  %3632 = vrot.lane.b32.xlu0 %v3559_v41, %s6845_s25 }
 0x11e   : > { %2164 = vst.msk [vmem:[#allocation3 + $0x88] sm:$0xff] %vm2146_vm9, %v6797_v23  ;;  %321 = vst [vmem:[#allocation2 + $0x168] sm:$0x1] %v320_v32  ;;  %v1368_v60 = vrot.slane %v1366_v33, 7  ;;  %v3715_v28 = vld [vmem:[#allocation3] sm:$0xff]  ;;  %v7840_v23 = vld [vmem:[#allocation3 + $0x8] sm:$0xff]  ;;  %v1734_v40 = vsel %vm6895_vm3, %v1381_v5, %v1733_v22 }
 0x11f   : > { %2165 = vst.msk [vmem:[#allocation3 + $0x90] sm:$0xff] %vm2146_vm9, %v6798_v42  ;;  %1728 = vst [vmem:[#allocation2 + $0x158] sm:$0x1] %v1727_v27  ;;  %6340 = vmatprep.mubr.msk.bf16.mxu0 %vm3839_vm8, %v3715_v28  ;;  %6270 = vmatprep.mubr.msk.bf16.mxu1 %vm3839_vm8, %v7840_v23  ;;  %v1386_v53 = vshll.u32 %v6085_v45, 16  ;;  %v1391_v18 = vshrl.u32 %v6086_v57, 16  ;;  %v1394_v37 = vshll.u32 %v6086_v57, 16 }
 0x120   : > { %1725 = vst.msk [vmem:[#allocation2 + $0x154] sm:$0xf] %vm1530_vm2, %v1363_v17  ;;  %425 = vst [vmem:[#allocation2 + $0x170] sm:$0x1] %v424_v26  ;;  %v1371_v2 = vor.u32 %v1369_v12, %v1368_v60  ;;  %v1372_v55 = vrot.slane %v1368_v60, 4  ;;  %v1385_v52 = vrot.slane %v1383_v10, 7 }
 0x121   : > { %3694 = vst.msk [vmem:[#allocation3 + $0x68] sm:$0xff] %vm3680_vm11, %v3605_v39  ;;  %1735 = vst [vmem:[#allocation2 + $0x164] sm:$0x1] %v1734_v40  ;;  %v2995_v39 = vpop.permute.xlu0 %2994  ;;  %v1393_v0 = vrot.slane %v1391_v18, 7  ;;  %v427_v33 = vsel %vm6903_vm5, 0, %v426_v43  ;;  %vm562_vm12 = vcmp.ge.f32.partialorder %v7833_v30, 0.0 }
 0x122   : > { %3081 = vst.msk [vmem:[#allocation3 + $0x70] sm:$0xff] %vm3066_vm10, %v2993_v51  ;;  %v1730_v49 = vsel %vm6971_vm13, %v1371_v2, %v1729_v9  ;;  %v1380_v15 = vsel %vm6978_vm14, %v1372_v55, %v1379_v35  ;;  %3082 = vst.msk [vmem:[#allocation3 + $0x78] sm:$0xff] %vm3066_vm10, %v2995_v39  ;;  %v1388_v13 = vor.u32 %v1386_v53, %v1385_v52  ;;  %v1389_v20 = vrot.slane %v1385_v52, 4  ;;  %v499_v9 = vld [vmem:[%s6933_s24 + $0x1f0] sm:$0xff]  ;;  %v500_v51 = vld [vmem:[%s6933_s24 + $0x1f8] sm:$0xff] }
 0x123   : > { %1731 = vst [vmem:[#allocation2 + $0x15c] sm:$0xf] %v1730_v49  ;;  %1732 = vst.msk [vmem:[#allocation2 + $0x160] sm:$0xf] %vm1530_vm2, %v1380_v15  ;;  %vm563_vm15 = vcmp.ge.f32.partialorder %v7836_v63, 0.0  ;;  %v1396_v36 = vor.u32 %v1394_v37, %v1393_v0  ;;  %v1398_v62 = vrot.slane %v1393_v0, 4  ;;  %v691_v60 = vsel %vm562_vm12, %v7833_v30, %v627_v38 }
 0x124   : > { %3695 = vst.msk [vmem:[#allocation3 + $0x70] sm:$0xff] %vm3680_vm11, %v3607_v8  ;;  %324 = vst [vmem:[#allocation2 + $0x174] sm:$0x1] %v323_v31  ;;  %v692_v22 = vsel %vm563_vm15, %v7836_v63, %v628_v56  ;;  %v6087_v29 = vpack.c.bf16 %v691_v60, %v691_v60  ;;  %v326_v28 = vsel %vm6895_vm3, 0, %v325_v61  ;;  %v430_v63 = vsel %vm6903_vm5, 0, %v429_v16  ;;  %v2997_v56 = vpop.permute.xlu1 %2996 }
 0x125   : > { %v1736_v11 = vld [vmem:[#allocation2 + $0x168] sm:$0xf]  ;;  %428 = vst [vmem:[#allocation2 + $0x17c] sm:$0x1] %v427_v33  ;;  %v3609_v54 = vpop.permute.xlu0 %3608  ;;  %v1397_v30 = vsel %vm6978_vm14, %v1389_v20, %v1396_v36  ;;  %v6088_v48 = vpack.c.bf16 %v692_v22, %v692_v22  ;;  %327 = vst [vmem:[#allocation2 + $0x180] sm:$0x1] %v326_v28  ;;  %v629_v45 = vmul.f32 %v8627_v47, %v499_v9 }
 0x126   : > { %v6750_v7 = vld [vmem:[#allocation2 + $0x158] ss:$0 sps:$4 sm:$0x11]   ;;  %v1737_v46 = vsel %vm6971_vm13, %v1388_v13, %v1736_v11  ;;  %3696 = vst.msk [vmem:[#allocation3 + $0x78] sm:$0xff] %vm3680_vm11, %v3609_v54  ;;  %v1400_v44 = vshrl.u32 %v6087_v29, 16  ;;  %v1403_v49 = vshll.u32 %v6087_v29, 16  ;;  %v630_v57 = vmul.f32 %v8627_v47, %v500_v51 }
 0x127   : > { %v6749_v59 = vld [vmem:[#allocation2 + $0x150] sm:$0xff]   ;;  %v2900_v19 = vshll.u32 %v6750_v7, 16  ;;  %v6754_v32 = vld [vmem:[#allocation2 + $0x158] ss:$0 sps:$4 sm:$0x11]   ;;  %vm564_vm1 = vcmp.ge.f32.partialorder %v499_v9, 0.0 }
 0x128   : > { %v2893_v25 = vshrl.u32 %v6749_v59, 16  ;;  %v2895_v42 = vshll.u32 %v6749_v59, 16  ;;  %v6753_v21 = vld [vmem:[#allocation2 + $0x150] sm:$0xfe]   ;;  %v3561_v26 = vrot.slane %v6754_v32, 1  ;;  %v1402_v41 = vrot.slane %v1400_v44, 7  ;;  %v3611_v33 = vpop.permute.xlu1 %3610 }
 0x129   : > { %v3560_v27 = vrot.slane %v6753_v21, 1  ;;  %v2902_v34 = vrot.slane %v2900_v19, 1  ;;  %v1740_v6 = vld [vmem:[#allocation2 + $0x170] sm:$0x1]  ;;  %1738 = vst [vmem:[#allocation2 + $0x168] sm:$0xf] %v1737_v46  ;;  %v693_v37 = vsel %vm564_vm1, %v499_v9, %v629_v45 }
 0x12a   : > { %v2897_v17 = vrot.slane %v2895_v42, 1  ;;  %v6756_v2 = vld [vmem:[#allocation2 + $0x15c] sm:$0xff]   ;;  %v1741_v55 = vsel %vm6895_vm3, %v1398_v62, %v1740_v6  ;;  %v6757_v38 = vld [vmem:[#allocation2 + $0x164] ss:$0 sps:$4 sm:$0x11]   ;;  %v1408_v42 = vshrl.u32 %v6088_v48, 16  ;;  %v1405_v32 = vor.u32 %v1403_v49, %v1402_v41 }
 0x12b   : > { %v3562_v12 = vsel %vm3475_vm7, %v3560_v27, %v3561_v26  ;;  %1739 = vst.msk [vmem:[#allocation2 + $0x16c] sm:$0xf] %vm1530_vm2, %v1397_v30  ;;  %1742 = vst [vmem:[#allocation2 + $0x170] sm:$0x1] %v1741_v55  ;;  %v2905_v59 = vshrl.u32 %v6756_v2, 16  ;;  %v2907_v35 = vshll.u32 %v6756_v2, 16  ;;  %v6089_v61 = vpack.c.bf16 %v693_v37, %v693_v37 }
 0x12c   : > { %v2898_v50 = vor.u32 %v2897_v17, %v2893_v25  ;;  %431 = vst [vmem:[#allocation2 + $0x188] sm:$0x1] %v430_v63  ;;  %v6764_v5 = vld [vmem:[#allocation2 + $0x15c] sm:$0xfe]   ;;  %v2912_v14 = vshll.u32 %v6757_v38, 16  ;;  %v1411_v21 = vshll.u32 %v6088_v48, 16 }
 0x12d   : > { %v6765_v7 = vld [vmem:[#allocation2 + $0x164] ss:$0 sps:$4 sm:$0x11]   ;;  %v2909_v43 = vrot.slane %v2907_v35, 1  ;;  %v3563_v25 = vrot.slane %v6764_v5, 1  ;;  %v1406_v10 = vrot.slane %v1402_v41, 4 }
 0x12e   : > { %v2903_v58 = vsel %vm2555_vm6, %v2898_v50, %v2902_v34  ;;  %v1743_v15 = vld [vmem:[#allocation2 + $0x174] sm:$0xf]  ;;  %v6775_v40 = vld [vmem:[%s8591_s2 + $0x24] ss:$0 sps:$4 sm:$0x33]   ;;  %v2914_v8 = vrot.slane %v2912_v14, 1 }
 0x12f   : > { %3020 = vrot.lane.b32.xlu1 %v2903_v58, %s6846_s26  ;;  %v3564_v19 = vrot.slane %v6765_v7, 1  ;;  %v7895_v53 = vld [vmem:[%s8591_s2 + $0x10] ss:$0 sps:$4 sm:$0x33]   ;;  %v2910_v47 = vor.u32 %v2909_v43, %v2905_v59  ;;  %v1410_v17 = vrot.slane %v1408_v42, 7  ;;  %vm565_vm4 = vcmp.ge.f32.partialorder %v500_v51, 0.0  ;;  %v2999_v42 = vpop.permute.xlu0 %2998 }
 0x130   : > { %3083 = vst.msk [vmem:[#allocation3 + $0x80] sm:$0xff] %vm3066_vm10, %v2997_v56  ;;  %v1744_v27 = vsel %vm6971_vm13, %v1405_v32, %v1743_v15  ;;  %v1747_v18 = vld [vmem:[#allocation2 + $0x17c] sm:$0x1]  ;;  %v694_v39 = vsel %vm565_vm4, %v500_v51, %v630_v57  ;;  %vm3936_vm12 = vcmask 1041408   ;;  %v6782_v58 = vld [vmem:[%s8591_s2 + $0x28] sm:$0xff]   ;;  %v1417_v60 = vshrl.u32 %v6089_v61, 16 }
 0x131   : > { %v2915_v34 = vsel %vm2555_vm6, %v2910_v47, %v2914_v8  ;;  %v1413_v52 = vor.u32 %v1411_v21, %v1410_v17  ;;  %v1415_v31 = vrot.slane %v1410_v17, 4  ;;  %1745 = vst [vmem:[#allocation2 + $0x174] sm:$0xf] %v1744_v27  ;;  %v3565_v0 = vsel %vm3475_vm7, %v3563_v25, %v3564_v19  ;;  %6608 = vmatprep.subr.msk.bf16.mxu1 %vm3936_vm12, %v6775_v40  ;;  %v1750_v29 = vld [vmem:[#allocation2 + $0x180] sm:$0xf]  ;;  %v7915_v28 = vld [vmem:[#allocation3 + $0x10] sm:$0xff] }
 0x132   : > { %v6758_v26 = vld [vmem:[#allocation2 + $0x168] sm:$0xff]   ;;  %3022 = vrot.lane.b32.xlu0 %v2915_v34, %s6846_s26  ;;  %v6759_v50 = vld [vmem:[#allocation2 + $0x170] ss:$0 sps:$4 sm:$0x11]   ;;  %v6090_v11 = vpack.c.bf16 %v694_v39, %v694_v39  ;;  %6609 = vmatprep.subr.msk.bf16.mxu0 %vm3936_vm12, %v7895_v53  ;;  %3697 = vst.msk [vmem:[#allocation3 + $0x80] sm:$0xff] %vm3680_vm11, %v3611_v33  ;;  %v1420_v9 = vshll.u32 %v6089_v61, 16 }
 0x133   : > { %3634 = vrot.lane.b32.xlu1 %v3562_v12, %s6845_s25  ;;  %v2917_v12 = vshrl.u32 %v6758_v26, 16  ;;  %v2919_v13 = vshll.u32 %v6758_v26, 16  ;;  %v6766_v20 = vld [vmem:[#allocation2 + $0x168] sm:$0xfe]   ;;  %v1414_v6 = vsel %vm6978_vm14, %v1406_v10, %v1413_v52  ;;  %v1748_v16 = vsel %vm6895_vm3, %v1415_v31, %v1747_v18  ;;  %v1754_v48 = vld [vmem:[#allocation2 + $0x188] sm:$0x1]  ;;  %v3613_v18 = vpop.permute.xlu0 %3612 }
 0x134   : > { %v2924_v36 = vshll.u32 %v6759_v50, 16  ;;  %v6767_v62 = vld [vmem:[#allocation2 + $0x170] ss:$0 sps:$4 sm:$0x11]   ;;  %1746 = vst.msk [vmem:[#allocation2 + $0x178] sm:$0xf] %vm1530_vm2, %v1414_v6 }
 0x135   : > { %1749 = vst [vmem:[#allocation2 + $0x17c] sm:$0x1] %v1748_v16  ;;  %v2921_v54 = vrot.slane %v2919_v13, 1  ;;  %v1425_v46 = vshrl.u32 %v6090_v11, 16  ;;  %v1428_v22 = vshll.u32 %v6090_v11, 16  ;;  %v3566_v30 = vrot.slane %v6766_v20, 1 }
 0x136   : > { %v7920_v51 = vld [vmem:[%s8591_s2 + $0x38] ss:$0 sps:$4 sm:$0x33]   ;;  %v2926_v2 = vrot.slane %v2924_v36, 1  ;;  %3636 = vrot.lane.b32.xlu0 %v3565_v0, %s6845_s25  ;;  %v1419_v55 = vrot.slane %v1417_v60, 7  ;;  %v3938_v63 = vsel %vm3936_vm12, %v6775_v40, 0  ;;  %v3001_v0 = vpop.permute.xlu1 %3000 }
 0x137   : > { %v2922_v38 = vor.u32 %v2921_v54, %v2917_v12  ;;  %v3567_v44 = vrot.slane %v6767_v62, 1  ;;  %v1427_v59 = vrot.slane %v1425_v46, 7  ;;  %6269 = vmatpush3.bf16.msra.mxu1 %v3938_v63  ;;  %v7926_v35 = vsel %vm3936_vm12, %v7895_v53, 0  ;;  %v6789_v5 = vld [vmem:[%s8591_s2 + $0x30] sm:$0xff]   ;;  %v6799_v45 = vld [vmem:[#allocation2 + $0xe4] sm:$0xff]   ;;  %v6805_v21 = vld [vmem:[#allocation2 + $0xfc] sm:$0xff]  }
 0x138   : > { %v1422_v14 = vor.u32 %v1420_v9, %v1419_v55  ;;  %v1423_v7 = vrot.slane %v1419_v55, 4  ;;  %6339 = vmatpush3.bf16.msra.mxu0 %v7926_v35  ;;  %v6818_v41 = vld [vmem:[%s8591_s2] sm:$0xff]   ;;  %v6800_v49 = vld [vmem:[#allocation2 + $0xf0] sm:$0xff]   ;;  %2166 = vst.msk [vmem:[#allocation3 + $0x98] sm:$0xff] %vm2146_vm9, %v6799_v45  ;;  %v4750_v10 = vsel %vm3936_vm12, %v7920_v51, 0  ;;  %2168 = vst.msk [vmem:[#allocation3 + $0xa8] sm:$0xff] %vm2146_vm9, %v6805_v21 }
 0x139   : > { %6474 = vmatprep.subr.bf16.mxu1 %v6818_v41  ;;  %v2927_v57 = vsel %vm2555_vm6, %v2922_v38, %v2926_v2  ;;  %v1430_v43 = vor.u32 %v1428_v22, %v1427_v59  ;;  %v1432_v25 = vrot.slane %v1427_v59, 4  ;;  %6404 = vmatprep.subr.bf16.mxu0 %v6782_v58  ;;  %v7942_v40 = vld [vmem:[#allocation3 + $0x18] sm:$0xff]  ;;  %3084 = vst.msk [vmem:[#allocation3 + $0x88] sm:$0xff] %vm3066_vm10, %v2999_v42  ;;  %v7964_v34 = vld [vmem:[#allocation3 + $0x28] sm:$0xff]  ;;  %v6819_v26 = vld [vmem:[%s8591_s2 + $0x8] sm:$0xff]   ;;  %v8628_v16 = vmov 0  }
 0x13a   : > { %3024 = vrot.lane.b32.xlu1 %v2927_v57, %s6846_s26  ;;  %v1751_v15 = vsel %vm6971_vm13, %v1422_v14, %v1750_v29  ;;  %6271 = vmatmul.mubr.msk.bf16.vlgmr.msra.gmra.mrb[0].mxu1 %vm3839_vm8, %v7915_v28  ;;  %2167 = vst.msk [vmem:[#allocation3 + $0xa0] sm:$0xff] %vm2146_vm9, %v6800_v49  ;;  %v3568_v8 = vsel %vm3475_vm7, %v3566_v30, %v3567_v44  ;;  %2169 = vst.msk [vmem:[#allocation3 + $0xb0] sm:$0xff] %vm2146_vm9, %v6806_v3  ;;  %v328_v11 = vld [vmem:[#allocation2 + $0x18c] sm:$0x1]  ;;  %v432_v33 = vld [vmem:[#allocation2 + $0x194] sm:$0x1]  ;;  %v3615_v4 = vpop.permute.xlu1 %3614 }
 0x13b   : > { %v6770_v19 = vld [vmem:[#allocation2 + $0x174] sm:$0xff]   ;;  %v1431_v32 = vsel %vm6978_vm14, %v1423_v7, %v1430_v43  ;;  %1752 = vst [vmem:[#allocation2 + $0x180] sm:$0xf] %v1751_v15  ;;  %v1755_v24 = vsel %vm6895_vm3, %v1432_v25, %v1754_v48  ;;  %6341 = vmatmul.mubr.msk.bf16.vlgmr.msra.gmra.mrb[0].mxu0 %vm3839_vm8, %v7840_v23  ;;  %6477 = vmatpush3.bf16.msra.mxu1 %v6818_v41  ;;  %3698 = vst.msk [vmem:[#allocation3 + $0x88] sm:$0xff] %vm3680_vm11, %v3613_v18  ;;  %v329_v13 = vsel %vm6895_vm3, 0, %v328_v11  ;;  %v7995_v54 = vld [vmem:[#allocation3 + $0x30] sm:$0xff] }
 0x13c   : > { %v6771_v56 = vld [vmem:[#allocation2 + $0x17c] ss:$0 sps:$4 sm:$0x11]   ;;  %1753 = vst.msk [vmem:[#allocation2 + $0x184] sm:$0xf] %vm1530_vm2, %v1431_v32  ;;  %6344 = vmatprep.mubr.msk.bf16.mxu0 %vm3839_vm8, %v7915_v28  ;;  %6405 = vmatpush3.bf16.msra.mxu0 %v6782_v58  ;;  %v2929_v47 = vshrl.u32 %v6770_v19, 16 }
 0x13d   : > { %1756 = vst [vmem:[#allocation2 + $0x188] sm:$0x1] %v1755_v24  ;;  %v2931_v17 = vshll.u32 %v6770_v19, 16  ;;  %v6778_v27 = vld [vmem:[#allocation2 + $0x174] sm:$0xfe]   ;;  %6274 = vmatprep.mubr.msk.bf16.mxu1 %vm3839_vm8, %v7942_v40  ;;  %6406 = vmatprep.subr.bf16.mxu0 %v6789_v5  ;;  %v2936_v37 = vshll.u32 %v6771_v56, 16 }
 0x13e   : > { %v7961_v23 = vld [vmem:[#allocation3 + $0x20] sm:$0xff]  ;;  %3638 = vrot.lane.b32.xlu1 %v3568_v8, %s6845_s25  ;;  %6475 = vmatprep.subr.bf16.mxu1 %v6819_v26  ;;  %v3569_v31 = vrot.slane %v6778_v27, 1  ;;  %3085 = vst.msk [vmem:[#allocation3 + $0x90] sm:$0xff] %vm3066_vm10, %v3001_v0  ;;  %v433_v20 = vsel %vm6903_vm5, 0, %v432_v33  ;;  %330 = vst [vmem:[#allocation2 + $0x18c] sm:$0x1] %v329_v13 }
 0x13f   : > { %v6779_v39 = vld [vmem:[#allocation2 + $0x17c] ss:$0 sps:$4 sm:$0x11]   ;;  %v2933_v52 = vrot.slane %v2931_v17, 1  ;;  %6478 = vmatpush3.bf16.msra.mxu1 %v6819_v26  ;;  %v2938_v61 = vrot.slane %v2936_v37, 1  ;;  %v6807_v58 = vld [vmem:[#allocation2 + $0x114] sm:$0xff]  }
 0x140   : > { %v3570_v50 = vrot.slane %v6779_v39, 1  ;;  %6407 = vmatpush3.bf16.msra.mxu0 %v6789_v5  ;;  %6610 = vmatprep.subr.msk.bf16.mxu1 %vm3936_vm12, %v7895_v53  ;;  %434 = vst [vmem:[#allocation2 + $0x194] sm:$0x1] %v433_v20  ;;  %1819 = vst.msk [vmem:[#allocation2 + $0x18c] sm:$0xf] %vm1530_vm2, %v8628_v16  ;;  %v7999_v29 = vld [vmem:[#allocation3 + $0x38] sm:$0xff] }
 0x141   : > { %v2934_v12 = vor.u32 %v2933_v52, %v2929_v47  ;;  %6611 = vmatprep.subr.msk.bf16.mxu0 %vm3936_vm12, %v7920_v51  ;;  %1822 = vst.msk [vmem:[#allocation2 + $0x194] sm:$0x1] %vm226_vm0, %v8628_v16  ;;  %v3003_v51 = vpop.permute.xlu0 %3002  ;;  %v6808_v2 = vld [vmem:[#allocation2 + $0x120] sm:$0xff]   ;;  %v6809_v45 = vld [vmem:[#allocation2 + $0x12c] sm:$0xff]   ;;  %v8017_v57 = vld [vmem:[#allocation3 + $0x40] sm:$0xff]  ;;  %vm5432_vm0 = vcmask 191488  }
 0x142   : > { %6275 = vmatmul.mubr.msk.bf16.gmra.mrb[4].mxu1 %vm3839_vm8, %v7961_v23  ;;  %v3571_v60 = vsel %vm3475_vm7, %v3569_v31, %v3570_v50  ;;  %3699 = vst.msk [vmem:[#allocation3 + $0x90] sm:$0xff] %vm3680_vm11, %v3615_v4  ;;  %v6810_v42 = vld [vmem:[#allocation2 + $0x138] sm:$0xff]   ;;  %v8020_v21 = vld [vmem:[#allocation3 + $0x48] sm:$0xff]  ;;  %v6812_v56 = vld [vmem:[#allocation2 + $0x150] sm:$0xff]  }
 0x143   : > { %v2939_v6 = vsel %vm2555_vm6, %v2934_v12, %v2938_v61  ;;  %v6772_v53 = vld [vmem:[#allocation2 + $0x180] sm:$0xff]   ;;  %6345 = vmatmul.mubr.msk.bf16.gmra.mrb[4].mxu0 %vm3839_vm8, %v7942_v40  ;;  %6278 = vmatprep.mubr.msk.bf16.mxu1 %vm3839_vm8, %v7964_v34  ;;  %2170 = vst.msk [vmem:[#allocation3 + $0xb8] sm:$0xff] %vm2146_vm9, %v6807_v58  ;;  %2171 = vst.msk [vmem:[#allocation3 + $0xc0] sm:$0xff] %vm2146_vm9, %v6808_v2  ;;  %v6814_v18 = vld [vmem:[#allocation2 + $0x168] sm:$0xff]  }
 0x144   : > { %3026 = vrot.lane.b32.xlu0 %v2939_v6, %s6846_s26  ;;  %v6773_v1 = vld [vmem:[#allocation2 + $0x188] ss:$0 sps:$4 sm:$0x11]   ;;  %6348 = vmatprep.mubr.msk.bf16.mxu0 %vm3839_vm8, %v7961_v23  ;;  %v2941_v36 = vshrl.u32 %v6772_v53, 16  ;;  %v2943_v62 = vshll.u32 %v6772_v53, 16  ;;  %3086 = vst.msk [vmem:[#allocation3 + $0x98] sm:$0xff] %vm3066_vm10, %v3003_v51 }
 0x145   : > { %v6780_v9 = vld [vmem:[#allocation2 + $0x180] sm:$0xfe]   ;;  %6409 = vmatpush3.bf16.msra.mxu0 %v4750_v10  ;;  %6479 = vmatpush3.bf16.msra.mxu1 %v7926_v35  ;;  %v2948_v46 = vshll.u32 %v6773_v1, 16  ;;  %v6781_v22 = vld [vmem:[#allocation2 + $0x188] ss:$0 sps:$4 sm:$0x11]   ;;  %v3617_v59 = vpop.permute.xlu0 %3616  ;;  %v3005_v17 = vpop.permute.xlu1 %3004 }
 0x146   : > { %v2945_v30 = vrot.slane %v2943_v62, 1  ;;  %v3572_v55 = vrot.slane %v6780_v9, 1  ;;  %v3573_v63 = vrot.slane %v6781_v22, 1  ;;  %3700 = vst.msk [vmem:[#allocation3 + $0x98] sm:$0xff] %vm3680_vm11, %v3617_v59  ;;  %v6811_v10 = vld [vmem:[#allocation2 + $0x144] sm:$0xff]   ;;  %v6813_v27 = vld [vmem:[#allocation2 + $0x15c] sm:$0xff]  }
 0x147   : > { %v2950_v48 = vrot.slane %v2948_v46, 1  ;;  %v6801_v44 = vld [vmem:[#allocation2 + $0x18c] sm:$0xff]   ;;  %2172 = vst.msk [vmem:[#allocation3 + $0xc8] sm:$0xff] %vm2146_vm9, %v6809_v45  ;;  %2173 = vst.msk [vmem:[#allocation3 + $0xd0] sm:$0xff] %vm2146_vm9, %v6810_v42  ;;  %v6815_v37 = vld [vmem:[#allocation2 + $0x174] sm:$0xff]  }
 0x148   : > { %3640 = vrot.lane.b32.xlu0 %v3571_v60, %s6845_s25  ;;  %v2946_v38 = vor.u32 %v2945_v30, %v2941_v36  ;;  %v6802_v5 = vld [vmem:[#allocation2 + $0x194] ss:$0 sps:$4 sm:$0x11]   ;;  %v2953_v14 = vshrl.u32 %v6801_v44, 16  ;;  %v2955_v7 = vshll.u32 %v6801_v44, 16  ;;  %v3574_v49 = vsel %vm3475_vm7, %v3572_v55, %v3573_v63  ;;  %2174 = vst.msk [vmem:[#allocation3 + $0xd8] sm:$0xff] %vm2146_vm9, %v6811_v10 }
 0x149   : > { %v6803_v41 = vld [vmem:[#allocation2 + $0x18c] sm:$0xfe]   ;;  %v2960_v43 = vshll.u32 %v6802_v5, 16  ;;  %v6804_v25 = vld [vmem:[#allocation2 + $0x194] ss:$0 sps:$4 sm:$0x11]   ;;  %v3619_v52 = vpop.permute.xlu1 %3618 }
 0x14a   : > { %6279 = vmatmul.mubr.msk.bf16.gmra.mrb[8].mxu1 %vm3839_vm8, %v7995_v54  ;;  %v2951_v35 = vsel %vm2555_vm6, %v2946_v38, %v2950_v48  ;;  %v2957_v15 = vrot.slane %v2955_v7, 1  ;;  %v3575_v8 = vrot.slane %v6803_v41, 1  ;;  %v3576_v32 = vrot.slane %v6804_v25, 1  ;;  %2175 = vst.msk [vmem:[#allocation3 + $0xe0] sm:$0xff] %vm2146_vm9, %v6812_v56  ;;  %2176 = vst.msk [vmem:[#allocation3 + $0xe8] sm:$0xff] %vm2146_vm9, %v6813_v27  ;;  %v6816_v39 = vld [vmem:[#allocation2 + $0x180] sm:$0xff]  }
 0x14b   : > { %6349 = vmatmul.mubr.msk.bf16.gmra.mrb[8].mxu0 %vm3839_vm8, %v7964_v34  ;;  %6282 = vmatprep.mubr.msk.bf16.mxu1 %vm3839_vm8, %v7999_v29  ;;  %v2962_v19 = vrot.slane %v2960_v43, 1  ;;  %3087 = vst.msk [vmem:[#allocation3 + $0xa0] sm:$0xff] %vm3066_vm10, %v3005_v17  ;;  %v8041_v26 = vld [vmem:[#allocation3 + $0x50] sm:$0xff]  ;;  %v8044_v31 = vld [vmem:[#allocation3 + $0x58] sm:$0xff]  ;;  %v8056_v50 = vld [vmem:[#allocation3 + $0x60] sm:$0xff] }
 0x14c   : > { %3028 = vrot.lane.b32.xlu1 %v2951_v35, %s6846_s26  ;;  %6352 = vmatprep.mubr.msk.bf16.mxu0 %vm3839_vm8, %v7995_v54  ;;  %v2958_v24 = vor.u32 %v2957_v15, %v2953_v14  ;;  %v3577_v47 = vsel %vm3475_vm7, %v3575_v8, %v3576_v32  ;;  %2177 = vst.msk [vmem:[#allocation3 + $0xf0] sm:$0xff] %vm2146_vm9, %v6814_v18  ;;  %2178 = vst.msk [vmem:[#allocation3 + $0xf8] sm:$0xff] %vm2146_vm9, %v6815_v37  ;;  %v8059_v0 = vld [vmem:[#allocation3 + $0x68] sm:$0xff]  ;;  %v8071_v12 = vld [vmem:[#allocation3 + $0x70] sm:$0xff] }
 0x14d   : > { %3701 = vst.msk [vmem:[#allocation3 + $0xa0] sm:$0xff] %vm3680_vm11, %v3619_v52  ;;  %v8073_v13 = vld [vmem:[#allocation3 + $0x78] sm:$0xff]  ;;  %v8085_v53 = vld [vmem:[#allocation3 + $0x80] sm:$0xff]  ;;  %v8087_v16 = vld [vmem:[#allocation3 + $0x88] sm:$0xff] }
 0x14e   : > { %v2963_v3 = vsel %vm2555_vm6, %v2958_v24, %v2962_v19  ;;  %2179 = vst.msk [vmem:[#allocation3 + $0x100] sm:$0xff] %vm2146_vm9, %v6816_v39  ;;  %v8099_v58 = vld [vmem:[#allocation3 + $0x90] sm:$0xff]  ;;  %v8101_v36 = vld [vmem:[#allocation3 + $0x98] sm:$0xff] }
 0x14f   : > { %3030 = vrot.lane.b32.xlu0 %v2963_v3, %s6846_s26 }
 0x150   : > { %3642 = vrot.lane.b32.xlu1 %v3574_v49, %s6845_s25  ;;  %v3007_v61 = vpop.permute.xlu0 %3006 }
 0x151   : > { %3088 = vst.msk [vmem:[#allocation3 + $0xa8] sm:$0xff] %vm3066_vm10, %v3007_v61 }
 0x152   : > { %6283 = vmatmul.mubr.msk.bf16.gmra.mrb[12].mxu1 %vm3839_vm8, %v8017_v57 }
 0x153   : > { %6353 = vmatmul.mubr.msk.bf16.gmra.mrb[12].mxu0 %vm3839_vm8, %v7999_v29  ;;  %6286 = vmatprep.mubr.msk.bf16.mxu1 %vm3839_vm8, %v8020_v21 }
 0x154   : > { %6356 = vmatprep.mubr.msk.bf16.mxu0 %vm3839_vm8, %v8017_v57  ;;  %3644 = vrot.lane.b32.xlu1 %v3577_v47, %s6845_s25  ;;  %v3621_v11 = vpop.permute.xlu0 %3620  ;;  %v8113_v60 = vld [vmem:[#allocation3 + $0xa0] sm:$0xff] }
 0x155   : > { %3702 = vst.msk [vmem:[#allocation3 + $0xa8] sm:$0xff] %vm3680_vm11, %v3621_v11 }
 0x157   : > { %v3009_v33 = vpop.permute.xlu1 %3008 }
 0x158   : > { %3089 = vst.msk [vmem:[#allocation3 + $0xb0] sm:$0xff] %vm3066_vm10, %v3009_v33 }
 0x15a   : > { %6287 = vmatmul.mubr.msk.bf16.gmra.mrb[16].mxu1 %vm3839_vm8, %v8041_v26 }
 0x15b   : > { %6357 = vmatmul.mubr.msk.bf16.gmra.mrb[16].mxu0 %vm3839_vm8, %v8020_v21  ;;  %6290 = vmatprep.mubr.msk.bf16.mxu1 %vm3839_vm8, %v8044_v31  ;;  %v3623_v20 = vpop.permute.xlu1 %3622 }
 0x15c   : > { %6360 = vmatprep.mubr.msk.bf16.mxu0 %vm3839_vm8, %v8041_v26  ;;  %3703 = vst.msk [vmem:[#allocation3 + $0xb0] sm:$0xff] %vm3680_vm11, %v3623_v20  ;;  %v8115_v9 = vld [vmem:[#allocation3 + $0xa8] sm:$0xff] }
 0x15f   : > { %v3011_v6 = vpop.permute.xlu0 %3010 }
 0x160   : > { %3090 = vst.msk [vmem:[#allocation3 + $0xb8] sm:$0xff] %vm3066_vm10, %v3011_v6 }
 0x162   : > { %6291 = vmatmul.mubr.msk.bf16.gmra.mrb[20].mxu1 %vm3839_vm8, %v8056_v50 }
 0x163   : > { %6361 = vmatmul.mubr.msk.bf16.gmra.mrb[20].mxu0 %vm3839_vm8, %v8044_v31  ;;  %6294 = vmatprep.mubr.msk.bf16.mxu1 %vm3839_vm8, %v8059_v0  ;;  %v3625_v1 = vpop.permute.xlu0 %3624 }
 0x164   : > { %6364 = vmatprep.mubr.msk.bf16.mxu0 %vm3839_vm8, %v8056_v50  ;;  %3704 = vst.msk [vmem:[#allocation3 + $0xb8] sm:$0xff] %vm3680_vm11, %v3625_v1 }
 0x167   : > { %v3013_v4 = vpop.permute.xlu1 %3012 }
 0x168   : > { %3091 = vst.msk [vmem:[#allocation3 + $0xc0] sm:$0xff] %vm3066_vm10, %v3013_v4 }
 0x16a   : > { %6295 = vmatmul.mubr.msk.bf16.gmra.mrb[24].mxu1 %vm3839_vm8, %v8071_v12 }
 0x16b   : > { %6365 = vmatmul.mubr.msk.bf16.gmra.mrb[24].mxu0 %vm3839_vm8, %v8059_v0  ;;  %6298 = vmatprep.mubr.msk.bf16.mxu1 %vm3839_vm8, %v8073_v13  ;;  %v3627_v62 = vpop.permute.xlu1 %3626  ;;  %v8130_v51 = vld [vmem:[#allocation3 + $0xb8] sm:$0xff] }
 0x16c   : > { %6368 = vmatprep.mubr.msk.bf16.mxu0 %vm3839_vm8, %v8071_v12  ;;  %3705 = vst.msk [vmem:[#allocation3 + $0xc0] sm:$0xff] %vm3680_vm11, %v3627_v62 }
 0x172   : > { %6299 = vmatmul.mubr.msk.bf16.gmra.mrb[28].mxu1 %vm3839_vm8, %v8085_v53  ;;  %v3015_v46 = vpop.permute.xlu0 %3014 }
 0x173   : > { %6369 = vmatmul.mubr.msk.bf16.gmra.mrb[28].mxu0 %vm3839_vm8, %v8073_v13  ;;  %6302 = vmatprep.mubr.msk.bf16.mxu1 %vm3839_vm8, %v8087_v16  ;;  %3092 = vst.msk [vmem:[#allocation3 + $0xc8] sm:$0xff] %vm3066_vm10, %v3015_v46 }
 0x174   : > { %6410 = vmatprep.mubr.msk.bf16.mxu0 %vm3839_vm8, %v7915_v28  ;;  %v6817_v28 = vld [vmem:[#allocation2 + $0x18c] sm:$0xff]  }
 0x175   : > { %2180 = vst.msk [vmem:[#allocation3 + $0x108] sm:$0xff] %vm2146_vm9, %v6817_v28 }
 0x17a   : > { %6303 = vmatmul.mubr.msk.bf16.gmra.mrb[32].mxu1 %vm3839_vm8, %v8099_v58  ;;  %v3017_v22 = vpop.permute.xlu1 %3016 }
 0x17b   : > { %6411 = vmatmul.mubr.msk.bf16.vlgmr.msra.gmra.mrb[0].mxu0 %vm3839_vm8, %v7942_v40  ;;  %6306 = vmatprep.mubr.msk.bf16.mxu1 %vm3839_vm8, %v8101_v36  ;;  %v3629_v40 = vpop.permute.xlu0 %3628  ;;  %3093 = vst.msk [vmem:[#allocation3 + $0xd0] sm:$0xff] %vm3066_vm10, %v3017_v22 }
 0x17c   : > { %6414 = vmatprep.mubr.msk.bf16.mxu0 %vm3839_vm8, %v7961_v23  ;;  %3706 = vst.msk [vmem:[#allocation3 + $0xc8] sm:$0xff] %vm3680_vm11, %v3629_v40  ;;  %v8127_v23 = vld [vmem:[#allocation3 + $0xb0] sm:$0xff] }
 0x182   : > { %6307 = vmatmul.mubr.msk.bf16.gmra.mrb[36].mxu1 %vm3839_vm8, %v8113_v60 }
 0x183   : > { %6415 = vmatmul.mubr.msk.bf16.gmra.mrb[4].mxu0 %vm3839_vm8, %v7964_v34  ;;  %6310 = vmatprep.mubr.msk.bf16.mxu1 %vm3839_vm8, %v8115_v9  ;;  %v3631_v34 = vpop.permute.xlu1 %3630  ;;  %v8143_v2 = vld [vmem:[#allocation3 + $0xc8] sm:$0xff] }
 0x184   : > { %6418 = vmatprep.mubr.msk.bf16.mxu0 %vm3839_vm8, %v7995_v54  ;;  %3707 = vst.msk [vmem:[#allocation3 + $0xd0] sm:$0xff] %vm3680_vm11, %v3631_v34  ;;  %v8141_v54 = vld [vmem:[#allocation3 + $0xc0] sm:$0xff] }
 0x18a   : > { %6311 = vmatmul.mubr.msk.bf16.gmra.mrb[40].mxu1 %vm3839_vm8, %v8127_v23 }
 0x18b   : > { %6419 = vmatmul.mubr.msk.bf16.gmra.mrb[8].mxu0 %vm3839_vm8, %v7999_v29  ;;  %6314 = vmatprep.mubr.msk.bf16.mxu1 %vm3839_vm8, %v8130_v51  ;;  %v3019_v30 = vpop.permute.xlu0 %3018  ;;  %v8155_v55 = vld [vmem:[#allocation3 + $0xd0] sm:$0xff] }
 0x18c   : > { %6422 = vmatprep.mubr.msk.bf16.mxu0 %vm3839_vm8, %v8017_v57  ;;  %3094 = vst.msk [vmem:[#allocation3 + $0xd8] sm:$0xff] %vm3066_vm10, %v3019_v30 }
 0x18f   : > { %v3633_v29 = vpop.permute.xlu0 %3632 }
 0x190   : > { %3708 = vst.msk [vmem:[#allocation3 + $0xd8] sm:$0xff] %vm3680_vm11, %v3633_v29 }
 0x192   : > { %6315 = vmatmul.mubr.msk.bf16.gmra.mrb[44].mxu1 %vm3839_vm8, %v8141_v54 }
 0x193   : > { %6423 = vmatmul.mubr.msk.bf16.gmra.mrb[12].mxu0 %vm3839_vm8, %v8020_v21  ;;  %6318 = vmatprep.mubr.msk.bf16.mxu1 %vm3839_vm8, %v8143_v2 }
 0x194   : > { %6426 = vmatprep.mubr.msk.bf16.mxu0 %vm3839_vm8, %v8041_v26 }
 0x197   : > { %v8164_v38 = vld [vmem:[#allocation3 + $0xd8] sm:$0xff] }
 0x19a   : > { %6319 = vmatmul.mubr.msk.bf16.gmra.mrb[48].mxu1 %vm3839_vm8, %v8155_v55 }
 0x19b   : > { %6427 = vmatmul.mubr.msk.bf16.gmra.mrb[16].mxu0 %vm3839_vm8, %v8044_v31  ;;  %6322 = vmatprep.mubr.msk.bf16.mxu1 %vm3839_vm8, %v8164_v38 }
 0x19c   : > { %6430 = vmatprep.mubr.msk.bf16.mxu0 %vm3839_vm8, %v8056_v50 }
 0x1a1   : > { %v3021_v48 = vpop.permute.xlu1 %3020 }
 0x1a2   : > { %3095 = vst.msk [vmem:[#allocation3 + $0xe0] sm:$0xff] %vm3066_vm10, %v3021_v48 }
 0x1a3   : > { %6431 = vmatmul.mubr.msk.bf16.gmra.mrb[20].mxu0 %vm3839_vm8, %v8059_v0 }
 0x1a4   : > { %v3023_v44 = vpop.permute.xlu0 %3022  ;;  %6434 = vmatprep.mubr.msk.bf16.mxu0 %vm3839_vm8, %v8071_v12 }
 0x1a5   : > { %v3635_v63 = vpop.permute.xlu1 %3634  ;;  %3096 = vst.msk [vmem:[#allocation3 + $0xe8] sm:$0xff] %vm3066_vm10, %v3023_v44 }
 0x1a6   : > { %3709 = vst.msk [vmem:[#allocation3 + $0xe0] sm:$0xff] %vm3680_vm11, %v3635_v63 }
 0x1a8   : > { %v3637_v35 = vpop.permute.xlu0 %3636 }
 0x1a9   : > { %3710 = vst.msk [vmem:[#allocation3 + $0xe8] sm:$0xff] %vm3680_vm11, %v3637_v35 }
 0x1ab   : > { %6435 = vmatmul.mubr.msk.bf16.gmra.mrb[24].mxu0 %vm3839_vm8, %v8073_v13 }
 0x1ac   : > { %v3025_v5 = vpop.permute.xlu1 %3024  ;;  %6438 = vmatprep.mubr.msk.bf16.mxu0 %vm3839_vm8, %v8085_v53 }
 0x1ad   : > { %v3775_v59 = vld [vmem:[#allocation3 + $0xe0] sm:$0xff]  ;;  %3097 = vst.msk [vmem:[#allocation3 + $0xf0] sm:$0xff] %vm3066_vm10, %v3025_v5 }
 0x1ae   : > { %6323 = vmatmul.mubr.msk.bf16.gmra.mrb[52].mxu1 %vm3839_vm8, %v3775_v59 }
 0x1b0   : > { %v3639_v45 = vpop.permute.xlu1 %3638  ;;  %v3776_v14 = vld [vmem:[#allocation3 + $0xe8] sm:$0xff] }
 0x1b1   : > { %3711 = vst.msk [vmem:[#allocation3 + $0xf0] sm:$0xff] %vm3680_vm11, %v3639_v45  ;;  %6326 = vmatprep.mubr.msk.bf16.mxu1 %vm3839_vm8, %v3776_v14 }
 0x1b3   : > { %6439 = vmatmul.mubr.msk.bf16.gmra.mrb[28].mxu0 %vm3839_vm8, %v8087_v16 }
 0x1b4   : > { %6442 = vmatprep.mubr.msk.bf16.mxu0 %vm3839_vm8, %v8099_v58 }
 0x1b6   : > { %v3027_v7 = vpop.permute.xlu0 %3026 }
 0x1b7   : > { %3098 = vst.msk [vmem:[#allocation3 + $0xf8] sm:$0xff] %vm3066_vm10, %v3027_v7 }
 0x1b8   : > { %v3777_v41 = vld [vmem:[#allocation3 + $0xf0] sm:$0xff] }
 0x1b9   : > { %6327 = vmatmul.mubr.msk.bf16.gmra.mrb[56].mxu1 %vm3839_vm8, %v3777_v41 }
 0x1ba   : > { %v3641_v49 = vpop.permute.xlu0 %3640 }
 0x1bb   : > { %3712 = vst.msk [vmem:[#allocation3 + $0xf8] sm:$0xff] %vm3680_vm11, %v3641_v49  ;;  %6443 = vmatmul.mubr.msk.bf16.gmra.mrb[32].mxu0 %vm3839_vm8, %v8101_v36 }
 0x1bc   : > { %6446 = vmatprep.mubr.msk.bf16.mxu0 %vm3839_vm8, %v8113_v60 }
 0x1be   : > { %v3029_v57 = vpop.permute.xlu1 %3028 }
 0x1bf   : > { %3099 = vst.msk [vmem:[#allocation3 + $0x100] sm:$0xff] %vm3066_vm10, %v3029_v57 }
 0x1c1   : > { %v3031_v42 = vpop.permute.xlu0 %3030 }
 0x1c2   : > { %v3643_v43 = vpop.permute.xlu1 %3642  ;;  %v3778_v25 = vld [vmem:[#allocation3 + $0xf8] sm:$0xff]  ;;  %3100 = vst.msk [vmem:[#allocation3 + $0x108] sm:$0xff] %vm3066_vm10, %v3031_v42 }
 0x1c3   : > { %3713 = vst.msk [vmem:[#allocation3 + $0x100] sm:$0xff] %vm3680_vm11, %v3643_v43  ;;  %6330 = vmatprep.mubr.msk.bf16.mxu1 %vm3839_vm8, %v3778_v25  ;;  %6447 = vmatmul.mubr.msk.bf16.gmra.mrb[36].mxu0 %vm3839_vm8, %v8115_v9 }
 0x1c4   : > { %6450 = vmatprep.mubr.msk.bf16.mxu0 %vm3839_vm8, %v8127_v23 }
 0x1c6   : > { %v3645_v21 = vpop.permute.xlu1 %3644 }
 0x1c7   : > { %3714 = vst.msk [vmem:[#allocation3 + $0x108] sm:$0xff] %vm3680_vm11, %v3645_v21 }
 0x1ca   : > { %v3779_v15 = vld [vmem:[#allocation3 + $0x100] sm:$0xff] }
 0x1cb   : > { %6331 = vmatmul.mubr.msk.bf16.gmra.mrb[60].mxu1 %vm3839_vm8, %v3779_v15  ;;  %6451 = vmatmul.mubr.msk.bf16.gmra.mrb[40].mxu0 %vm3839_vm8, %v8130_v51 }
 0x1cc   : > { %6372 = vmatprep.mubr.msk.bf16.mxu1 %vm3839_vm8, %v8085_v53  ;;  %6454 = vmatprep.mubr.msk.bf16.mxu0 %vm3839_vm8, %v8141_v54 }
 0x1ce   : > { %v3812_v8 = vld [vmem:[#allocation3 + $0x108] sm:$0xff] }
 0x1d3   : > { %6373 = vmatmul.mubr.msk.bf16.vlgmr.msra.gmra.mrb[32].mxu1 %vm3839_vm8, %v8087_v16  ;;  %6455 = vmatmul.mubr.msk.bf16.gmra.mrb[44].mxu0 %vm3839_vm8, %v8143_v2 }
 0x1d4   : > { %6376 = vmatprep.mubr.msk.bf16.mxu1 %vm3839_vm8, %v8099_v58  ;;  %6458 = vmatprep.mubr.msk.bf16.mxu0 %vm3839_vm8, %v8155_v55 }
 0x1db   : > { %6377 = vmatmul.mubr.msk.bf16.gmra.mrb[36].mxu1 %vm3839_vm8, %v8101_v36  ;;  %6459 = vmatmul.mubr.msk.bf16.gmra.mrb[48].mxu0 %vm3839_vm8, %v8164_v38 }
 0x1dc   : > { %6380 = vmatprep.mubr.msk.bf16.mxu1 %vm3839_vm8, %v8113_v60  ;;  %6462 = vmatprep.mubr.msk.bf16.mxu0 %vm3839_vm8, %v3775_v59 }
 0x1e3   : > { %6381 = vmatmul.mubr.msk.bf16.gmra.mrb[40].mxu1 %vm3839_vm8, %v8115_v9  ;;  %6463 = vmatmul.mubr.msk.bf16.gmra.mrb[52].mxu0 %vm3839_vm8, %v3776_v14  ;;  %v8299_v9 = vld [vmem:[%s8592_s3] ss:$0 sm:$0xff] }
 0x1e4   : > { %6384 = vmatprep.mubr.msk.bf16.mxu1 %vm3839_vm8, %v8127_v23  ;;  %6466 = vmatprep.mubr.msk.bf16.mxu0 %vm3839_vm8, %v3777_v41 }
 0x1eb   : > { %6385 = vmatmul.mubr.msk.bf16.gmra.mrb[44].mxu1 %vm3839_vm8, %v8130_v51  ;;  %6467 = vmatmul.mubr.msk.bf16.gmra.mrb[56].mxu0 %vm3839_vm8, %v3778_v25 }
 0x1ec   : > { %6388 = vmatprep.mubr.msk.bf16.mxu1 %vm3839_vm8, %v8141_v54  ;;  %6470 = vmatprep.mubr.msk.bf16.mxu0 %vm3839_vm8, %v3779_v15 }
 0x1f3   : > { %6389 = vmatmul.mubr.msk.bf16.gmra.mrb[48].mxu1 %vm3839_vm8, %v8143_v2  ;;  %6471 = vmatmul.mubr.msk.bf16.gmra.mrb[60].mxu0 %vm3839_vm8, %v3812_v8 }
 0x1f4   : > { %6392 = vmatprep.mubr.msk.bf16.mxu1 %vm3839_vm8, %v8155_v55 }
 0x1fb   : > { %6393 = vmatmul.mubr.msk.bf16.gmra.mrb[52].mxu1 %vm3839_vm8, %v8164_v38 }
 0x1fc   : > { %6396 = vmatprep.mubr.msk.bf16.mxu1 %vm3839_vm8, %v3775_v59 }
 0x203   : > { %6397 = vmatmul.mubr.msk.bf16.gmra.mrb[56].mxu1 %vm3839_vm8, %v3776_v14 }
 0x204   : > { %6400 = vmatprep.mubr.msk.bf16.mxu1 %vm3839_vm8, %v3777_v41 }
 0x20b   : > { %6401 = vmatmul.mubr.msk.bf16.gmra.mrb[60].mxu1 %vm3839_vm8, %v3778_v25 }
 0x20d   : > { %v6272_v19 = vpop.f32.mrb[0].mxu1 }
 0x20e   : > { %v3974_v32 = vpop.f32.mrb[1].mxu1 }
 0x20f   : > { %v6273_v24 = vpop.f32.mrb[2].mxu1 }
 0x210   : > { %v3977_v10 = vpop.f32.mrb[3].mxu1 }
 0x215   : > { %v6276_v56 = vpop.f32.mrb[4].mxu1 }
 0x216   : > { %v3990_v3 = vpop.f32.mrb[5].mxu1 }
 0x217   : > { %v6277_v47 = vpop.f32.mrb[6].mxu1 }
 0x218   : > { %v3993_v17 = vpop.f32.mrb[7].mxu1 }
 0x21d   : > { %v8248_v27 = vpop.f32.mrb[8].mxu1 }
 0x21e   : > { %v8250_v18 = vpop.f32.mrb[9].mxu1 }
 0x21f   : > { %v8252_v37 = vpop.f32.mrb[10].mxu1 }
 0x220   : > { %v8254_v39 = vpop.f32.mrb[11].mxu1 }
 0x225   : > { %v8256_v26 = vpop.f32.mrb[12].mxu1 }
 0x226   : > { %v8258_v52 = vpop.f32.mrb[13].mxu1 }
 0x227   : > { %v8260_v31 = vpop.f32.mrb[14].mxu1 }
 0x228   : > { %v8262_v61 = vpop.f32.mrb[15].mxu1 }
 0x22d   : > { %v8264_v50 = vpop.f32.mrb[16].mxu1 }
 0x22e   : > { %v8266_v0 = vpop.f32.mrb[17].mxu1 }
 0x22f   : > { %v8268_v11 = vpop.f32.mrb[18].mxu1 }
 0x230   : > { %v8270_v33 = vpop.f32.mrb[19].mxu1 }
 0x235   : > { %v8272_v12 = vpop.f32.mrb[20].mxu1 }
 0x236   : > { %v8274_v13 = vpop.f32.mrb[21].mxu1 }
 0x237   : > { %v8276_v20 = vpop.f32.mrb[22].mxu1 }
 0x238   : > { %v8278_v6 = vpop.f32.mrb[23].mxu1 }
 0x23d   : > { %v8280_v53 = vpop.f32.mrb[24].mxu1 }
 0x23e   : > { %v8282_v16 = vpop.f32.mrb[25].mxu1 }
 0x23f   : > { %v8284_v1 = vpop.f32.mrb[26].mxu1 }
 0x240   : > { %v8286_v4 = vpop.f32.mrb[27].mxu1 }
 0x245   : > { %v8288_v58 = vpop.f32.mrb[28].mxu1 }
 0x246   : > { %v8290_v36 = vpop.f32.mrb[29].mxu1 }
 0x247   : > { %v8292_v62 = vpop.f32.mrb[30].mxu1 }
 0x248   : > { %v8294_v28 = vpop.f32.mrb[31].mxu1 }
 0x24e   : > { %v6412_v60 = vpop.f32.mrb[0].mxu0 }
 0x24f   : > { %v6480_v46 = vadd.f32 %v6412_v60, %v6272_v19  ;;  %v4786_v40 = vpop.f32.mrb[1].mxu0 }
 0x250   : > { %v6481_v23 = vadd.f32 %v4786_v40, %v3974_v32  ;;  %v6413_v22 = vpop.f32.mrb[2].mxu0 }
 0x251   : > { %v5114_v51 = vadd.f32 %v6480_v46, %v8299_v9  ;;  %v6482_v34 = vadd.f32 %v6413_v22, %v6273_v24  ;;  %v4789_v54 = vpop.f32.mrb[3].mxu0 }
 0x252   : > { %v5112_v2 = vadd.f32 %v6481_v23, %v8299_v9  ;;  %v6483_v30 = vadd.f32 %v4789_v54, %v3977_v10 }
 0x253   : > { %v6097_v29 = vpack.c.bf16 %v5114_v51, %v5114_v51  ;;  %v5115_v55 = vadd.f32 %v6482_v34, %v8299_v9 }
 0x254   : > { %v6095_v48 = vpack.c.bf16 %v5112_v2, %v5112_v2  ;;  %v5113_v63 = vadd.f32 %v6483_v30, %v8299_v9 }
 0x255   : > { %5435 = vst.msk [vmem:[%s8306_s5 + $0x8] sm:$0xf] %vm5432_vm0, %v6097_v29  ;;  %v6098_v38 = vpack.c.bf16 %v5115_v55, %v5115_v55 }
 0x256   : > { %5433 = vst.msk [vmem:[%s8306_s5] sm:$0xf] %vm5432_vm0, %v6095_v48  ;;  %v6096_v44 = vpack.c.bf16 %v5113_v63, %v5113_v63  ;;  %v6416_v59 = vpop.f32.mrb[4].mxu0 }
 0x257   : > { %5436 = vst.msk [vmem:[%s8306_s5 + $0xc] sm:$0xf] %vm5432_vm0, %v6098_v38  ;;  %v6484_v35 = vadd.f32 %v6416_v59, %v6276_v56  ;;  %v4802_v5 = vpop.f32.mrb[5].mxu0 }
 0x258   : > { %5434 = vst.msk [vmem:[%s8306_s5 + $0x4] sm:$0xf] %vm5432_vm0, %v6096_v44  ;;  %v6485_v45 = vadd.f32 %v4802_v5, %v3990_v3  ;;  %v6417_v14 = vpop.f32.mrb[6].mxu0 }
 0x259   : > { %v5118_v7 = vadd.f32 %v6484_v35, %v8299_v9  ;;  %v6486_v41 = vadd.f32 %v6417_v14, %v6277_v47  ;;  %v4805_v49 = vpop.f32.mrb[7].mxu0 }
 0x25a   : > { %v5116_v57 = vadd.f32 %v6485_v45, %v8299_v9  ;;  %v6487_v43 = vadd.f32 %v4805_v49, %v3993_v17 }
 0x25b   : > { %v6101_v25 = vpack.c.bf16 %v5118_v7, %v5118_v7  ;;  %v5119_v42 = vadd.f32 %v6486_v41, %v8299_v9 }
 0x25c   : > { %v6099_v21 = vpack.c.bf16 %v5116_v57, %v5116_v57  ;;  %v5117_v15 = vadd.f32 %v6487_v43, %v8299_v9 }
 0x25d   : > { %5439 = vst.msk [vmem:[%s8306_s5 + $0x18] sm:$0xf] %vm5432_vm0, %v6101_v25  ;;  %v6102_v8 = vpack.c.bf16 %v5119_v42, %v5119_v42 }
 0x25e   : > { %5437 = vst.msk [vmem:[%s8306_s5 + $0x10] sm:$0xf] %vm5432_vm0, %v6099_v21  ;;  %v6100_v19 = vpack.c.bf16 %v5117_v15, %v5117_v15  ;;  %v6420_v32 = vpop.f32.mrb[8].mxu0 }
 0x25f   : > { %5440 = vst.msk [vmem:[%s8306_s5 + $0x1c] sm:$0xf] %vm5432_vm0, %v6102_v8  ;;  %v6488_v24 = vadd.f32 %v6420_v32, %v8248_v27  ;;  %v4818_v10 = vpop.f32.mrb[9].mxu0 }
 0x260   : > { %5438 = vst.msk [vmem:[%s8306_s5 + $0x14] sm:$0xf] %vm5432_vm0, %v6100_v19  ;;  %v6489_v56 = vadd.f32 %v4818_v10, %v8250_v18  ;;  %v6421_v3 = vpop.f32.mrb[10].mxu0 }
 0x261   : > { %v5122_v47 = vadd.f32 %v6488_v24, %v8299_v9  ;;  %v6490_v17 = vadd.f32 %v6421_v3, %v8252_v37  ;;  %v4821_v60 = vpop.f32.mrb[11].mxu0 }
 0x262   : > { %v5120_v46 = vadd.f32 %v6489_v56, %v8299_v9  ;;  %v6491_v40 = vadd.f32 %v4821_v60, %v8254_v39 }
 0x263   : > { %v6105_v23 = vpack.c.bf16 %v5122_v47, %v5122_v47  ;;  %v5123_v27 = vadd.f32 %v6490_v17, %v8299_v9 }
 0x264   : > { %v6103_v22 = vpack.c.bf16 %v5120_v46, %v5120_v46  ;;  %v5121_v51 = vadd.f32 %v6491_v40, %v8299_v9 }
 0x265   : > { %5443 = vst.msk [vmem:[%s8306_s5 + $0x28] sm:$0xf] %vm5432_vm0, %v6105_v23  ;;  %v6106_v18 = vpack.c.bf16 %v5123_v27, %v5123_v27 }
 0x266   : > { %5441 = vst.msk [vmem:[%s8306_s5 + $0x20] sm:$0xf] %vm5432_vm0, %v6103_v22  ;;  %v6104_v34 = vpack.c.bf16 %v5121_v51, %v5121_v51  ;;  %v6424_v54 = vpop.f32.mrb[12].mxu0 }
 0x267   : > { %5444 = vst.msk [vmem:[%s8306_s5 + $0x2c] sm:$0xf] %vm5432_vm0, %v6106_v18  ;;  %v6492_v37 = vadd.f32 %v6424_v54, %v8256_v26  ;;  %v4834_v39 = vpop.f32.mrb[13].mxu0 }
 0x268   : > { %5442 = vst.msk [vmem:[%s8306_s5 + $0x24] sm:$0xf] %vm5432_vm0, %v6104_v34  ;;  %v6493_v2 = vadd.f32 %v4834_v39, %v8258_v52  ;;  %v6425_v30 = vpop.f32.mrb[14].mxu0 }
 0x269   : > { %v5126_v29 = vadd.f32 %v6492_v37, %v8299_v9  ;;  %v6494_v55 = vadd.f32 %v6425_v30, %v8260_v31  ;;  %v4837_v48 = vpop.f32.mrb[15].mxu0 }
 0x26a   : > { %v5124_v63 = vadd.f32 %v6493_v2, %v8299_v9  ;;  %v6495_v38 = vadd.f32 %v4837_v48, %v8262_v61 }
 0x26b   : > { %v6109_v44 = vpack.c.bf16 %v5126_v29, %v5126_v29  ;;  %v5127_v26 = vadd.f32 %v6494_v55, %v8299_v9 }
 0x26c   : > { %v6107_v59 = vpack.c.bf16 %v5124_v63, %v5124_v63  ;;  %v5125_v35 = vadd.f32 %v6495_v38, %v8299_v9 }
 0x26d   : > { %5447 = vst.msk [vmem:[%s8306_s5 + $0x38] sm:$0xf] %vm5432_vm0, %v6109_v44  ;;  %v6110_v52 = vpack.c.bf16 %v5127_v26, %v5127_v26 }
 0x26e   : > { %5445 = vst.msk [vmem:[%s8306_s5 + $0x30] sm:$0xf] %vm5432_vm0, %v6107_v59  ;;  %v6108_v5 = vpack.c.bf16 %v5125_v35, %v5125_v35  ;;  %v6428_v45 = vpop.f32.mrb[16].mxu0 }
 0x26f   : > { %5448 = vst.msk [vmem:[%s8306_s5 + $0x3c] sm:$0xf] %vm5432_vm0, %v6110_v52  ;;  %v6496_v31 = vadd.f32 %v6428_v45, %v8264_v50  ;;  %v4850_v61 = vpop.f32.mrb[17].mxu0 }
 0x270   : > { %5446 = vst.msk [vmem:[%s8306_s5 + $0x34] sm:$0xf] %vm5432_vm0, %v6108_v5  ;;  %v6497_v14 = vadd.f32 %v4850_v61, %v8266_v0  ;;  %v6429_v7 = vpop.f32.mrb[18].mxu0 }
 0x271   : > { %v5130_v41 = vadd.f32 %v6496_v31, %v8299_v9  ;;  %v6498_v49 = vadd.f32 %v6429_v7, %v8268_v11  ;;  %v4853_v57 = vpop.f32.mrb[19].mxu0 }
 0x272   : > { %v5128_v43 = vadd.f32 %v6497_v14, %v8299_v9  ;;  %v6499_v25 = vadd.f32 %v4853_v57, %v8270_v33 }
 0x273   : > { %v6113_v42 = vpack.c.bf16 %v5130_v41, %v5130_v41  ;;  %v5131_v50 = vadd.f32 %v6498_v49, %v8299_v9 }
 0x274   : > { %v6111_v21 = vpack.c.bf16 %v5128_v43, %v5128_v43  ;;  %v5129_v15 = vadd.f32 %v6499_v25, %v8299_v9 }
 0x275   : > { %5451 = vst.msk [vmem:[%s8306_s5 + $0x48] sm:$0xf] %vm5432_vm0, %v6113_v42  ;;  %v6114_v0 = vpack.c.bf16 %v5131_v50, %v5131_v50 }
 0x276   : > { %5449 = vst.msk [vmem:[%s8306_s5 + $0x40] sm:$0xf] %vm5432_vm0, %v6111_v21  ;;  %v6112_v8 = vpack.c.bf16 %v5129_v15, %v5129_v15  ;;  %v6432_v19 = vpop.f32.mrb[20].mxu0 }
 0x277   : > { %5452 = vst.msk [vmem:[%s8306_s5 + $0x4c] sm:$0xf] %vm5432_vm0, %v6114_v0  ;;  %v6500_v11 = vadd.f32 %v6432_v19, %v8272_v12  ;;  %v4866_v33 = vpop.f32.mrb[21].mxu0 }
 0x278   : > { %5450 = vst.msk [vmem:[%s8306_s5 + $0x44] sm:$0xf] %vm5432_vm0, %v6112_v8  ;;  %v6501_v32 = vadd.f32 %v4866_v33, %v8274_v13  ;;  %v6433_v24 = vpop.f32.mrb[22].mxu0 }
 0x279   : > { %v5134_v10 = vadd.f32 %v6500_v11, %v8299_v9  ;;  %v6502_v56 = vadd.f32 %v6433_v24, %v8276_v20  ;;  %v4869_v3 = vpop.f32.mrb[23].mxu0 }
 0x27a   : > { %v5132_v47 = vadd.f32 %v6501_v32, %v8299_v9  ;;  %v6503_v17 = vadd.f32 %v4869_v3, %v8278_v6 }
 0x27b   : > { %v6117_v60 = vpack.c.bf16 %v5134_v10, %v5134_v10  ;;  %v5135_v12 = vadd.f32 %v6502_v56, %v8299_v9 }
 0x27c   : > { %v6115_v46 = vpack.c.bf16 %v5132_v47, %v5132_v47  ;;  %v5133_v40 = vadd.f32 %v6503_v17, %v8299_v9 }
 0x27d   : > { %5455 = vst.msk [vmem:[%s8306_s5 + $0x58] sm:$0xf] %vm5432_vm0, %v6117_v60  ;;  %v6118_v13 = vpack.c.bf16 %v5135_v12, %v5135_v12 }
 0x27e   : > { %5453 = vst.msk [vmem:[%s8306_s5 + $0x50] sm:$0xf] %vm5432_vm0, %v6115_v46  ;;  %v6116_v23 = vpack.c.bf16 %v5133_v40, %v5133_v40  ;;  %v6436_v27 = vpop.f32.mrb[24].mxu0 }
 0x27f   : > { %5456 = vst.msk [vmem:[%s8306_s5 + $0x5c] sm:$0xf] %vm5432_vm0, %v6118_v13  ;;  %v6504_v20 = vadd.f32 %v6436_v27, %v8280_v53  ;;  %v4882_v6 = vpop.f32.mrb[25].mxu0 }
 0x280   : > { %5454 = vst.msk [vmem:[%s8306_s5 + $0x54] sm:$0xf] %vm5432_vm0, %v6116_v23  ;;  %v6505_v22 = vadd.f32 %v4882_v6, %v8282_v16  ;;  %v6437_v51 = vpop.f32.mrb[26].mxu0 }
 0x281   : > { %v5138_v18 = vadd.f32 %v6504_v20, %v8299_v9  ;;  %v6506_v34 = vadd.f32 %v6437_v51, %v8284_v1  ;;  %v4885_v54 = vpop.f32.mrb[27].mxu0 }
 0x282   : > { %v5136_v37 = vadd.f32 %v6505_v22, %v8299_v9  ;;  %v6507_v39 = vadd.f32 %v4885_v54, %v8286_v4 }
 0x283   : > { %v6121_v2 = vpack.c.bf16 %v5138_v18, %v5138_v18  ;;  %v5139_v53 = vadd.f32 %v6506_v34, %v8299_v9 }
 0x284   : > { %v6119_v30 = vpack.c.bf16 %v5136_v37, %v5136_v37  ;;  %v5137_v29 = vadd.f32 %v6507_v39, %v8299_v9 }
 0x285   : > { %5459 = vst.msk [vmem:[%s8306_s5 + $0x68] sm:$0xf] %vm5432_vm0, %v6121_v2  ;;  %v6122_v16 = vpack.c.bf16 %v5139_v53, %v5139_v53 }
 0x286   : > { %5457 = vst.msk [vmem:[%s8306_s5 + $0x60] sm:$0xf] %vm5432_vm0, %v6119_v30  ;;  %v6120_v55 = vpack.c.bf16 %v5137_v29, %v5137_v29  ;;  %v6440_v48 = vpop.f32.mrb[28].mxu0 }
 0x287   : > { %5460 = vst.msk [vmem:[%s8306_s5 + $0x6c] sm:$0xf] %vm5432_vm0, %v6122_v16  ;;  %v6508_v1 = vadd.f32 %v6440_v48, %v8288_v58  ;;  %v4898_v4 = vpop.f32.mrb[29].mxu0 }
 0x288   : > { %5458 = vst.msk [vmem:[%s8306_s5 + $0x64] sm:$0xf] %vm5432_vm0, %v6120_v55  ;;  %v6509_v63 = vadd.f32 %v4898_v4, %v8290_v36  ;;  %v6441_v38 = vpop.f32.mrb[30].mxu0 }
 0x289   : > { %v5142_v44 = vadd.f32 %v6508_v1, %v8299_v9  ;;  %v6510_v26 = vadd.f32 %v6441_v38, %v8292_v62  ;;  %v4901_v59 = vpop.f32.mrb[31].mxu0 }
 0x28a   : > { %v5140_v35 = vadd.f32 %v6509_v63, %v8299_v9  ;;  %v6511_v52 = vadd.f32 %v4901_v59, %v8294_v28 }
 0x28b   : > { %v6125_v5 = vpack.c.bf16 %v5142_v44, %v5142_v44  ;;  %v5143_v58 = vadd.f32 %v6510_v26, %v8299_v9 }
 0x28c   : > { %v6123_v45 = vpack.c.bf16 %v5140_v35, %v5140_v35  ;;  %v5141_v31 = vadd.f32 %v6511_v52, %v8299_v9 }
 0x28d   : > { %5463 = vst.msk [vmem:[%s8306_s5 + $0x78] sm:$0xf] %vm5432_vm0, %v6125_v5  ;;  %v6126_v36 = vpack.c.bf16 %v5143_v58, %v5143_v58 }
 0x28e   : > { %5461 = vst.msk [vmem:[%s8306_s5 + $0x70] sm:$0xf] %vm5432_vm0, %v6123_v45  ;;  %v6124_v61 = vpack.c.bf16 %v5141_v31, %v5141_v31  ;;  %v6444_v14 = vpop.f32.mrb[32].mxu0 }
 0x28f   : > { %5464 = vst.msk [vmem:[%s8306_s5 + $0x7c] sm:$0xf] %vm5432_vm0, %v6126_v36  ;;  %v4914_v62 = vpop.f32.mrb[33].mxu0 }
 0x290   : > { %5462 = vst.msk [vmem:[%s8306_s5 + $0x74] sm:$0xf] %vm5432_vm0, %v6124_v61  ;;  %v6445_v7 = vpop.f32.mrb[34].mxu0 }
 0x291   : > { %v4917_v28 = vpop.f32.mrb[35].mxu0 }
 0x296   : > { %v6448_v41 = vpop.f32.mrb[36].mxu0 }
 0x297   : > { %v4930_v49 = vpop.f32.mrb[37].mxu0 }
 0x298   : > { %v6449_v57 = vpop.f32.mrb[38].mxu0 }
 0x299   : > { %v4933_v43 = vpop.f32.mrb[39].mxu0 }
 0x29e   : > { %v6452_v25 = vpop.f32.mrb[40].mxu0 }
 0x29f   : > { %v4946_v42 = vpop.f32.mrb[41].mxu0 }
 0x2a0   : > { %v6453_v50 = vpop.f32.mrb[42].mxu0 }
 0x2a1   : > { %v4949_v21 = vpop.f32.mrb[43].mxu0 }
 0x2a6   : > { %v6374_v15 = vpop.f32.mrb[32].mxu1  ;;  %v8427_v0 = vpop.f32.mrb[44].mxu0 }
 0x2a7   : > { %v6512_v8 = vadd.f32 %v6444_v14, %v6374_v15  ;;  %v4505_v19 = vpop.f32.mrb[33].mxu1  ;;  %v8429_v11 = vpop.f32.mrb[45].mxu0 }
 0x2a8   : > { %v6513_v33 = vadd.f32 %v4914_v62, %v4505_v19  ;;  %v6375_v32 = vpop.f32.mrb[34].mxu1  ;;  %v8431_v24 = vpop.f32.mrb[46].mxu0 }
 0x2a9   : > { %v5146_v10 = vadd.f32 %v6512_v8, %v8299_v9  ;;  %v6514_v56 = vadd.f32 %v6445_v7, %v6375_v32  ;;  %v4508_v3 = vpop.f32.mrb[35].mxu1  ;;  %v8434_v47 = vpop.f32.mrb[47].mxu0 }
 0x2aa   : > { %v5144_v17 = vadd.f32 %v6513_v33, %v8299_v9  ;;  %v6515_v60 = vadd.f32 %v4917_v28, %v4508_v3 }
 0x2ab   : > { %v6129_v12 = vpack.c.bf16 %v5146_v10, %v5146_v10  ;;  %v5147_v46 = vadd.f32 %v6514_v56, %v8299_v9 }
 0x2ac   : > { %v6127_v40 = vpack.c.bf16 %v5144_v17, %v5144_v17  ;;  %v5145_v13 = vadd.f32 %v6515_v60, %v8299_v9 }
 0x2ad   : > { %5467 = vst.msk [vmem:[%s8306_s5 + $0x88] sm:$0xf] %vm5432_vm0, %v6129_v12  ;;  %v6130_v23 = vpack.c.bf16 %v5147_v46, %v5147_v46 }
 0x2ae   : > { %5465 = vst.msk [vmem:[%s8306_s5 + $0x80] sm:$0xf] %vm5432_vm0, %v6127_v40  ;;  %v6128_v27 = vpack.c.bf16 %v5145_v13, %v5145_v13  ;;  %v6378_v20 = vpop.f32.mrb[36].mxu1  ;;  %v8443_v6 = vpop.f32.mrb[48].mxu0 }
 0x2af   : > { %5468 = vst.msk [vmem:[%s8306_s5 + $0x8c] sm:$0xf] %vm5432_vm0, %v6130_v23  ;;  %v6516_v22 = vadd.f32 %v6448_v41, %v6378_v20  ;;  %v4521_v51 = vpop.f32.mrb[37].mxu1  ;;  %v8447_v18 = vpop.f32.mrb[49].mxu0 }
 0x2b0   : > { %5466 = vst.msk [vmem:[%s8306_s5 + $0x84] sm:$0xf] %vm5432_vm0, %v6128_v27  ;;  %v6517_v34 = vadd.f32 %v4930_v49, %v4521_v51  ;;  %v6379_v54 = vpop.f32.mrb[38].mxu1  ;;  %v8451_v37 = vpop.f32.mrb[50].mxu0 }
 0x2b1   : > { %v5150_v39 = vadd.f32 %v6516_v22, %v8299_v9  ;;  %v6518_v2 = vadd.f32 %v6449_v57, %v6379_v54  ;;  %v4524_v53 = vpop.f32.mrb[39].mxu1  ;;  %v8454_v30 = vpop.f32.mrb[51].mxu0 }
 0x2b2   : > { %v5148_v29 = vadd.f32 %v6517_v34, %v8299_v9  ;;  %v6519_v16 = vadd.f32 %v4933_v43, %v4524_v53 }
 0x2b3   : > { %v6133_v55 = vpack.c.bf16 %v5150_v39, %v5150_v39  ;;  %v5151_v48 = vadd.f32 %v6518_v2, %v8299_v9 }
 0x2b4   : > { %v6131_v1 = vpack.c.bf16 %v5148_v29, %v5148_v29  ;;  %v5149_v4 = vadd.f32 %v6519_v16, %v8299_v9 }
 0x2b5   : > { %5471 = vst.msk [vmem:[%s8306_s5 + $0x98] sm:$0xf] %vm5432_vm0, %v6133_v55  ;;  %v6134_v63 = vpack.c.bf16 %v5151_v48, %v5151_v48 }
 0x2b6   : > { %5469 = vst.msk [vmem:[%s8306_s5 + $0x90] sm:$0xf] %vm5432_vm0, %v6131_v1  ;;  %v6132_v38 = vpack.c.bf16 %v5149_v4, %v5149_v4  ;;  %v6382_v44 = vpop.f32.mrb[40].mxu1  ;;  %v8463_v26 = vpop.f32.mrb[52].mxu0 }
 0x2b7   : > { %5472 = vst.msk [vmem:[%s8306_s5 + $0x9c] sm:$0xf] %vm5432_vm0, %v6134_v63  ;;  %v6520_v59 = vadd.f32 %v6452_v25, %v6382_v44  ;;  %v4537_v35 = vpop.f32.mrb[41].mxu1  ;;  %v8467_v52 = vpop.f32.mrb[53].mxu0 }
 0x2b8   : > { %5470 = vst.msk [vmem:[%s8306_s5 + $0x94] sm:$0xf] %vm5432_vm0, %v6132_v38  ;;  %v6521_v5 = vadd.f32 %v4946_v42, %v4537_v35  ;;  %v6383_v58 = vpop.f32.mrb[42].mxu1  ;;  %v8471_v45 = vpop.f32.mrb[54].mxu0 }
 0x2b9   : > { %v5154_v31 = vadd.f32 %v6520_v59, %v8299_v9  ;;  %v6522_v36 = vadd.f32 %v6453_v50, %v6383_v58  ;;  %v4540_v61 = vpop.f32.mrb[43].mxu1  ;;  %v8474_v14 = vpop.f32.mrb[55].mxu0 }
 0x2ba   : > { %v5152_v62 = vadd.f32 %v6521_v5, %v8299_v9  ;;  %v6523_v7 = vadd.f32 %v4949_v21, %v4540_v61 }
 0x2bb   : > { %v6137_v28 = vpack.c.bf16 %v5154_v31, %v5154_v31  ;;  %v5155_v41 = vadd.f32 %v6522_v36, %v8299_v9 }
 0x2bc   : > { %v6135_v49 = vpack.c.bf16 %v5152_v62, %v5152_v62  ;;  %v5153_v57 = vadd.f32 %v6523_v7, %v8299_v9 }
 0x2bd   : > { %5475 = vst.msk [vmem:[%s8306_s5 + $0xa8] sm:$0xf] %vm5432_vm0, %v6137_v28  ;;  %v6138_v43 = vpack.c.bf16 %v5155_v41, %v5155_v41 }
 0x2be   : > { %5473 = vst.msk [vmem:[%s8306_s5 + $0xa0] sm:$0xf] %vm5432_vm0, %v6135_v49  ;;  %v6136_v25 = vpack.c.bf16 %v5153_v57, %v5153_v57  ;;  %v6386_v42 = vpop.f32.mrb[44].mxu1  ;;  %v8483_v50 = vpop.f32.mrb[56].mxu0 }
 0x2bf   : > { %5476 = vst.msk [vmem:[%s8306_s5 + $0xac] sm:$0xf] %vm5432_vm0, %v6138_v43  ;;  %v6524_v15 = vadd.f32 %v8427_v0, %v6386_v42  ;;  %v4553_v21 = vpop.f32.mrb[45].mxu1  ;;  %v8488_v8 = vpop.f32.mrb[57].mxu0 }
 0x2c0   : > { %5474 = vst.msk [vmem:[%s8306_s5 + $0xa4] sm:$0xf] %vm5432_vm0, %v6136_v25  ;;  %v6525_v19 = vadd.f32 %v8429_v11, %v4553_v21  ;;  %v6387_v33 = vpop.f32.mrb[46].mxu1  ;;  %v8493_v32 = vpop.f32.mrb[58].mxu0 }
 0x2c1   : > { %v5158_v10 = vadd.f32 %v6524_v15, %v8299_v9  ;;  %v6526_v56 = vadd.f32 %v8431_v24, %v6387_v33  ;;  %v4556_v3 = vpop.f32.mrb[47].mxu1  ;;  %v8497_v17 = vpop.f32.mrb[59].mxu0 }
 0x2c2   : > { %v5156_v0 = vadd.f32 %v6525_v19, %v8299_v9  ;;  %v6527_v60 = vadd.f32 %v8434_v47, %v4556_v3 }
 0x2c3   : > { %v6141_v12 = vpack.c.bf16 %v5158_v10, %v5158_v10  ;;  %v5159_v46 = vadd.f32 %v6526_v56, %v8299_v9 }
 0x2c4   : > { %v6139_v11 = vpack.c.bf16 %v5156_v0, %v5156_v0  ;;  %v5157_v40 = vadd.f32 %v6527_v60, %v8299_v9 }
 0x2c5   : > { %5479 = vst.msk [vmem:[%s8306_s5 + $0xb8] sm:$0xf] %vm5432_vm0, %v6141_v12  ;;  %v6142_v13 = vpack.c.bf16 %v5159_v46, %v5159_v46 }
 0x2c6   : > { %5477 = vst.msk [vmem:[%s8306_s5 + $0xb0] sm:$0xf] %vm5432_vm0, %v6139_v11  ;;  %v6140_v24 = vpack.c.bf16 %v5157_v40, %v5157_v40  ;;  %v6390_v23 = vpop.f32.mrb[48].mxu1  ;;  %v8507_v27 = vpop.f32.mrb[60].mxu0 }
 0x2c7   : > { %5480 = vst.msk [vmem:[%s8306_s5 + $0xbc] sm:$0xf] %vm5432_vm0, %v6142_v13  ;;  %v6528_v20 = vadd.f32 %v8443_v6, %v6390_v23  ;;  %v4569_v47 = vpop.f32.mrb[49].mxu1  ;;  %v8512_v22 = vpop.f32.mrb[61].mxu0 }
 0x2c8   : > { %5478 = vst.msk [vmem:[%s8306_s5 + $0xb4] sm:$0xf] %vm5432_vm0, %v6140_v24  ;;  %v6529_v51 = vadd.f32 %v8447_v18, %v4569_v47  ;;  %v6391_v34 = vpop.f32.mrb[50].mxu1  ;;  %v8517_v54 = vpop.f32.mrb[62].mxu0 }
 0x2c9   : > { %v5162_v39 = vadd.f32 %v6528_v20, %v8299_v9  ;;  %v6530_v2 = vadd.f32 %v8451_v37, %v6391_v34  ;;  %v4572_v53 = vpop.f32.mrb[51].mxu1  ;;  %v5029_v6 = vpop.f32.mrb[63].mxu0 }
 0x2ca   : > { %v5160_v29 = vadd.f32 %v6529_v51, %v8299_v9  ;;  %v6531_v16 = vadd.f32 %v8454_v30, %v4572_v53 }
 0x2cb   : > { %v6145_v55 = vpack.c.bf16 %v5162_v39, %v5162_v39  ;;  %v5163_v48 = vadd.f32 %v6530_v2, %v8299_v9 }
 0x2cc   : > { %v6143_v1 = vpack.c.bf16 %v5160_v29, %v5160_v29  ;;  %v5161_v18 = vadd.f32 %v6531_v16, %v8299_v9 }
 0x2cd   : > { %5483 = vst.msk [vmem:[%s8306_s5 + $0xc8] sm:$0xf] %vm5432_vm0, %v6145_v55  ;;  %v6146_v4 = vpack.c.bf16 %v5163_v48, %v5163_v48 }
 0x2ce   : > { %5481 = vst.msk [vmem:[%s8306_s5 + $0xc0] sm:$0xf] %vm5432_vm0, %v6143_v1  ;;  %v6144_v63 = vpack.c.bf16 %v5161_v18, %v5161_v18  ;;  %v6394_v37 = vpop.f32.mrb[52].mxu1 }
 0x2cf   : > { %5484 = vst.msk [vmem:[%s8306_s5 + $0xcc] sm:$0xf] %vm5432_vm0, %v6146_v4  ;;  %v6532_v38 = vadd.f32 %v8463_v26, %v6394_v37  ;;  %v4585_v30 = vpop.f32.mrb[53].mxu1 }
 0x2d0   : > { %5482 = vst.msk [vmem:[%s8306_s5 + $0xc4] sm:$0xf] %vm5432_vm0, %v6144_v63  ;;  %v6533_v44 = vadd.f32 %v8467_v52, %v4585_v30  ;;  %v6395_v59 = vpop.f32.mrb[54].mxu1 }
 0x2d1   : > { %v5166_v35 = vadd.f32 %v6532_v38, %v8299_v9  ;;  %v6534_v5 = vadd.f32 %v8471_v45, %v6395_v59  ;;  %v4588_v58 = vpop.f32.mrb[55].mxu1 }
 0x2d2   : > { %v5164_v31 = vadd.f32 %v6533_v44, %v8299_v9  ;;  %v6535_v36 = vadd.f32 %v8474_v14, %v4588_v58 }
 0x2d3   : > { %v6149_v61 = vpack.c.bf16 %v5166_v35, %v5166_v35  ;;  %v5167_v26 = vadd.f32 %v6534_v5, %v8299_v9 }
 0x2d4   : > { %v6147_v62 = vpack.c.bf16 %v5164_v31, %v5164_v31  ;;  %v5165_v7 = vadd.f32 %v6535_v36, %v8299_v9 }
 0x2d5   : > { %5487 = vst.msk [vmem:[%s8306_s5 + $0xd8] sm:$0xf] %vm5432_vm0, %v6149_v61  ;;  %v6150_v52 = vpack.c.bf16 %v5167_v26, %v5167_v26 }
 0x2d6   : > { %5485 = vst.msk [vmem:[%s8306_s5 + $0xd0] sm:$0xf] %vm5432_vm0, %v6147_v62  ;;  %v6148_v28 = vpack.c.bf16 %v5165_v7, %v5165_v7  ;;  %v6398_v41 = vpop.f32.mrb[56].mxu1 }
 0x2d7   : > { %5488 = vst.msk [vmem:[%s8306_s5 + $0xdc] sm:$0xf] %vm5432_vm0, %v6150_v52  ;;  %v6536_v45 = vadd.f32 %v8483_v50, %v6398_v41  ;;  %v4601_v14 = vpop.f32.mrb[57].mxu1 }
 0x2d8   : > { %5486 = vst.msk [vmem:[%s8306_s5 + $0xd4] sm:$0xf] %vm5432_vm0, %v6148_v28  ;;  %v6537_v49 = vadd.f32 %v8488_v8, %v4601_v14  ;;  %v6399_v57 = vpop.f32.mrb[58].mxu1 }
 0x2d9   : > { %v5170_v43 = vadd.f32 %v6536_v45, %v8299_v9  ;;  %v6538_v25 = vadd.f32 %v8493_v32, %v6399_v57  ;;  %v4604_v42 = vpop.f32.mrb[59].mxu1 }
 0x2da   : > { %v5168_v15 = vadd.f32 %v6537_v49, %v8299_v9  ;;  %v6539_v21 = vadd.f32 %v8497_v17, %v4604_v42 }
 0x2db   : > { %v6153_v19 = vpack.c.bf16 %v5170_v43, %v5170_v43  ;;  %v5171_v50 = vadd.f32 %v6538_v25, %v8299_v9 }
 0x2dc   : > { %v6151_v33 = vpack.c.bf16 %v5168_v15, %v5168_v15  ;;  %v5169_v10 = vadd.f32 %v6539_v21, %v8299_v9 }
 0x2dd   : > { %5491 = vst.msk [vmem:[%s8306_s5 + $0xe8] sm:$0xf] %vm5432_vm0, %v6153_v19  ;;  %v6154_v8 = vpack.c.bf16 %v5171_v50, %v5171_v50 }
 0x2de   : > { %5489 = vst.msk [vmem:[%s8306_s5 + $0xe0] sm:$0xf] %vm5432_vm0, %v6151_v33  ;;  %v6152_v56 = vpack.c.bf16 %v5169_v10, %v5169_v10  ;;  %v6402_v3 = vpop.f32.mrb[60].mxu1 }
 0x2df   : > { %5492 = vst.msk [vmem:[%s8306_s5 + $0xec] sm:$0xf] %vm5432_vm0, %v6154_v8  ;;  %v6540_v32 = vadd.f32 %v8507_v27, %v6402_v3  ;;  %v4617_v17 = vpop.f32.mrb[61].mxu1 }
 0x2e0   : > { %5490 = vst.msk [vmem:[%s8306_s5 + $0xe4] sm:$0xf] %vm5432_vm0, %v6152_v56  ;;  %v6541_v0 = vadd.f32 %v8512_v22, %v4617_v17  ;;  %v6403_v60 = vpop.f32.mrb[62].mxu1 }
 0x2e1   : > { %v5174_v12 = vadd.f32 %v6540_v32, %v8299_v9  ;;  %v6542_v46 = vadd.f32 %v8517_v54, %v6403_v60  ;;  %v4620_v11 = vpop.f32.mrb[63].mxu1 }
 0x2e2   : > { %v5172_v40 = vadd.f32 %v6541_v0, %v8299_v9  ;;  %v6543_v13 = vadd.f32 %v5029_v6, %v4620_v11 }
 0x2e3   : > { %v6157_v24 = vpack.c.bf16 %v5174_v12, %v5174_v12  ;;  %v5175_v23 = vadd.f32 %v6542_v46, %v8299_v9 }
 0x2e4   : > { %v6155_v27 = vpack.c.bf16 %v5172_v40, %v5172_v40  ;;  %v5173_v20 = vadd.f32 %v6543_v13, %v8299_v9 }
 0x2e5   : > { %5495 = vst.msk [vmem:[%s8306_s5 + $0xf8] sm:$0xf] %vm5432_vm0, %v6157_v24  ;;  %v6158_v47 = vpack.c.bf16 %v5175_v23, %v5175_v23 }
 0x2e6   : > { %5493 = vst.msk [vmem:[%s8306_s5 + $0xf0] sm:$0xf] %vm5432_vm0, %v6155_v27  ;;  %v6156_v22 = vpack.c.bf16 %v5173_v20, %v5173_v20 }
 0x2e7   : > { %5496 = vst.msk [vmem:[%s8306_s5 + $0xfc] sm:$0xf] %vm5432_vm0, %v6158_v47 }
 0x2e8   : > { %5494 = vst.msk [vmem:[%s8306_s5 + $0xf4] sm:$0xf] %vm5432_vm0, %v6156_v22 }
 0x2e9 PF: > { %s15_s19 = sadd.s32 1, %s6842_s19   ;;  %s8629_s17 = smov %s6838_s18 }
 0x2ea   : > { %p12_p5 = scmp.ge.s32.totalorder %s15_s19, 4   ;;  %s8630_s18 = smov %s8632_s0 }
 0x2ec   :  { %14 = sbr.rel (!%p12_p5) target bundleno = 2 (0x2), region = 92 }

</bundles_post_ra>
